<compile_context>
chip_gen: v5e
topology: v5e:2x2
jax: 0.10.0
libtpu: 0.0.40
codegen_flags: <defaults>
</compile_context>

<pallas_src>
import functools

import jax
import jax.numpy as jnp
from jax.experimental import pallas as pl
from jax.experimental.pallas import tpu as pltpu


# ----------------------------------------------------------------------------
# Small static helpers (all shapes are static under jit).
# ----------------------------------------------------------------------------
def _round_up(x, m):
    return ((x + m - 1) // m) * m


def _pick_row_tile(rows, cap=512):
    """Largest multiple-of-8 divisor of `rows` that is <= cap (rows is a mult of 8)."""
    best = 8
    for d in range(8, min(rows, cap) + 1, 8):
        if rows % d == 0:
            best = d
    return best


def _pick_time_chunk(s, cap=16):
    """Largest divisor of s that is <= cap."""
    best = 1
    for d in range(1, min(s, cap) + 1):
        if s % d == 0:
            best = d
    return best


# ----------------------------------------------------------------------------
# Hoisted input projection: (S*Bp, in_p) @ (in_p, 4Hp) + b  ->  (S*Bp, 4Hp)
# Time-independent, so it is one big matmul with a "parallel" row-tile grid.
# ----------------------------------------------------------------------------
def _proj_kernel(x_ref, w_ref, b_ref, o_ref):
    o_ref[...] = (
        jnp.dot(x_ref[...], w_ref[...], preferred_element_type=jnp.float32)
        + b_ref[...]
    )


def input_projection(x2d, w_ih_t, b):
    """x2d: (R, in_p); w_ih_t: (in_p, 4Hp); b: (1, 4Hp) -> (R, 4Hp). R % 8 == 0."""
    R, in_p = x2d.shape
    H4 = w_ih_t.shape[1]
    tm = _pick_row_tile(R)
    return pl.pallas_call(
        _proj_kernel,
        out_shape=jax.ShapeDtypeStruct((R, H4), jnp.float32),
        grid_spec=pltpu.PrefetchScalarGridSpec(
            num_scalar_prefetch=0,
            grid=(R // tm,),
            in_specs=[
                pl.BlockSpec((tm, in_p), lambda i: (i, 0)),
                pl.BlockSpec((in_p, H4), lambda i: (0, 0)),
                pl.BlockSpec((1, H4), lambda i: (0, 0)),
            ],
            out_specs=pl.BlockSpec((tm, H4), lambda i: (i, 0)),
        ),
        compiler_params=pltpu.CompilerParams(
            dimension_semantics=("parallel",),
            vmem_limit_bytes=64 * 1024 * 1024,
        ),
    )(x2d, w_ih_t, b)


# ----------------------------------------------------------------------------
# Recurrent kernel (intermediate layers): one grid step == one chunk of Tc
# timesteps.  h/c persist in VMEM scratch across the sequential grid axis.
# Gate order follows PyTorch nn.LSTM: [i, f, g, o] (each padded to Hp lanes).
# ----------------------------------------------------------------------------
def _lstm_rec_kernel(xp_ref, w_hh_ref, out_ref, h_sc, c_sc):
    @pl.when(pl.program_id(0) == 0)
    def _():
        h_sc[...] = jnp.zeros_like(h_sc)
        c_sc[...] = jnp.zeros_like(c_sc)

    h = h_sc[...]                       # (Bp, Hp)
    c = c_sc[...]                       # (Bp, Hp)
    w_hh = w_hh_ref[...]                # (Hp, 4Hp)
    Hp = h.shape[-1]

    for t in range(xp_ref.shape[0]):    # static unroll over the time chunk
        gates = xp_ref[t] + jnp.dot(h, w_hh, preferred_element_type=jnp.float32)
        i_g = jax.nn.sigmoid(gates[:, 0 * Hp:1 * Hp])
        f_g = jax.nn.sigmoid(gates[:, 1 * Hp:2 * Hp])
        g_g = jnp.tanh(gates[:, 2 * Hp:3 * Hp])
        o_g = jax.nn.sigmoid(gates[:, 3 * Hp:4 * Hp])
        c = f_g * c + i_g * g_g
        h = o_g * jnp.tanh(c)
        out_ref[t] = h

    h_sc[...] = h
    c_sc[...] = c


def lstm_recurrent(xp, w_hh_t, tc):
    """xp: (S, Bp, 4Hp); w_hh_t: (Hp, 4Hp) -> full sequence (S, Bp, Hp)."""
    S, Bp, H4 = xp.shape
    Hp = w_hh_t.shape[0]
    return pl.pallas_call(
        _lstm_rec_kernel,
        out_shape=jax.ShapeDtypeStruct((S, Bp, Hp), jnp.float32),
        grid_spec=pltpu.PrefetchScalarGridSpec(
            num_scalar_prefetch=0,
            grid=(S // tc,),
            in_specs=[
                pl.BlockSpec((tc, Bp, H4), lambda s: (s, 0, 0)),
                pl.BlockSpec((Hp, H4), lambda s: (0, 0)),
            ],
            out_specs=pl.BlockSpec((tc, Bp, Hp), lambda s: (s, 0, 0)),
            scratch_shapes=[
                pltpu.VMEM((Bp, Hp), jnp.float32),
                pltpu.VMEM((Bp, Hp), jnp.float32),
            ],
        ),
        compiler_params=pltpu.CompilerParams(
            dimension_semantics=("arbitrary",),
            vmem_limit_bytes=64 * 1024 * 1024,
        ),
    )(xp, w_hh_t)


# ----------------------------------------------------------------------------
# Recurrent kernel for the LAST layer: identical recurrence but no (S,B,H)
# sequence output; the fc layer is fused and applied to the final hidden state
# under @pl.when(last chunk), writing only the (Bp, Op) result.
# ----------------------------------------------------------------------------
def _lstm_rec_fc_kernel(xp_ref, w_hh_ref, w_fc_ref, b_fc_ref, out_ref, h_sc, c_sc):
    @pl.when(pl.program_id(0) == 0)
    def _():
        h_sc[...] = jnp.zeros_like(h_sc)
        c_sc[...] = jnp.zeros_like(c_sc)

    h = h_sc[...]
    c = c_sc[...]
    w_hh = w_hh_ref[...]
    Hp = h.shape[-1]

    for t in range(xp_ref.shape[0]):    # static unroll over the time chunk
        gates = xp_ref[t] + jnp.dot(h, w_hh, preferred_element_type=jnp.float32)
        i_g = jax.nn.sigmoid(gates[:, 0 * Hp:1 * Hp])
        f_g = jax.nn.sigmoid(gates[:, 1 * Hp:2 * Hp])
        g_g = jnp.tanh(gates[:, 2 * Hp:3 * Hp])
        o_g = jax.nn.sigmoid(gates[:, 3 * Hp:4 * Hp])
        c = f_g * c + i_g * g_g
        h = o_g * jnp.tanh(c)

    h_sc[...] = h
    c_sc[...] = c

    @pl.when(pl.program_id(0) == pl.num_programs(0) - 1)
    def _():
        out_ref[...] = (
            jnp.dot(h, w_fc_ref[...], preferred_element_type=jnp.float32)
            + b_fc_ref[...]
        )


def lstm_recurrent_fc(xp, w_hh_t, w_fc_t, b_fc, tc):
    """xp: (S, Bp, 4Hp) -> fc(last hidden state): (Bp, Op)."""
    S, Bp, H4 = xp.shape
    Hp = w_hh_t.shape[0]
    Op = w_fc_t.shape[1]
    return pl.pallas_call(
        _lstm_rec_fc_kernel,
        out_shape=jax.ShapeDtypeStruct((Bp, Op), jnp.float32),
        grid_spec=pltpu.PrefetchScalarGridSpec(
            num_scalar_prefetch=0,
            grid=(S // tc,),
            in_specs=[
                pl.BlockSpec((tc, Bp, H4), lambda s: (s, 0, 0)),
                pl.BlockSpec((Hp, H4), lambda s: (0, 0)),
                pl.BlockSpec((Hp, Op), lambda s: (0, 0)),
                pl.BlockSpec((1, Op), lambda s: (0, 0)),
            ],
            out_specs=pl.BlockSpec((Bp, Op), lambda s: (0, 0)),
            scratch_shapes=[
                pltpu.VMEM((Bp, Hp), jnp.float32),
                pltpu.VMEM((Bp, Hp), jnp.float32),
            ],
        ),
        compiler_params=pltpu.CompilerParams(
            dimension_semantics=("arbitrary",),
            vmem_limit_bytes=64 * 1024 * 1024,
        ),
    )(xp, w_hh_t, w_fc_t, b_fc)


# ----------------------------------------------------------------------------
# Parameter construction (PyTorch-like layout) + zero-padding to TPU tiles.
# ----------------------------------------------------------------------------
def init_params(key, input_size, hidden_size, num_layers, output_size):
    """Uniform(-1/sqrt(H), 1/sqrt(H)) init mimicking nn.LSTM / nn.Linear."""
    bound = 1.0 / (hidden_size ** 0.5)
    layers = []
    for layer in range(num_layers):
        in_sz = input_size if layer == 0 else hidden_size
        key, k1, k2, k3, k4 = jax.random.split(key, 5)
        w_ih = jax.random.uniform(k1, (4 * hidden_size, in_sz),
                                  minval=-bound, maxval=bound, dtype=jnp.float32)
        w_hh = jax.random.uniform(k2, (4 * hidden_size, hidden_size),
                                  minval=-bound, maxval=bound, dtype=jnp.float32)
        b_ih = jax.random.uniform(k3, (4 * hidden_size,),
                                  minval=-bound, maxval=bound, dtype=jnp.float32)
        b_hh = jax.random.uniform(k4, (4 * hidden_size,),
                                  minval=-bound, maxval=bound, dtype=jnp.float32)
        layers.append({"w_ih": w_ih, "w_hh": w_hh, "b": b_ih + b_hh})
    key, k5, k6 = jax.random.split(key, 3)
    fc_w = jax.random.uniform(k5, (output_size, hidden_size),
                              minval=-bound, maxval=bound, dtype=jnp.float32)
    fc_b = jax.random.uniform(k6, (output_size,),
                              minval=-bound, maxval=bound, dtype=jnp.float32)
    return {"layers": layers, "fc_w": fc_w, "fc_b": fc_b}


def _pad_gate_rows(w, H, Hp):
    """(4H, cols) -> (4Hp, cols): pad each of the [i,f,g,o] gate blocks to Hp rows."""
    cols = w.shape[1]
    w4 = w.reshape(4, H, cols)
    w4 = jnp.pad(w4, ((0, 0), (0, Hp - H), (0, 0)))
    return w4.reshape(4 * Hp, cols)


def pad_params(params, input_size, hidden_size, output_size):
    """Transpose + zero-pad weights so padded h/c columns stay exactly zero."""
    H = hidden_size
    Hp = _round_up(H, 128)
    Ip = _round_up(input_size, 128)
    Op = _round_up(output_size, 128)
    layers_p = []
    for li, lp in enumerate(params["layers"]):
        in_sz = input_size if li == 0 else H
        in_p = Ip if li == 0 else Hp
        w_ih = _pad_gate_rows(lp["w_ih"], H, Hp)            # (4Hp, in_sz)
        w_ih = jnp.pad(w_ih, ((0, 0), (0, in_p - in_sz)))   # (4Hp, in_p)
        w_hh = _pad_gate_rows(lp["w_hh"], H, Hp)            # (4Hp, H)
        w_hh = jnp.pad(w_hh, ((0, 0), (0, Hp - H)))         # (4Hp, Hp)
        b = jnp.pad(lp["b"].reshape(4, H), ((0, 0), (0, Hp - H))).reshape(1, 4 * Hp)
        layers_p.append({"w_ih_t": w_ih.T, "w_hh_t": w_hh.T, "b": b})
    fc_w = jnp.pad(params["fc_w"],
                   ((0, Op - output_size), (0, Hp - H)))    # (Op, Hp)
    fc_b = jnp.pad(params["fc_b"], (0, Op - output_size)).reshape(1, Op)
    return {"layers": layers_p, "fc_w_t": fc_w.T, "fc_b": fc_b}


# ----------------------------------------------------------------------------
# Full LSTM_Network forward.
# ----------------------------------------------------------------------------
@functools.partial(jax.jit, static_argnames=("output_size",))
def lstm_network_forward(x_bsf, padded_params, *, output_size):
    """x_bsf: (B, S, input_size), batch_first like PyTorch -> (B, output_size)."""
    B, S, I = x_bsf.shape
    layers = padded_params["layers"]
    Ip = layers[0]["w_ih_t"].shape[0]
    Hp = layers[0]["w_hh_t"].shape[0]
    Bp = _round_up(B, 8)

    # (B, S, I) -> (S, Bp, Ip), zero-padded to 8-sublane / 128-lane tiles.
    x = jnp.transpose(x_bsf, (1, 0, 2))
    x = jnp.pad(x, ((0, 0), (0, Bp - B), (0, Ip - I)))

    tc = _pick_time_chunk(S)
    n_layers = len(layers)
    out = None
    for li, lp in enumerate(layers):
        in_p = x.shape[-1]
        # Hoisted, time-independent input projection (+ fused bias) as one matmul.
        xp = input_projection(x.reshape(S * Bp, in_p), lp["w_ih_t"], lp["b"])
        xp = xp.reshape(S, Bp, 4 * Hp)
        if li + 1 < n_layers:
            x = lstm_recurrent(xp, lp["w_hh_t"], tc)                    # (S, Bp, Hp)
        else:
            out = lstm_recurrent_fc(xp, lp["w_hh_t"],
                                    padded_params["fc_w_t"],
                                    padded_params["fc_b"], tc)          # (Bp, Op)
    return out[:B, :output_size]


# ----------------------------------------------------------------------------
# Pure-JAX reference (unpadded, same math) for a correctness check.
# ----------------------------------------------------------------------------
def reference_forward(x_bsf, params):
    x = jnp.transpose(x_bsf, (1, 0, 2)).astype(jnp.float32)
    for lp in params["layers"]:
        w_ih_t, w_hh_t, b = lp["w_ih"].T, lp["w_hh"].T, lp["b"][None, :]
        S, B, _ = x.shape
        H = lp["w_hh"].shape[1]
        h = jnp.zeros((B, H), jnp.float32)
        c = jnp.zeros((B, H), jnp.float32)
        outs = []
        for t in range(S):
            gates = x[t] @ w_ih_t + h @ w_hh_t + b
            i_g = jax.nn.sigmoid(gates[:, 0 * H:1 * H])
            f_g = jax.nn.sigmoid(gates[:, 1 * H:2 * H])
            g_g = jnp.tanh(gates[:, 2 * H:3 * H])
            o_g = jax.nn.sigmoid(gates[:, 3 * H:4 * H])
            c = f_g * c + i_g * g_g
            h = o_g * jnp.tanh(c)
            outs.append(h)
        x = jnp.stack(outs, axis=0)
    return x[-1] @ params["fc_w"].T + params["fc_b"][None, :]


if __name__ == "__main__":
    input_size, hidden_size, num_layers, output_size = 16, 32, 2, 4
    batch, seq = 2, 8

    key = jax.random.PRNGKey(0)
    key, kp, kx = jax.random.split(key, 3)
    params = init_params(kp, input_size, hidden_size, num_layers, output_size)
    padded = pad_params(params, input_size, hidden_size, output_size)
    x = jax.random.normal(kx, (batch, seq, input_size), dtype=jnp.float32)

    out = lstm_network_forward(x, padded, output_size=output_size)
    out = jax.block_until_ready(out)

    ref = reference_forward(x, params)
    assert out.shape == (batch, output_size)
    # Tolerance covers f32 reassociation from padded/hoisted matmuls vs. the
    # unpadded step-by-step reference.
    assert jnp.allclose(out, ref, atol=2e-4, rtol=2e-4), "Pallas output mismatch"

    print("KERNEL_OK")
</pallas_src>

<mosaic_0001>
module attributes {stable_mosaic.version = 11 : i64} {
  func.func @_proj_kernel(%arg0: i32, %arg1: memref<64x128xf32, #tpu.memory_space<vmem>>, %arg2: memref<128x512xf32, #tpu.memory_space<vmem>>, %arg3: memref<1x512xf32, #tpu.memory_space<vmem>>, %arg4: memref<64x512xf32, #tpu.memory_space<vmem>>) attributes {dimension_semantics = [#tpu.dimension_semantics<parallel>], iteration_bounds = array<i64: 1>, scalar_prefetch = 0 : i64, scratch_operands = 0 : i64, tpu.core_type = #tpu.core_type<tc>, window_params = [{transform_indices = @transform_0, window_bounds = array<i64: 64, 128>}, {pipeline_mode = #tpu.pipeline_mode<synchronous>, transform_indices = @transform_1, window_bounds = array<i64: 128, 512>}, {pipeline_mode = #tpu.pipeline_mode<synchronous>, transform_indices = @transform_2, window_bounds = array<i64: 1, 512>}, {transform_indices = @transform_3, window_bounds = array<i64: 64, 512>}]} {
    %c0 = arith.constant 0 : index
    %c0_0 = arith.constant 0 : index
    %0 = vector.load %arg1[%c0, %c0_0] : memref<64x128xf32, #tpu.memory_space<vmem>>, vector<64x128xf32>
    %c0_1 = arith.constant 0 : index
    %c0_2 = arith.constant 0 : index
    %1 = vector.load %arg2[%c0_1, %c0_2] : memref<128x512xf32, #tpu.memory_space<vmem>>, vector<128x512xf32>
    %cst = arith.constant dense<0.000000e+00> : vector<64x512xf32>
    %2 = tpu.matmul %0, %1, %cst {dimension_numbers = #tpu.dot_dimension_numbers<[1], [0], [0], [1], [0, 0, 1, 1], [], []>} : vector<64x128xf32>, vector<128x512xf32>, vector<64x512xf32> -> vector<64x512xf32>
    %c0_3 = arith.constant 0 : index
    %c0_4 = arith.constant 0 : index
    %3 = vector.load %arg3[%c0_3, %c0_4] : memref<1x512xf32, #tpu.memory_space<vmem>>, vector<1x512xf32>
    %4 = vector.broadcast %3 : vector<1x512xf32> to vector<64x512xf32>
    %5 = arith.addf %2, %4 : vector<64x512xf32>
    %c0_5 = arith.constant 0 : index
    %c0_6 = arith.constant 0 : index
    %6 = vector.load %arg4[%c0_5, %c0_6] : memref<64x512xf32, #tpu.memory_space<vmem>>, vector<64x512xf32>
    tpu.vector_store %arg4[%c0_5, %c0_6], %5 {strides = array<i32>} : memref<64x512xf32, #tpu.memory_space<vmem>>, vector<64x512xf32>,
    return
  }
  func.func @transform_0(%arg0: i32) -> (i32, i32) {
    %c0_i32 = arith.constant 0 : i32
    %c0_i32_0 = arith.constant 0 : i32
    return %arg0, %c0_i32 : i32, i32
  }
  func.func @transform_1(%arg0: i32) -> (i32, i32) {
    %c0_i32 = arith.constant 0 : i32
    %c0_i32_0 = arith.constant 0 : i32
    %c0_i32_1 = arith.constant 0 : i32
    return %c0_i32, %c0_i32_0 : i32, i32
  }
  func.func @transform_2(%arg0: i32) -> (i32, i32) {
    %c0_i32 = arith.constant 0 : i32
    %c0_i32_0 = arith.constant 0 : i32
    %c0_i32_1 = arith.constant 0 : i32
    return %c0_i32, %c0_i32_0 : i32, i32
  }
  func.func @transform_3(%arg0: i32) -> (i32, i32) {
    %c0_i32 = arith.constant 0 : i32
    %c0_i32_0 = arith.constant 0 : i32
    return %arg0, %c0_i32 : i32, i32
  }
}

module attributes {stable_mosaic.version = 11 : i64} {
  func.func @_lstm_rec_kernel(%arg0: i32, %arg1: memref<8x8x512xf32, #tpu.memory_space<vmem>>, %arg2: memref<128x512xf32, #tpu.memory_space<vmem>>, %arg3: memref<8x8x128xf32, #tpu.memory_space<vmem>>, %arg4: memref<8x128xf32, #tpu.memory_space<vmem>>, %arg5: memref<8x128xf32, #tpu.memory_space<vmem>>) attributes {dimension_semantics = [#tpu.dimension_semantics<arbitrary>], iteration_bounds = array<i64: 1>, scalar_prefetch = 0 : i64, scratch_operands = 2 : i64, tpu.core_type = #tpu.core_type<tc>, window_params = [{transform_indices = @transform_0, window_bounds = array<i64: 8, 8, 512>}, {pipeline_mode = #tpu.pipeline_mode<synchronous>, transform_indices = @transform_1, window_bounds = array<i64: 128, 512>}, {transform_indices = @transform_2, window_bounds = array<i64: 8, 8, 128>}]} {
    %c0_i32 = arith.constant 0 : i32
    %0 = arith.cmpi eq, %arg0, %c0_i32 : i32
    %1 = arith.extui %0 : i1 to i32
    %c0_i32_0 = arith.constant 0 : i32
    %2 = arith.cmpi ne, %1, %c0_i32_0 : i32
    scf.if %2 {
      %cst_82 = arith.constant 0.000000e+00 : f32
      %264 = vector.broadcast %cst_82 : f32 to vector<8x128xf32>
      %c0_83 = arith.constant 0 : index
      %c0_84 = arith.constant 0 : index
      %265 = vector.load %arg4[%c0_83, %c0_84] : memref<8x128xf32, #tpu.memory_space<vmem>>, vector<8x128xf32>
      tpu.vector_store %arg4[%c0_83, %c0_84], %264 {strides = array<i32>} : memref<8x128xf32, #tpu.memory_space<vmem>>, vector<8x128xf32>,
      %cst_85 = arith.constant 0.000000e+00 : f32
      %266 = vector.broadcast %cst_85 : f32 to vector<8x128xf32>
      %c0_86 = arith.constant 0 : index
      %c0_87 = arith.constant 0 : index
      %267 = vector.load %arg5[%c0_86, %c0_87] : memref<8x128xf32, #tpu.memory_space<vmem>>, vector<8x128xf32>
      tpu.vector_store %arg5[%c0_86, %c0_87], %266 {strides = array<i32>} : memref<8x128xf32, #tpu.memory_space<vmem>>, vector<8x128xf32>,
    } else {
    }
    %c0 = arith.constant 0 : index
    %c0_1 = arith.constant 0 : index
    %3 = vector.load %arg4[%c0, %c0_1] : memref<8x128xf32, #tpu.memory_space<vmem>>, vector<8x128xf32>
    %c0_2 = arith.constant 0 : index
    %c0_3 = arith.constant 0 : index
    %4 = vector.load %arg5[%c0_2, %c0_3] : memref<8x128xf32, #tpu.memory_space<vmem>>, vector<8x128xf32>
    %c0_4 = arith.constant 0 : index
    %c0_5 = arith.constant 0 : index
    %5 = vector.load %arg2[%c0_4, %c0_5] : memref<128x512xf32, #tpu.memory_space<vmem>>, vector<128x512xf32>
    %c0_6 = arith.constant 0 : index
    %c0_7 = arith.constant 0 : index
    %c0_8 = arith.constant 0 : index
    %6 = vector.load %arg1[%c0_6, %c0_7, %c0_8] : memref<8x8x512xf32, #tpu.memory_space<vmem>>, vector<1x8x512xf32>
    %7 = vector.shape_cast %6 : vector<1x8x512xf32> to vector<8x512xf32>
    %cst = arith.constant dense<0.000000e+00> : vector<8x512xf32>
    %8 = tpu.matmul %3, %5, %cst {dimension_numbers = #tpu.dot_dimension_numbers<[1], [0], [0], [1], [0, 0, 1, 1], [], []>} : vector<8x128xf32>, vector<128x512xf32>, vector<8x512xf32> -> vector<8x512xf32>
    %9 = arith.addf %7, %8 : vector<8x512xf32>
    %10 = vector.extract_strided_slice %9 {offsets = [0, 0], sizes = [8, 128], strides = [1, 1]} : vector<8x512xf32> to vector<8x128xf32>
    %11 = arith.negf %10 : vector<8x128xf32>
    %12 = math.exp %11 : vector<8x128xf32>
    %cst_9 = arith.constant 1.000000e+00 : f32
    %13 = vector.broadcast %cst_9 : f32 to vector<8x128xf32>
    %14 = arith.addf %13, %12 : vector<8x128xf32>
    %15 = arith.divf %13, %14 : vector<8x128xf32>
    %16 = vector.extract_strided_slice %9 {offsets = [0, 128], sizes = [8, 128], strides = [1, 1]} : vector<8x512xf32> to vector<8x128xf32>
    %17 = arith.negf %16 : vector<8x128xf32>
    %18 = math.exp %17 : vector<8x128xf32>
    %cst_10 = arith.constant 1.000000e+00 : f32
    %19 = vector.broadcast %cst_10 : f32 to vector<8x128xf32>
    %20 = arith.addf %19, %18 : vector<8x128xf32>
    %21 = arith.divf %19, %20 : vector<8x128xf32>
    %22 = vector.extract_strided_slice %9 {offsets = [0, 256], sizes = [8, 128], strides = [1, 1]} : vector<8x512xf32> to vector<8x128xf32>
    %23 = math.tanh %22 : vector<8x128xf32>
    %24 = vector.extract_strided_slice %9 {offsets = [0, 384], sizes = [8, 128], strides = [1, 1]} : vector<8x512xf32> to vector<8x128xf32>
    %25 = arith.negf %24 : vector<8x128xf32>
    %26 = math.exp %25 : vector<8x128xf32>
    %cst_11 = arith.constant 1.000000e+00 : f32
    %27 = vector.broadcast %cst_11 : f32 to vector<8x128xf32>
    %28 = arith.addf %27, %26 : vector<8x128xf32>
    %29 = arith.divf %27, %28 : vector<8x128xf32>
    %30 = arith.mulf %21, %4 : vector<8x128xf32>
    %31 = arith.mulf %15, %23 : vector<8x128xf32>
    %32 = arith.addf %30, %31 : vector<8x128xf32>
    %33 = math.tanh %32 : vector<8x128xf32>
    %34 = arith.mulf %29, %33 : vector<8x128xf32>
    %c0_12 = arith.constant 0 : index
    %c0_13 = arith.constant 0 : index
    %c0_14 = arith.constant 0 : index
    %35 = vector.load %arg3[%c0_12, %c0_13, %c0_14] : memref<8x8x128xf32, #tpu.memory_space<vmem>>, vector<1x8x128xf32>
    %36 = vector.shape_cast %35 : vector<1x8x128xf32> to vector<8x128xf32>
    %37 = vector.shape_cast %34 : vector<8x128xf32> to vector<1x8x128xf32>
    tpu.vector_store %arg3[%c0_12, %c0_13, %c0_14], %37 {strides = array<i32>} : memref<8x8x128xf32, #tpu.memory_space<vmem>>, vector<1x8x128xf32>,
    %c1 = arith.constant 1 : index
    %c0_15 = arith.constant 0 : index
    %c0_16 = arith.constant 0 : index
    %38 = vector.load %arg1[%c1, %c0_15, %c0_16] : memref<8x8x512xf32, #tpu.memory_space<vmem>>, vector<1x8x512xf32>
    %39 = vector.shape_cast %38 : vector<1x8x512xf32> to vector<8x512xf32>
    %cst_17 = arith.constant dense<0.000000e+00> : vector<8x512xf32>
    %40 = tpu.matmul %34, %5, %cst_17 {dimension_numbers = #tpu.dot_dimension_numbers<[1], [0], [0], [1], [0, 0, 1, 1], [], []>} : vector<8x128xf32>, vector<128x512xf32>, vector<8x512xf32> -> vector<8x512xf32>
    %41 = arith.addf %39, %40 : vector<8x512xf32>
    %42 = vector.extract_strided_slice %41 {offsets = [0, 0], sizes = [8, 128], strides = [1, 1]} : vector<8x512xf32> to vector<8x128xf32>
    %43 = arith.negf %42 : vector<8x128xf32>
    %44 = math.exp %43 : vector<8x128xf32>
    %cst_18 = arith.constant 1.000000e+00 : f32
    %45 = vector.broadcast %cst_18 : f32 to vector<8x128xf32>
    %46 = arith.addf %45, %44 : vector<8x128xf32>
    %47 = arith.divf %45, %46 : vector<8x128xf32>
    %48 = vector.extract_strided_slice %41 {offsets = [0, 128], sizes = [8, 128], strides = [1, 1]} : vector<8x512xf32> to vector<8x128xf32>
    %49 = arith.negf %48 : vector<8x128xf32>
    %50 = math.exp %49 : vector<8x128xf32>
    %cst_19 = arith.constant 1.000000e+00 : f32
    %51 = vector.broadcast %cst_19 : f32 to vector<8x128xf32>
    %52 = arith.addf %51, %50 : vector<8x128xf32>
    %53 = arith.divf %51, %52 : vector<8x128xf32>
    %54 = vector.extract_strided_slice %41 {offsets = [0, 256], sizes = [8, 128], strides = [1, 1]} : vector<8x512xf32> to vector<8x128xf32>
    %55 = math.tanh %54 : vector<8x128xf32>
    %56 = vector.extract_strided_slice %41 {offsets = [0, 384], sizes = [8, 128], strides = [1, 1]} : vector<8x512xf32> to vector<8x128xf32>
    %57 = arith.negf %56 : vector<8x128xf32>
    %58 = math.exp %57 : vector<8x128xf32>
    %cst_20 = arith.constant 1.000000e+00 : f32
    %59 = vector.broadcast %cst_20 : f32 to vector<8x128xf32>
    %60 = arith.addf %59, %58 : vector<8x128xf32>
    %61 = arith.divf %59, %60 : vector<8x128xf32>
    %62 = arith.mulf %53, %32 : vector<8x128xf32>
    %63 = arith.mulf %47, %55 : vector<8x128xf32>
    %64 = arith.addf %62, %63 : vector<8x128xf32>
    %65 = math.tanh %64 : vector<8x128xf32>
    %66 = arith.mulf %61, %65 : vector<8x128xf32>
    %c1_21 = arith.constant 1 : index
    %c0_22 = arith.constant 0 : index
    %c0_23 = arith.constant 0 : index
    %67 = vector.load %arg3[%c1_21, %c0_22, %c0_23] : memref<8x8x128xf32, #tpu.memory_space<vmem>>, vector<1x8x128xf32>
    %68 = vector.shape_cast %67 : vector<1x8x128xf32> to vector<8x128xf32>
    %69 = vector.shape_cast %66 : vector<8x128xf32> to vector<1x8x128xf32>
    tpu.vector_store %arg3[%c1_21, %c0_22, %c0_23], %69 {strides = array<i32>} : memref<8x8x128xf32, #tpu.memory_space<vmem>>, vector<1x8x128xf32>,
    %c2 = arith.constant 2 : index
    %c0_24 = arith.constant 0 : index
    %c0_25 = arith.constant 0 : index
    %70 = vector.load %arg1[%c2, %c0_24, %c0_25] : memref<8x8x512xf32, #tpu.memory_space<vmem>>, vector<1x8x512xf32>
    %71 = vector.shape_cast %70 : vector<1x8x512xf32> to vector<8x512xf32>
    %cst_26 = arith.constant dense<0.000000e+00> : vector<8x512xf32>
    %72 = tpu.matmul %66, %5, %cst_26 {dimension_numbers = #tpu.dot_dimension_numbers<[1], [0], [0], [1], [0, 0, 1, 1], [], []>} : vector<8x128xf32>, vector<128x512xf32>, vector<8x512xf32> -> vector<8x512xf32>
    %73 = arith.addf %71, %72 : vector<8x512xf32>
    %74 = vector.extract_strided_slice %73 {offsets = [0, 0], sizes = [8, 128], strides = [1, 1]} : vector<8x512xf32> to vector<8x128xf32>
    %75 = arith.negf %74 : vector<8x128xf32>
    %76 = math.exp %75 : vector<8x128xf32>
    %cst_27 = arith.constant 1.000000e+00 : f32
    %77 = vector.broadcast %cst_27 : f32 to vector<8x128xf32>
    %78 = arith.addf %77, %76 : vector<8x128xf32>
    %79 = arith.divf %77, %78 : vector<8x128xf32>
    %80 = vector.extract_strided_slice %73 {offsets = [0, 128], sizes = [8, 128], strides = [1, 1]} : vector<8x512xf32> to vector<8x128xf32>
    %81 = arith.negf %80 : vector<8x128xf32>
    %82 = math.exp %81 : vector<8x128xf32>
    %cst_28 = arith.constant 1.000000e+00 : f32
    %83 = vector.broadcast %cst_28 : f32 to vector<8x128xf32>
    %84 = arith.addf %83, %82 : vector<8x128xf32>
    %85 = arith.divf %83, %84 : vector<8x128xf32>
    %86 = vector.extract_strided_slice %73 {offsets = [0, 256], sizes = [8, 128], strides = [1, 1]} : vector<8x512xf32> to vector<8x128xf32>
    %87 = math.tanh %86 : vector<8x128xf32>
    %88 = vector.extract_strided_slice %73 {offsets = [0, 384], sizes = [8, 128], strides = [1, 1]} : vector<8x512xf32> to vector<8x128xf32>
    %89 = arith.negf %88 : vector<8x128xf32>
    %90 = math.exp %89 : vector<8x128xf32>
    %cst_29 = arith.constant 1.000000e+00 : f32
    %91 = vector.broadcast %cst_29 : f32 to vector<8x128xf32>
    %92 = arith.addf %91, %90 : vector<8x128xf32>
    %93 = arith.divf %91, %92 : vector<8x128xf32>
    %94 = arith.mulf %85, %64 : vector<8x128xf32>
    %95 = arith.mulf %79, %87 : vector<8x128xf32>
    %96 = arith.addf %94, %95 : vector<8x128xf32>
    %97 = math.tanh %96 : vector<8x128xf32>
    %98 = arith.mulf %93, %97 : vector<8x128xf32>
    %c2_30 = arith.constant 2 : index
    %c0_31 = arith.constant 0 : index
    %c0_32 = arith.constant 0 : index
    %99 = vector.load %arg3[%c2_30, %c0_31, %c0_32] : memref<8x8x128xf32, #tpu.memory_space<vmem>>, vector<1x8x128xf32>
    %100 = vector.shape_cast %99 : vector<1x8x128xf32> to vector<8x128xf32>
    %101 = vector.shape_cast %98 : vector<8x128xf32> to vector<1x8x128xf32>
    tpu.vector_store %arg3[%c2_30, %c0_31, %c0_32], %101 {strides = array<i32>} : memref<8x8x128xf32, #tpu.memory_space<vmem>>, vector<1x8x128xf32>,
    %c3 = arith.constant 3 : index
    %c0_33 = arith.constant 0 : index
    %c0_34 = arith.constant 0 : index
    %102 = vector.load %arg1[%c3, %c0_33, %c0_34] : memref<8x8x512xf32, #tpu.memory_space<vmem>>, vector<1x8x512xf32>
    %103 = vector.shape_cast %102 : vector<1x8x512xf32> to vector<8x512xf32>
    %cst_35 = arith.constant dense<0.000000e+00> : vector<8x512xf32>
    %104 = tpu.matmul %98, %5, %cst_35 {dimension_numbers = #tpu.dot_dimension_numbers<[1], [0], [0], [1], [0, 0, 1, 1], [], []>} : vector<8x128xf32>, vector<128x512xf32>, vector<8x512xf32> -> vector<8x512xf32>
    %105 = arith.addf %103, %104 : vector<8x512xf32>
    %106 = vector.extract_strided_slice %105 {offsets = [0, 0], sizes = [8, 128], strides = [1, 1]} : vector<8x512xf32> to vector<8x128xf32>
    %107 = arith.negf %106 : vector<8x128xf32>
    %108 = math.exp %107 : vector<8x128xf32>
    %cst_36 = arith.constant 1.000000e+00 : f32
    %109 = vector.broadcast %cst_36 : f32 to vector<8x128xf32>
    %110 = arith.addf %109, %108 : vector<8x128xf32>
    %111 = arith.divf %109, %110 : vector<8x128xf32>
    %112 = vector.extract_strided_slice %105 {offsets = [0, 128], sizes = [8, 128], strides = [1, 1]} : vector<8x512xf32> to vector<8x128xf32>
    %113 = arith.negf %112 : vector<8x128xf32>
    %114 = math.exp %113 : vector<8x128xf32>
    %cst_37 = arith.constant 1.000000e+00 : f32
    %115 = vector.broadcast %cst_37 : f32 to vector<8x128xf32>
    %116 = arith.addf %115, %114 : vector<8x128xf32>
    %117 = arith.divf %115, %116 : vector<8x128xf32>
    %118 = vector.extract_strided_slice %105 {offsets = [0, 256], sizes = [8, 128], strides = [1, 1]} : vector<8x512xf32> to vector<8x128xf32>
    %119 = math.tanh %118 : vector<8x128xf32>
    %120 = vector.extract_strided_slice %105 {offsets = [0, 384], sizes = [8, 128], strides = [1, 1]} : vector<8x512xf32> to vector<8x128xf32>
    %121 = arith.negf %120 : vector<8x128xf32>
    %122 = math.exp %121 : vector<8x128xf32>
    %cst_38 = arith.constant 1.000000e+00 : f32
    %123 = vector.broadcast %cst_38 : f32 to vector<8x128xf32>
    %124 = arith.addf %123, %122 : vector<8x128xf32>
    %125 = arith.divf %123, %124 : vector<8x128xf32>
    %126 = arith.mulf %117, %96 : vector<8x128xf32>
    %127 = arith.mulf %111, %119 : vector<8x128xf32>
    %128 = arith.addf %126, %127 : vector<8x128xf32>
    %129 = math.tanh %128 : vector<8x128xf32>
    %130 = arith.mulf %125, %129 : vector<8x128xf32>
    %c3_39 = arith.constant 3 : index
    %c0_40 = arith.constant 0 : index
    %c0_41 = arith.constant 0 : index
    %131 = vector.load %arg3[%c3_39, %c0_40, %c0_41] : memref<8x8x128xf32, #tpu.memory_space<vmem>>, vector<1x8x128xf32>
    %132 = vector.shape_cast %131 : vector<1x8x128xf32> to vector<8x128xf32>
    %133 = vector.shape_cast %130 : vector<8x128xf32> to vector<1x8x128xf32>
    tpu.vector_store %arg3[%c3_39, %c0_40, %c0_41], %133 {strides = array<i32>} : memref<8x8x128xf32, #tpu.memory_space<vmem>>, vector<1x8x128xf32>,
    %c4 = arith.constant 4 : index
    %c0_42 = arith.constant 0 : index
    %c0_43 = arith.constant 0 : index
    %134 = vector.load %arg1[%c4, %c0_42, %c0_43] : memref<8x8x512xf32, #tpu.memory_space<vmem>>, vector<1x8x512xf32>
    %135 = vector.shape_cast %134 : vector<1x8x512xf32> to vector<8x512xf32>
    %cst_44 = arith.constant dense<0.000000e+00> : vector<8x512xf32>
    %136 = tpu.matmul %130, %5, %cst_44 {dimension_numbers = #tpu.dot_dimension_numbers<[1], [0], [0], [1], [0, 0, 1, 1], [], []>} : vector<8x128xf32>, vector<128x512xf32>, vector<8x512xf32> -> vector<8x512xf32>
    %137 = arith.addf %135, %136 : vector<8x512xf32>
    %138 = vector.extract_strided_slice %137 {offsets = [0, 0], sizes = [8, 128], strides = [1, 1]} : vector<8x512xf32> to vector<8x128xf32>
    %139 = arith.negf %138 : vector<8x128xf32>
    %140 = math.exp %139 : vector<8x128xf32>
    %cst_45 = arith.constant 1.000000e+00 : f32
    %141 = vector.broadcast %cst_45 : f32 to vector<8x128xf32>
    %142 = arith.addf %141, %140 : vector<8x128xf32>
    %143 = arith.divf %141, %142 : vector<8x128xf32>
    %144 = vector.extract_strided_slice %137 {offsets = [0, 128], sizes = [8, 128], strides = [1, 1]} : vector<8x512xf32> to vector<8x128xf32>
    %145 = arith.negf %144 : vector<8x128xf32>
    %146 = math.exp %145 : vector<8x128xf32>
    %cst_46 = arith.constant 1.000000e+00 : f32
    %147 = vector.broadcast %cst_46 : f32 to vector<8x128xf32>
    %148 = arith.addf %147, %146 : vector<8x128xf32>
    %149 = arith.divf %147, %148 : vector<8x128xf32>
    %150 = vector.extract_strided_slice %137 {offsets = [0, 256], sizes = [8, 128], strides = [1, 1]} : vector<8x512xf32> to vector<8x128xf32>
    %151 = math.tanh %150 : vector<8x128xf32>
    %152 = vector.extract_strided_slice %137 {offsets = [0, 384], sizes = [8, 128], strides = [1, 1]} : vector<8x512xf32> to vector<8x128xf32>
    %153 = arith.negf %152 : vector<8x128xf32>
    %154 = math.exp %153 : vector<8x128xf32>
    %cst_47 = arith.constant 1.000000e+00 : f32
    %155 = vector.broadcast %cst_47 : f32 to vector<8x128xf32>
    %156 = arith.addf %155, %154 : vector<8x128xf32>
    %157 = arith.divf %155, %156 : vector<8x128xf32>
    %158 = arith.mulf %149, %128 : vector<8x128xf32>
    %159 = arith.mulf %143, %151 : vector<8x128xf32>
    %160 = arith.addf %158, %159 : vector<8x128xf32>
    %161 = math.tanh %160 : vector<8x128xf32>
    %162 = arith.mulf %157, %161 : vector<8x128xf32>
    %c4_48 = arith.constant 4 : index
    %c0_49 = arith.constant 0 : index
    %c0_50 = arith.constant 0 : index
    %163 = vector.load %arg3[%c4_48, %c0_49, %c0_50] : memref<8x8x128xf32, #tpu.memory_space<vmem>>, vector<1x8x128xf32>
    %164 = vector.shape_cast %163 : vector<1x8x128xf32> to vector<8x128xf32>
    %165 = vector.shape_cast %162 : vector<8x128xf32> to vector<1x8x128xf32>
    tpu.vector_store %arg3[%c4_48, %c0_49, %c0_50], %165 {strides = array<i32>} : memref<8x8x128xf32, #tpu.memory_space<vmem>>, vector<1x8x128xf32>,
    %c5 = arith.constant 5 : index
    %c0_51 = arith.constant 0 : index
    %c0_52 = arith.constant 0 : index
    %166 = vector.load %arg1[%c5, %c0_51, %c0_52] : memref<8x8x512xf32, #tpu.memory_space<vmem>>, vector<1x8x512xf32>
    %167 = vector.shape_cast %166 : vector<1x8x512xf32> to vector<8x512xf32>
    %cst_53 = arith.constant dense<0.000000e+00> : vector<8x512xf32>
    %168 = tpu.matmul %162, %5, %cst_53 {dimension_numbers = #tpu.dot_dimension_numbers<[1], [0], [0], [1], [0, 0, 1, 1], [], []>} : vector<8x128xf32>, vector<128x512xf32>, vector<8x512xf32> -> vector<8x512xf32>
    %169 = arith.addf %167, %168 : vector<8x512xf32>
    %170 = vector.extract_strided_slice %169 {offsets = [0, 0], sizes = [8, 128], strides = [1, 1]} : vector<8x512xf32> to vector<8x128xf32>
    %171 = arith.negf %170 : vector<8x128xf32>
    %172 = math.exp %171 : vector<8x128xf32>
    %cst_54 = arith.constant 1.000000e+00 : f32
    %173 = vector.broadcast %cst_54 : f32 to vector<8x128xf32>
    %174 = arith.addf %173, %172 : vector<8x128xf32>
    %175 = arith.divf %173, %174 : vector<8x128xf32>
    %176 = vector.extract_strided_slice %169 {offsets = [0, 128], sizes = [8, 128], strides = [1, 1]} : vector<8x512xf32> to vector<8x128xf32>
    %177 = arith.negf %176 : vector<8x128xf32>
    %178 = math.exp %177 : vector<8x128xf32>
    %cst_55 = arith.constant 1.000000e+00 : f32
    %179 = vector.broadcast %cst_55 : f32 to vector<8x128xf32>
    %180 = arith.addf %179, %178 : vector<8x128xf32>
    %181 = arith.divf %179, %180 : vector<8x128xf32>
    %182 = vector.extract_strided_slice %169 {offsets = [0, 256], sizes = [8, 128], strides = [1, 1]} : vector<8x512xf32> to vector<8x128xf32>
    %183 = math.tanh %182 : vector<8x128xf32>
    %184 = vector.extract_strided_slice %169 {offsets = [0, 384], sizes = [8, 128], strides = [1, 1]} : vector<8x512xf32> to vector<8x128xf32>
    %185 = arith.negf %184 : vector<8x128xf32>
    %186 = math.exp %185 : vector<8x128xf32>
    %cst_56 = arith.constant 1.000000e+00 : f32
    %187 = vector.broadcast %cst_56 : f32 to vector<8x128xf32>
    %188 = arith.addf %187, %186 : vector<8x128xf32>
    %189 = arith.divf %187, %188 : vector<8x128xf32>
    %190 = arith.mulf %181, %160 : vector<8x128xf32>
    %191 = arith.mulf %175, %183 : vector<8x128xf32>
    %192 = arith.addf %190, %191 : vector<8x128xf32>
    %193 = math.tanh %192 : vector<8x128xf32>
    %194 = arith.mulf %189, %193 : vector<8x128xf32>
    %c5_57 = arith.constant 5 : index
    %c0_58 = arith.constant 0 : index
    %c0_59 = arith.constant 0 : index
    %195 = vector.load %arg3[%c5_57, %c0_58, %c0_59] : memref<8x8x128xf32, #tpu.memory_space<vmem>>, vector<1x8x128xf32>
    %196 = vector.shape_cast %195 : vector<1x8x128xf32> to vector<8x128xf32>
    %197 = vector.shape_cast %194 : vector<8x128xf32> to vector<1x8x128xf32>
    tpu.vector_store %arg3[%c5_57, %c0_58, %c0_59], %197 {strides = array<i32>} : memref<8x8x128xf32, #tpu.memory_space<vmem>>, vector<1x8x128xf32>,
    %c6 = arith.constant 6 : index
    %c0_60 = arith.constant 0 : index
    %c0_61 = arith.constant 0 : index
    %198 = vector.load %arg1[%c6, %c0_60, %c0_61] : memref<8x8x512xf32, #tpu.memory_space<vmem>>, vector<1x8x512xf32>
    %199 = vector.shape_cast %198 : vector<1x8x512xf32> to vector<8x512xf32>
    %cst_62 = arith.constant dense<0.000000e+00> : vector<8x512xf32>
    %200 = tpu.matmul %194, %5, %cst_62 {dimension_numbers = #tpu.dot_dimension_numbers<[1], [0], [0], [1], [0, 0, 1, 1], [], []>} : vector<8x128xf32>, vector<128x512xf32>, vector<8x512xf32> -> vector<8x512xf32>
    %201 = arith.addf %199, %200 : vector<8x512xf32>
    %202 = vector.extract_strided_slice %201 {offsets = [0, 0], sizes = [8, 128], strides = [1, 1]} : vector<8x512xf32> to vector<8x128xf32>
    %203 = arith.negf %202 : vector<8x128xf32>
    %204 = math.exp %203 : vector<8x128xf32>
    %cst_63 = arith.constant 1.000000e+00 : f32
    %205 = vector.broadcast %cst_63 : f32 to vector<8x128xf32>
    %206 = arith.addf %205, %204 : vector<8x128xf32>
    %207 = arith.divf %205, %206 : vector<8x128xf32>
    %208 = vector.extract_strided_slice %201 {offsets = [0, 128], sizes = [8, 128], strides = [1, 1]} : vector<8x512xf32> to vector<8x128xf32>
    %209 = arith.negf %208 : vector<8x128xf32>
    %210 = math.exp %209 : vector<8x128xf32>
    %cst_64 = arith.constant 1.000000e+00 : f32
    %211 = vector.broadcast %cst_64 : f32 to vector<8x128xf32>
    %212 = arith.addf %211, %210 : vector<8x128xf32>
    %213 = arith.divf %211, %212 : vector<8x128xf32>
    %214 = vector.extract_strided_slice %201 {offsets = [0, 256], sizes = [8, 128], strides = [1, 1]} : vector<8x512xf32> to vector<8x128xf32>
    %215 = math.tanh %214 : vector<8x128xf32>
    %216 = vector.extract_strided_slice %201 {offsets = [0, 384], sizes = [8, 128], strides = [1, 1]} : vector<8x512xf32> to vector<8x128xf32>
    %217 = arith.negf %216 : vector<8x128xf32>
    %218 = math.exp %217 : vector<8x128xf32>
    %cst_65 = arith.constant 1.000000e+00 : f32
    %219 = vector.broadcast %cst_65 : f32 to vector<8x128xf32>
    %220 = arith.addf %219, %218 : vector<8x128xf32>
    %221 = arith.divf %219, %220 : vector<8x128xf32>
    %222 = arith.mulf %213, %192 : vector<8x128xf32>
    %223 = arith.mulf %207, %215 : vector<8x128xf32>
    %224 = arith.addf %222, %223 : vector<8x128xf32>
    %225 = math.tanh %224 : vector<8x128xf32>
    %226 = arith.mulf %221, %225 : vector<8x128xf32>
    %c6_66 = arith.constant 6 : index
    %c0_67 = arith.constant 0 : index
    %c0_68 = arith.constant 0 : index
    %227 = vector.load %arg3[%c6_66, %c0_67, %c0_68] : memref<8x8x128xf32, #tpu.memory_space<vmem>>, vector<1x8x128xf32>
    %228 = vector.shape_cast %227 : vector<1x8x128xf32> to vector<8x128xf32>
    %229 = vector.shape_cast %226 : vector<8x128xf32> to vector<1x8x128xf32>
    tpu.vector_store %arg3[%c6_66, %c0_67, %c0_68], %229 {strides = array<i32>} : memref<8x8x128xf32, #tpu.memory_space<vmem>>, vector<1x8x128xf32>,
    %c7 = arith.constant 7 : index
    %c0_69 = arith.constant 0 : index
    %c0_70 = arith.constant 0 : index
    %230 = vector.load %arg1[%c7, %c0_69, %c0_70] : memref<8x8x512xf32, #tpu.memory_space<vmem>>, vector<1x8x512xf32>
    %231 = vector.shape_cast %230 : vector<1x8x512xf32> to vector<8x512xf32>
    %cst_71 = arith.constant dense<0.000000e+00> : vector<8x512xf32>
    %232 = tpu.matmul %226, %5, %cst_71 {dimension_numbers = #tpu.dot_dimension_numbers<[1], [0], [0], [1], [0, 0, 1, 1], [], []>} : vector<8x128xf32>, vector<128x512xf32>, vector<8x512xf32> -> vector<8x512xf32>
    %233 = arith.addf %231, %232 : vector<8x512xf32>
    %234 = vector.extract_strided_slice %233 {offsets = [0, 0], sizes = [8, 128], strides = [1, 1]} : vector<8x512xf32> to vector<8x128xf32>
    %235 = arith.negf %234 : vector<8x128xf32>
    %236 = math.exp %235 : vector<8x128xf32>
    %cst_72 = arith.constant 1.000000e+00 : f32
    %237 = vector.broadcast %cst_72 : f32 to vector<8x128xf32>
    %238 = arith.addf %237, %236 : vector<8x128xf32>
    %239 = arith.divf %237, %238 : vector<8x128xf32>
    %240 = vector.extract_strided_slice %233 {offsets = [0, 128], sizes = [8, 128], strides = [1, 1]} : vector<8x512xf32> to vector<8x128xf32>
    %241 = arith.negf %240 : vector<8x128xf32>
    %242 = math.exp %241 : vector<8x128xf32>
    %cst_73 = arith.constant 1.000000e+00 : f32
    %243 = vector.broadcast %cst_73 : f32 to vector<8x128xf32>
    %244 = arith.addf %243, %242 : vector<8x128xf32>
    %245 = arith.divf %243, %244 : vector<8x128xf32>
    %246 = vector.extract_strided_slice %233 {offsets = [0, 256], sizes = [8, 128], strides = [1, 1]} : vector<8x512xf32> to vector<8x128xf32>
    %247 = math.tanh %246 : vector<8x128xf32>
    %248 = vector.extract_strided_slice %233 {offsets = [0, 384], sizes = [8, 128], strides = [1, 1]} : vector<8x512xf32> to vector<8x128xf32>
    %249 = arith.negf %248 : vector<8x128xf32>
    %250 = math.exp %249 : vector<8x128xf32>
    %cst_74 = arith.constant 1.000000e+00 : f32
    %251 = vector.broadcast %cst_74 : f32 to vector<8x128xf32>
    %252 = arith.addf %251, %250 : vector<8x128xf32>
    %253 = arith.divf %251, %252 : vector<8x128xf32>
    %254 = arith.mulf %245, %224 : vector<8x128xf32>
    %255 = arith.mulf %239, %247 : vector<8x128xf32>
    %256 = arith.addf %254, %255 : vector<8x128xf32>
    %257 = math.tanh %256 : vector<8x128xf32>
    %258 = arith.mulf %253, %257 : vector<8x128xf32>
    %c7_75 = arith.constant 7 : index
    %c0_76 = arith.constant 0 : index
    %c0_77 = arith.constant 0 : index
    %259 = vector.load %arg3[%c7_75, %c0_76, %c0_77] : memref<8x8x128xf32, #tpu.memory_space<vmem>>, vector<1x8x128xf32>
    %260 = vector.shape_cast %259 : vector<1x8x128xf32> to vector<8x128xf32>
    %261 = vector.shape_cast %258 : vector<8x128xf32> to vector<1x8x128xf32>
    tpu.vector_store %arg3[%c7_75, %c0_76, %c0_77], %261 {strides = array<i32>} : memref<8x8x128xf32, #tpu.memory_space<vmem>>, vector<1x8x128xf32>,
    %c0_78 = arith.constant 0 : index
    %c0_79 = arith.constant 0 : index
    %262 = vector.load %arg4[%c0_78, %c0_79] : memref<8x128xf32, #tpu.memory_space<vmem>>, vector<8x128xf32>
    tpu.vector_store %arg4[%c0_78, %c0_79], %258 {strides = array<i32>} : memref<8x128xf32, #tpu.memory_space<vmem>>, vector<8x128xf32>,
    %c0_80 = arith.constant 0 : index
    %c0_81 = arith.constant 0 : index
    %263 = vector.load %arg5[%c0_80, %c0_81] : memref<8x128xf32, #tpu.memory_space<vmem>>, vector<8x128xf32>
    tpu.vector_store %arg5[%c0_80, %c0_81], %256 {strides = array<i32>} : memref<8x128xf32, #tpu.memory_space<vmem>>, vector<8x128xf32>,
    return
  }
  func.func @transform_0(%arg0: i32) -> (i32, i32, i32) {
    %c0_i32 = arith.constant 0 : i32
    %c0_i32_0 = arith.constant 0 : i32
    %c0_i32_1 = arith.constant 0 : i32
    return %arg0, %c0_i32, %c0_i32_0 : i32, i32, i32
  }
  func.func @transform_1(%arg0: i32) -> (i32, i32) {
    %c0_i32 = arith.constant 0 : i32
    %c0_i32_0 = arith.constant 0 : i32
    %c0_i32_1 = arith.constant 0 : i32
    return %c0_i32, %c0_i32_0 : i32, i32
  }
  func.func @transform_2(%arg0: i32) -> (i32, i32, i32) {
    %c0_i32 = arith.constant 0 : i32
    %c0_i32_0 = arith.constant 0 : i32
    %c0_i32_1 = arith.constant 0 : i32
    return %arg0, %c0_i32, %c0_i32_0 : i32, i32, i32
  }
}

module attributes {stable_mosaic.version = 11 : i64} {
  func.func @_lstm_rec_fc_kernel(%arg0: i32, %arg1: memref<8x8x512xf32, #tpu.memory_space<vmem>>, %arg2: memref<128x512xf32, #tpu.memory_space<vmem>>, %arg3: memref<128x128xf32, #tpu.memory_space<vmem>>, %arg4: memref<1x128xf32, #tpu.memory_space<vmem>>, %arg5: memref<8x128xf32, #tpu.memory_space<vmem>>, %arg6: memref<8x128xf32, #tpu.memory_space<vmem>>, %arg7: memref<8x128xf32, #tpu.memory_space<vmem>>) attributes {dimension_semantics = [#tpu.dimension_semantics<arbitrary>], iteration_bounds = array<i64: 1>, scalar_prefetch = 0 : i64, scratch_operands = 2 : i64, tpu.core_type = #tpu.core_type<tc>, window_params = [{transform_indices = @transform_0, window_bounds = array<i64: 8, 8, 512>}, {pipeline_mode = #tpu.pipeline_mode<synchronous>, transform_indices = @transform_1, window_bounds = array<i64: 128, 512>}, {pipeline_mode = #tpu.pipeline_mode<synchronous>, transform_indices = @transform_2, window_bounds = array<i64: 128, 128>}, {pipeline_mode = #tpu.pipeline_mode<synchronous>, transform_indices = @transform_3, window_bounds = array<i64: 1, 128>}, {pipeline_mode = #tpu.pipeline_mode<synchronous>, transform_indices = @transform_4, window_bounds = array<i64: 8, 128>}]} {
    %c0_i32 = arith.constant 0 : i32
    %0 = arith.cmpi eq, %arg0, %c0_i32 : i32
    %1 = arith.extui %0 : i1 to i32
    %c0_i32_0 = arith.constant 0 : i32
    %2 = arith.cmpi ne, %1, %c0_i32_0 : i32
    scf.if %2 {
      %cst_60 = arith.constant 0.000000e+00 : f32
      %243 = vector.broadcast %cst_60 : f32 to vector<8x128xf32>
      %c0_61 = arith.constant 0 : index
      %c0_62 = arith.constant 0 : index
      %244 = vector.load %arg6[%c0_61, %c0_62] : memref<8x128xf32, #tpu.memory_space<vmem>>, vector<8x128xf32>
      tpu.vector_store %arg6[%c0_61, %c0_62], %243 {strides = array<i32>} : memref<8x128xf32, #tpu.memory_space<vmem>>, vector<8x128xf32>,
      %cst_63 = arith.constant 0.000000e+00 : f32
      %245 = vector.broadcast %cst_63 : f32 to vector<8x128xf32>
      %c0_64 = arith.constant 0 : index
      %c0_65 = arith.constant 0 : index
      %246 = vector.load %arg7[%c0_64, %c0_65] : memref<8x128xf32, #tpu.memory_space<vmem>>, vector<8x128xf32>
      tpu.vector_store %arg7[%c0_64, %c0_65], %245 {strides = array<i32>} : memref<8x128xf32, #tpu.memory_space<vmem>>, vector<8x128xf32>,
    } else {
    }
    %c0 = arith.constant 0 : index
    %c0_1 = arith.constant 0 : index
    %3 = vector.load %arg6[%c0, %c0_1] : memref<8x128xf32, #tpu.memory_space<vmem>>, vector<8x128xf32>
    %c0_2 = arith.constant 0 : index
    %c0_3 = arith.constant 0 : index
    %4 = vector.load %arg7[%c0_2, %c0_3] : memref<8x128xf32, #tpu.memory_space<vmem>>, vector<8x128xf32>
    %c0_4 = arith.constant 0 : index
    %c0_5 = arith.constant 0 : index
    %5 = vector.load %arg2[%c0_4, %c0_5] : memref<128x512xf32, #tpu.memory_space<vmem>>, vector<128x512xf32>
    %c0_6 = arith.constant 0 : index
    %c0_7 = arith.constant 0 : index
    %c0_8 = arith.constant 0 : index
    %6 = vector.load %arg1[%c0_6, %c0_7, %c0_8] : memref<8x8x512xf32, #tpu.memory_space<vmem>>, vector<1x8x512xf32>
    %7 = vector.shape_cast %6 : vector<1x8x512xf32> to vector<8x512xf32>
    %cst = arith.constant dense<0.000000e+00> : vector<8x512xf32>
    %8 = tpu.matmul %3, %5, %cst {dimension_numbers = #tpu.dot_dimension_numbers<[1], [0], [0], [1], [0, 0, 1, 1], [], []>} : vector<8x128xf32>, vector<128x512xf32>, vector<8x512xf32> -> vector<8x512xf32>
    %9 = arith.addf %7, %8 : vector<8x512xf32>
    %10 = vector.extract_strided_slice %9 {offsets = [0, 0], sizes = [8, 128], strides = [1, 1]} : vector<8x512xf32> to vector<8x128xf32>
    %11 = arith.negf %10 : vector<8x128xf32>
    %12 = math.exp %11 : vector<8x128xf32>
    %cst_9 = arith.constant 1.000000e+00 : f32
    %13 = vector.broadcast %cst_9 : f32 to vector<8x128xf32>
    %14 = arith.addf %13, %12 : vector<8x128xf32>
    %15 = arith.divf %13, %14 : vector<8x128xf32>
    %16 = vector.extract_strided_slice %9 {offsets = [0, 128], sizes = [8, 128], strides = [1, 1]} : vector<8x512xf32> to vector<8x128xf32>
    %17 = arith.negf %16 : vector<8x128xf32>
    %18 = math.exp %17 : vector<8x128xf32>
    %cst_10 = arith.constant 1.000000e+00 : f32
    %19 = vector.broadcast %cst_10 : f32 to vector<8x128xf32>
    %20 = arith.addf %19, %18 : vector<8x128xf32>
    %21 = arith.divf %19, %20 : vector<8x128xf32>
    %22 = vector.extract_strided_slice %9 {offsets = [0, 256], sizes = [8, 128], strides = [1, 1]} : vector<8x512xf32> to vector<8x128xf32>
    %23 = math.tanh %22 : vector<8x128xf32>
    %24 = vector.extract_strided_slice %9 {offsets = [0, 384], sizes = [8, 128], strides = [1, 1]} : vector<8x512xf32> to vector<8x128xf32>
    %25 = arith.negf %24 : vector<8x128xf32>
    %26 = math.exp %25 : vector<8x128xf32>
    %cst_11 = arith.constant 1.000000e+00 : f32
    %27 = vector.broadcast %cst_11 : f32 to vector<8x128xf32>
    %28 = arith.addf %27, %26 : vector<8x128xf32>
    %29 = arith.divf %27, %28 : vector<8x128xf32>
    %30 = arith.mulf %21, %4 : vector<8x128xf32>
    %31 = arith.mulf %15, %23 : vector<8x128xf32>
    %32 = arith.addf %30, %31 : vector<8x128xf32>
    %33 = math.tanh %32 : vector<8x128xf32>
    %34 = arith.mulf %29, %33 : vector<8x128xf32>
    %c1 = arith.constant 1 : index
    %c0_12 = arith.constant 0 : index
    %c0_13 = arith.constant 0 : index
    %35 = vector.load %arg1[%c1, %c0_12, %c0_13] : memref<8x8x512xf32, #tpu.memory_space<vmem>>, vector<1x8x512xf32>
    %36 = vector.shape_cast %35 : vector<1x8x512xf32> to vector<8x512xf32>
    %cst_14 = arith.constant dense<0.000000e+00> : vector<8x512xf32>
    %37 = tpu.matmul %34, %5, %cst_14 {dimension_numbers = #tpu.dot_dimension_numbers<[1], [0], [0], [1], [0, 0, 1, 1], [], []>} : vector<8x128xf32>, vector<128x512xf32>, vector<8x512xf32> -> vector<8x512xf32>
    %38 = arith.addf %36, %37 : vector<8x512xf32>
    %39 = vector.extract_strided_slice %38 {offsets = [0, 0], sizes = [8, 128], strides = [1, 1]} : vector<8x512xf32> to vector<8x128xf32>
    %40 = arith.negf %39 : vector<8x128xf32>
    %41 = math.exp %40 : vector<8x128xf32>
    %cst_15 = arith.constant 1.000000e+00 : f32
    %42 = vector.broadcast %cst_15 : f32 to vector<8x128xf32>
    %43 = arith.addf %42, %41 : vector<8x128xf32>
    %44 = arith.divf %42, %43 : vector<8x128xf32>
    %45 = vector.extract_strided_slice %38 {offsets = [0, 128], sizes = [8, 128], strides = [1, 1]} : vector<8x512xf32> to vector<8x128xf32>
    %46 = arith.negf %45 : vector<8x128xf32>
    %47 = math.exp %46 : vector<8x128xf32>
    %cst_16 = arith.constant 1.000000e+00 : f32
    %48 = vector.broadcast %cst_16 : f32 to vector<8x128xf32>
    %49 = arith.addf %48, %47 : vector<8x128xf32>
    %50 = arith.divf %48, %49 : vector<8x128xf32>
    %51 = vector.extract_strided_slice %38 {offsets = [0, 256], sizes = [8, 128], strides = [1, 1]} : vector<8x512xf32> to vector<8x128xf32>
    %52 = math.tanh %51 : vector<8x128xf32>
    %53 = vector.extract_strided_slice %38 {offsets = [0, 384], sizes = [8, 128], strides = [1, 1]} : vector<8x512xf32> to vector<8x128xf32>
    %54 = arith.negf %53 : vector<8x128xf32>
    %55 = math.exp %54 : vector<8x128xf32>
    %cst_17 = arith.constant 1.000000e+00 : f32
    %56 = vector.broadcast %cst_17 : f32 to vector<8x128xf32>
    %57 = arith.addf %56, %55 : vector<8x128xf32>
    %58 = arith.divf %56, %57 : vector<8x128xf32>
    %59 = arith.mulf %50, %32 : vector<8x128xf32>
    %60 = arith.mulf %44, %52 : vector<8x128xf32>
    %61 = arith.addf %59, %60 : vector<8x128xf32>
    %62 = math.tanh %61 : vector<8x128xf32>
    %63 = arith.mulf %58, %62 : vector<8x128xf32>
    %c2 = arith.constant 2 : index
    %c0_18 = arith.constant 0 : index
    %c0_19 = arith.constant 0 : index
    %64 = vector.load %arg1[%c2, %c0_18, %c0_19] : memref<8x8x512xf32, #tpu.memory_space<vmem>>, vector<1x8x512xf32>
    %65 = vector.shape_cast %64 : vector<1x8x512xf32> to vector<8x512xf32>
    %cst_20 = arith.constant dense<0.000000e+00> : vector<8x512xf32>
    %66 = tpu.matmul %63, %5, %cst_20 {dimension_numbers = #tpu.dot_dimension_numbers<[1], [0], [0], [1], [0, 0, 1, 1], [], []>} : vector<8x128xf32>, vector<128x512xf32>, vector<8x512xf32> -> vector<8x512xf32>
    %67 = arith.addf %65, %66 : vector<8x512xf32>
    %68 = vector.extract_strided_slice %67 {offsets = [0, 0], sizes = [8, 128], strides = [1, 1]} : vector<8x512xf32> to vector<8x128xf32>
    %69 = arith.negf %68 : vector<8x128xf32>
    %70 = math.exp %69 : vector<8x128xf32>
    %cst_21 = arith.constant 1.000000e+00 : f32
    %71 = vector.broadcast %cst_21 : f32 to vector<8x128xf32>
    %72 = arith.addf %71, %70 : vector<8x128xf32>
    %73 = arith.divf %71, %72 : vector<8x128xf32>
    %74 = vector.extract_strided_slice %67 {offsets = [0, 128], sizes = [8, 128], strides = [1, 1]} : vector<8x512xf32> to vector<8x128xf32>
    %75 = arith.negf %74 : vector<8x128xf32>
    %76 = math.exp %75 : vector<8x128xf32>
    %cst_22 = arith.constant 1.000000e+00 : f32
    %77 = vector.broadcast %cst_22 : f32 to vector<8x128xf32>
    %78 = arith.addf %77, %76 : vector<8x128xf32>
    %79 = arith.divf %77, %78 : vector<8x128xf32>
    %80 = vector.extract_strided_slice %67 {offsets = [0, 256], sizes = [8, 128], strides = [1, 1]} : vector<8x512xf32> to vector<8x128xf32>
    %81 = math.tanh %80 : vector<8x128xf32>
    %82 = vector.extract_strided_slice %67 {offsets = [0, 384], sizes = [8, 128], strides = [1, 1]} : vector<8x512xf32> to vector<8x128xf32>
    %83 = arith.negf %82 : vector<8x128xf32>
    %84 = math.exp %83 : vector<8x128xf32>
    %cst_23 = arith.constant 1.000000e+00 : f32
    %85 = vector.broadcast %cst_23 : f32 to vector<8x128xf32>
    %86 = arith.addf %85, %84 : vector<8x128xf32>
    %87 = arith.divf %85, %86 : vector<8x128xf32>
    %88 = arith.mulf %79, %61 : vector<8x128xf32>
    %89 = arith.mulf %73, %81 : vector<8x128xf32>
    %90 = arith.addf %88, %89 : vector<8x128xf32>
    %91 = math.tanh %90 : vector<8x128xf32>
    %92 = arith.mulf %87, %91 : vector<8x128xf32>
    %c3 = arith.constant 3 : index
    %c0_24 = arith.constant 0 : index
    %c0_25 = arith.constant 0 : index
    %93 = vector.load %arg1[%c3, %c0_24, %c0_25] : memref<8x8x512xf32, #tpu.memory_space<vmem>>, vector<1x8x512xf32>
    %94 = vector.shape_cast %93 : vector<1x8x512xf32> to vector<8x512xf32>
    %cst_26 = arith.constant dense<0.000000e+00> : vector<8x512xf32>
    %95 = tpu.matmul %92, %5, %cst_26 {dimension_numbers = #tpu.dot_dimension_numbers<[1], [0], [0], [1], [0, 0, 1, 1], [], []>} : vector<8x128xf32>, vector<128x512xf32>, vector<8x512xf32> -> vector<8x512xf32>
    %96 = arith.addf %94, %95 : vector<8x512xf32>
    %97 = vector.extract_strided_slice %96 {offsets = [0, 0], sizes = [8, 128], strides = [1, 1]} : vector<8x512xf32> to vector<8x128xf32>
    %98 = arith.negf %97 : vector<8x128xf32>
    %99 = math.exp %98 : vector<8x128xf32>
    %cst_27 = arith.constant 1.000000e+00 : f32
    %100 = vector.broadcast %cst_27 : f32 to vector<8x128xf32>
    %101 = arith.addf %100, %99 : vector<8x128xf32>
    %102 = arith.divf %100, %101 : vector<8x128xf32>
    %103 = vector.extract_strided_slice %96 {offsets = [0, 128], sizes = [8, 128], strides = [1, 1]} : vector<8x512xf32> to vector<8x128xf32>
    %104 = arith.negf %103 : vector<8x128xf32>
    %105 = math.exp %104 : vector<8x128xf32>
    %cst_28 = arith.constant 1.000000e+00 : f32
    %106 = vector.broadcast %cst_28 : f32 to vector<8x128xf32>
    %107 = arith.addf %106, %105 : vector<8x128xf32>
    %108 = arith.divf %106, %107 : vector<8x128xf32>
    %109 = vector.extract_strided_slice %96 {offsets = [0, 256], sizes = [8, 128], strides = [1, 1]} : vector<8x512xf32> to vector<8x128xf32>
    %110 = math.tanh %109 : vector<8x128xf32>
    %111 = vector.extract_strided_slice %96 {offsets = [0, 384], sizes = [8, 128], strides = [1, 1]} : vector<8x512xf32> to vector<8x128xf32>
    %112 = arith.negf %111 : vector<8x128xf32>
    %113 = math.exp %112 : vector<8x128xf32>
    %cst_29 = arith.constant 1.000000e+00 : f32
    %114 = vector.broadcast %cst_29 : f32 to vector<8x128xf32>
    %115 = arith.addf %114, %113 : vector<8x128xf32>
    %116 = arith.divf %114, %115 : vector<8x128xf32>
    %117 = arith.mulf %108, %90 : vector<8x128xf32>
    %118 = arith.mulf %102, %110 : vector<8x128xf32>
    %119 = arith.addf %117, %118 : vector<8x128xf32>
    %120 = math.tanh %119 : vector<8x128xf32>
    %121 = arith.mulf %116, %120 : vector<8x128xf32>
    %c4 = arith.constant 4 : index
    %c0_30 = arith.constant 0 : index
    %c0_31 = arith.constant 0 : index
    %122 = vector.load %arg1[%c4, %c0_30, %c0_31] : memref<8x8x512xf32, #tpu.memory_space<vmem>>, vector<1x8x512xf32>
    %123 = vector.shape_cast %122 : vector<1x8x512xf32> to vector<8x512xf32>
    %cst_32 = arith.constant dense<0.000000e+00> : vector<8x512xf32>
    %124 = tpu.matmul %121, %5, %cst_32 {dimension_numbers = #tpu.dot_dimension_numbers<[1], [0], [0], [1], [0, 0, 1, 1], [], []>} : vector<8x128xf32>, vector<128x512xf32>, vector<8x512xf32> -> vector<8x512xf32>
    %125 = arith.addf %123, %124 : vector<8x512xf32>
    %126 = vector.extract_strided_slice %125 {offsets = [0, 0], sizes = [8, 128], strides = [1, 1]} : vector<8x512xf32> to vector<8x128xf32>
    %127 = arith.negf %126 : vector<8x128xf32>
    %128 = math.exp %127 : vector<8x128xf32>
    %cst_33 = arith.constant 1.000000e+00 : f32
    %129 = vector.broadcast %cst_33 : f32 to vector<8x128xf32>
    %130 = arith.addf %129, %128 : vector<8x128xf32>
    %131 = arith.divf %129, %130 : vector<8x128xf32>
    %132 = vector.extract_strided_slice %125 {offsets = [0, 128], sizes = [8, 128], strides = [1, 1]} : vector<8x512xf32> to vector<8x128xf32>
    %133 = arith.negf %132 : vector<8x128xf32>
    %134 = math.exp %133 : vector<8x128xf32>
    %cst_34 = arith.constant 1.000000e+00 : f32
    %135 = vector.broadcast %cst_34 : f32 to vector<8x128xf32>
    %136 = arith.addf %135, %134 : vector<8x128xf32>
    %137 = arith.divf %135, %136 : vector<8x128xf32>
    %138 = vector.extract_strided_slice %125 {offsets = [0, 256], sizes = [8, 128], strides = [1, 1]} : vector<8x512xf32> to vector<8x128xf32>
    %139 = math.tanh %138 : vector<8x128xf32>
    %140 = vector.extract_strided_slice %125 {offsets = [0, 384], sizes = [8, 128], strides = [1, 1]} : vector<8x512xf32> to vector<8x128xf32>
    %141 = arith.negf %140 : vector<8x128xf32>
    %142 = math.exp %141 : vector<8x128xf32>
    %cst_35 = arith.constant 1.000000e+00 : f32
    %143 = vector.broadcast %cst_35 : f32 to vector<8x128xf32>
    %144 = arith.addf %143, %142 : vector<8x128xf32>
    %145 = arith.divf %143, %144 : vector<8x128xf32>
    %146 = arith.mulf %137, %119 : vector<8x128xf32>
    %147 = arith.mulf %131, %139 : vector<8x128xf32>
    %148 = arith.addf %146, %147 : vector<8x128xf32>
    %149 = math.tanh %148 : vector<8x128xf32>
    %150 = arith.mulf %145, %149 : vector<8x128xf32>
    %c5 = arith.constant 5 : index
    %c0_36 = arith.constant 0 : index
    %c0_37 = arith.constant 0 : index
    %151 = vector.load %arg1[%c5, %c0_36, %c0_37] : memref<8x8x512xf32, #tpu.memory_space<vmem>>, vector<1x8x512xf32>
    %152 = vector.shape_cast %151 : vector<1x8x512xf32> to vector<8x512xf32>
    %cst_38 = arith.constant dense<0.000000e+00> : vector<8x512xf32>
    %153 = tpu.matmul %150, %5, %cst_38 {dimension_numbers = #tpu.dot_dimension_numbers<[1], [0], [0], [1], [0, 0, 1, 1], [], []>} : vector<8x128xf32>, vector<128x512xf32>, vector<8x512xf32> -> vector<8x512xf32>
    %154 = arith.addf %152, %153 : vector<8x512xf32>
    %155 = vector.extract_strided_slice %154 {offsets = [0, 0], sizes = [8, 128], strides = [1, 1]} : vector<8x512xf32> to vector<8x128xf32>
    %156 = arith.negf %155 : vector<8x128xf32>
    %157 = math.exp %156 : vector<8x128xf32>
    %cst_39 = arith.constant 1.000000e+00 : f32
    %158 = vector.broadcast %cst_39 : f32 to vector<8x128xf32>
    %159 = arith.addf %158, %157 : vector<8x128xf32>
    %160 = arith.divf %158, %159 : vector<8x128xf32>
    %161 = vector.extract_strided_slice %154 {offsets = [0, 128], sizes = [8, 128], strides = [1, 1]} : vector<8x512xf32> to vector<8x128xf32>
    %162 = arith.negf %161 : vector<8x128xf32>
    %163 = math.exp %162 : vector<8x128xf32>
    %cst_40 = arith.constant 1.000000e+00 : f32
    %164 = vector.broadcast %cst_40 : f32 to vector<8x128xf32>
    %165 = arith.addf %164, %163 : vector<8x128xf32>
    %166 = arith.divf %164, %165 : vector<8x128xf32>
    %167 = vector.extract_strided_slice %154 {offsets = [0, 256], sizes = [8, 128], strides = [1, 1]} : vector<8x512xf32> to vector<8x128xf32>
    %168 = math.tanh %167 : vector<8x128xf32>
    %169 = vector.extract_strided_slice %154 {offsets = [0, 384], sizes = [8, 128], strides = [1, 1]} : vector<8x512xf32> to vector<8x128xf32>
    %170 = arith.negf %169 : vector<8x128xf32>
    %171 = math.exp %170 : vector<8x128xf32>
    %cst_41 = arith.constant 1.000000e+00 : f32
    %172 = vector.broadcast %cst_41 : f32 to vector<8x128xf32>
    %173 = arith.addf %172, %171 : vector<8x128xf32>
    %174 = arith.divf %172, %173 : vector<8x128xf32>
    %175 = arith.mulf %166, %148 : vector<8x128xf32>
    %176 = arith.mulf %160, %168 : vector<8x128xf32>
    %177 = arith.addf %175, %176 : vector<8x128xf32>
    %178 = math.tanh %177 : vector<8x128xf32>
    %179 = arith.mulf %174, %178 : vector<8x128xf32>
    %c6 = arith.constant 6 : index
    %c0_42 = arith.constant 0 : index
    %c0_43 = arith.constant 0 : index
    %180 = vector.load %arg1[%c6, %c0_42, %c0_43] : memref<8x8x512xf32, #tpu.memory_space<vmem>>, vector<1x8x512xf32>
    %181 = vector.shape_cast %180 : vector<1x8x512xf32> to vector<8x512xf32>
    %cst_44 = arith.constant dense<0.000000e+00> : vector<8x512xf32>
    %182 = tpu.matmul %179, %5, %cst_44 {dimension_numbers = #tpu.dot_dimension_numbers<[1], [0], [0], [1], [0, 0, 1, 1], [], []>} : vector<8x128xf32>, vector<128x512xf32>, vector<8x512xf32> -> vector<8x512xf32>
    %183 = arith.addf %181, %182 : vector<8x512xf32>
    %184 = vector.extract_strided_slice %183 {offsets = [0, 0], sizes = [8, 128], strides = [1, 1]} : vector<8x512xf32> to vector<8x128xf32>
    %185 = arith.negf %184 : vector<8x128xf32>
    %186 = math.exp %185 : vector<8x128xf32>
    %cst_45 = arith.constant 1.000000e+00 : f32
    %187 = vector.broadcast %cst_45 : f32 to vector<8x128xf32>
    %188 = arith.addf %187, %186 : vector<8x128xf32>
    %189 = arith.divf %187, %188 : vector<8x128xf32>
    %190 = vector.extract_strided_slice %183 {offsets = [0, 128], sizes = [8, 128], strides = [1, 1]} : vector<8x512xf32> to vector<8x128xf32>
    %191 = arith.negf %190 : vector<8x128xf32>
    %192 = math.exp %191 : vector<8x128xf32>
    %cst_46 = arith.constant 1.000000e+00 : f32
    %193 = vector.broadcast %cst_46 : f32 to vector<8x128xf32>
    %194 = arith.addf %193, %192 : vector<8x128xf32>
    %195 = arith.divf %193, %194 : vector<8x128xf32>
    %196 = vector.extract_strided_slice %183 {offsets = [0, 256], sizes = [8, 128], strides = [1, 1]} : vector<8x512xf32> to vector<8x128xf32>
    %197 = math.tanh %196 : vector<8x128xf32>
    %198 = vector.extract_strided_slice %183 {offsets = [0, 384], sizes = [8, 128], strides = [1, 1]} : vector<8x512xf32> to vector<8x128xf32>
    %199 = arith.negf %198 : vector<8x128xf32>
    %200 = math.exp %199 : vector<8x128xf32>
    %cst_47 = arith.constant 1.000000e+00 : f32
    %201 = vector.broadcast %cst_47 : f32 to vector<8x128xf32>
    %202 = arith.addf %201, %200 : vector<8x128xf32>
    %203 = arith.divf %201, %202 : vector<8x128xf32>
    %204 = arith.mulf %195, %177 : vector<8x128xf32>
    %205 = arith.mulf %189, %197 : vector<8x128xf32>
    %206 = arith.addf %204, %205 : vector<8x128xf32>
    %207 = math.tanh %206 : vector<8x128xf32>
    %208 = arith.mulf %203, %207 : vector<8x128xf32>
    %c7 = arith.constant 7 : index
    %c0_48 = arith.constant 0 : index
    %c0_49 = arith.constant 0 : index
    %209 = vector.load %arg1[%c7, %c0_48, %c0_49] : memref<8x8x512xf32, #tpu.memory_space<vmem>>, vector<1x8x512xf32>
    %210 = vector.shape_cast %209 : vector<1x8x512xf32> to vector<8x512xf32>
    %cst_50 = arith.constant dense<0.000000e+00> : vector<8x512xf32>
    %211 = tpu.matmul %208, %5, %cst_50 {dimension_numbers = #tpu.dot_dimension_numbers<[1], [0], [0], [1], [0, 0, 1, 1], [], []>} : vector<8x128xf32>, vector<128x512xf32>, vector<8x512xf32> -> vector<8x512xf32>
    %212 = arith.addf %210, %211 : vector<8x512xf32>
    %213 = vector.extract_strided_slice %212 {offsets = [0, 0], sizes = [8, 128], strides = [1, 1]} : vector<8x512xf32> to vector<8x128xf32>
    %214 = arith.negf %213 : vector<8x128xf32>
    %215 = math.exp %214 : vector<8x128xf32>
    %cst_51 = arith.constant 1.000000e+00 : f32
    %216 = vector.broadcast %cst_51 : f32 to vector<8x128xf32>
    %217 = arith.addf %216, %215 : vector<8x128xf32>
    %218 = arith.divf %216, %217 : vector<8x128xf32>
    %219 = vector.extract_strided_slice %212 {offsets = [0, 128], sizes = [8, 128], strides = [1, 1]} : vector<8x512xf32> to vector<8x128xf32>
    %220 = arith.negf %219 : vector<8x128xf32>
    %221 = math.exp %220 : vector<8x128xf32>
    %cst_52 = arith.constant 1.000000e+00 : f32
    %222 = vector.broadcast %cst_52 : f32 to vector<8x128xf32>
    %223 = arith.addf %222, %221 : vector<8x128xf32>
    %224 = arith.divf %222, %223 : vector<8x128xf32>
    %225 = vector.extract_strided_slice %212 {offsets = [0, 256], sizes = [8, 128], strides = [1, 1]} : vector<8x512xf32> to vector<8x128xf32>
    %226 = math.tanh %225 : vector<8x128xf32>
    %227 = vector.extract_strided_slice %212 {offsets = [0, 384], sizes = [8, 128], strides = [1, 1]} : vector<8x512xf32> to vector<8x128xf32>
    %228 = arith.negf %227 : vector<8x128xf32>
    %229 = math.exp %228 : vector<8x128xf32>
    %cst_53 = arith.constant 1.000000e+00 : f32
    %230 = vector.broadcast %cst_53 : f32 to vector<8x128xf32>
    %231 = arith.addf %230, %229 : vector<8x128xf32>
    %232 = arith.divf %230, %231 : vector<8x128xf32>
    %233 = arith.mulf %224, %206 : vector<8x128xf32>
    %234 = arith.mulf %218, %226 : vector<8x128xf32>
    %235 = arith.addf %233, %234 : vector<8x128xf32>
    %236 = math.tanh %235 : vector<8x128xf32>
    %237 = arith.mulf %232, %236 : vector<8x128xf32>
    %c0_54 = arith.constant 0 : index
    %c0_55 = arith.constant 0 : index
    %238 = vector.load %arg6[%c0_54, %c0_55] : memref<8x128xf32, #tpu.memory_space<vmem>>, vector<8x128xf32>
    tpu.vector_store %arg6[%c0_54, %c0_55], %237 {strides = array<i32>} : memref<8x128xf32, #tpu.memory_space<vmem>>, vector<8x128xf32>,
    %c0_56 = arith.constant 0 : index
    %c0_57 = arith.constant 0 : index
    %239 = vector.load %arg7[%c0_56, %c0_57] : memref<8x128xf32, #tpu.memory_space<vmem>>, vector<8x128xf32>
    tpu.vector_store %arg7[%c0_56, %c0_57], %235 {strides = array<i32>} : memref<8x128xf32, #tpu.memory_space<vmem>>, vector<8x128xf32>,
    %c0_i32_58 = arith.constant 0 : i32
    %240 = arith.cmpi eq, %arg0, %c0_i32_58 : i32
    %241 = arith.extui %240 : i1 to i32
    %c0_i32_59 = arith.constant 0 : i32
    %242 = arith.cmpi ne, %241, %c0_i32_59 : i32
    scf.if %242 {
      %c0_60 = arith.constant 0 : index
      %c0_61 = arith.constant 0 : index
      %243 = vector.load %arg3[%c0_60, %c0_61] : memref<128x128xf32, #tpu.memory_space<vmem>>, vector<128x128xf32>
      %cst_62 = arith.constant dense<0.000000e+00> : vector<8x128xf32>
      %244 = tpu.matmul %237, %243, %cst_62 {dimension_numbers = #tpu.dot_dimension_numbers<[1], [0], [0], [1], [0, 0, 1, 1], [], []>} : vector<8x128xf32>, vector<128x128xf32>, vector<8x128xf32> -> vector<8x128xf32>
      %c0_63 = arith.constant 0 : index
      %c0_64 = arith.constant 0 : index
      %245 = vector.load %arg4[%c0_63, %c0_64] : memref<1x128xf32, #tpu.memory_space<vmem>>, vector<1x128xf32>
      %246 = vector.broadcast %245 : vector<1x128xf32> to vector<8x128xf32>
      %247 = arith.addf %244, %246 : vector<8x128xf32>
      %c0_65 = arith.constant 0 : index
      %c0_66 = arith.constant 0 : index
      %248 = vector.load %arg5[%c0_65, %c0_66] : memref<8x128xf32, #tpu.memory_space<vmem>>, vector<8x128xf32>
      tpu.vector_store %arg5[%c0_65, %c0_66], %247 {strides = array<i32>} : memref<8x128xf32, #tpu.memory_space<vmem>>, vector<8x128xf32>,
    } else {
    }
    return
  }
  func.func @transform_0(%arg0: i32) -> (i32, i32, i32) {
    %c0_i32 = arith.constant 0 : i32
    %c0_i32_0 = arith.constant 0 : i32
    %c0_i32_1 = arith.constant 0 : i32
    return %arg0, %c0_i32, %c0_i32_0 : i32, i32, i32
  }
  func.func @transform_1(%arg0: i32) -> (i32, i32) {
    %c0_i32 = arith.constant 0 : i32
    %c0_i32_0 = arith.constant 0 : i32
    %c0_i32_1 = arith.constant 0 : i32
    return %c0_i32, %c0_i32_0 : i32, i32
  }
  func.func @transform_2(%arg0: i32) -> (i32, i32) {
    %c0_i32 = arith.constant 0 : i32
    %c0_i32_0 = arith.constant 0 : i32
    %c0_i32_1 = arith.constant 0 : i32
    return %c0_i32, %c0_i32_0 : i32, i32
  }
  func.func @transform_3(%arg0: i32) -> (i32, i32) {
    %c0_i32 = arith.constant 0 : i32
    %c0_i32_0 = arith.constant 0 : i32
    %c0_i32_1 = arith.constant 0 : i32
    return %c0_i32, %c0_i32_0 : i32, i32
  }
  func.func @transform_4(%arg0: i32) -> (i32, i32) {
    %c0_i32 = arith.constant 0 : i32
    %c0_i32_0 = arith.constant 0 : i32
    %c0_i32_1 = arith.constant 0 : i32
    return %c0_i32, %c0_i32_0 : i32, i32
  }
}

</mosaic_0001>

<bundles_post_ra>
// kernel: lstm_network_forward.4
= control target key start
LH: loop header
LB: loop body
LE: loop exit
PB: predicated region body
PF: predicated region fallthrough
CT: control target
= control target key end

     0   :  { %8 = vsyncpa [#allocation3], 0  ;;  %s342_s15 = smov [#allocation2]   ;;  %s343_s17 = smov 512   ;;  %s531_s0 = inlined_call_operand.vmem [shape: f32[64,128], index: 0, kind: input, shape index: {}]   ;;  %s532_s1 = inlined_call_operand.hbm [shape: f32[128,512], index: 1, kind: input, shape index: {}]   ;;  %s533_s2 = inlined_call_operand.vmem [shape: f32[1,512], index: 2, kind: input, shape index: {}]   ;;  %s534_s3 = inlined_call_operand.vmem [shape: f32[64,512], index: 3, kind: output, shape index: {}]  }
   0x1   :  { %s15_s14 = sshll.u32 %s532_s1, 4  ;;  %s17_s16 = sshll.u32 %s342_s15, 4  ;;  %s16_s14 = int_to_ptr.hbm [resolvable:$true] %s15_s14  ;;  %s18_s16 = int_to_ptr.vmem [resolvable:$true] %s17_s16 }
   0x2   :  { %s344_s18 = smov 32  }
   0x3   :  { %23 = dma.hbm_to_vmem [thread:$0]  %s16_s14, 8192, %s18_s16, [#allocation3], %s343_s17, %s343_s17, %s344_s18  }
   0x4   :  { %340 = dma.done.wait [#allocation3], 8192  }
   0x5   :  { %341 = vsyncadd [#allocation3], 4294959104  ;;  %v100_v0 = vld [vmem:[#allocation2 + $0x1f0] sm:$0xff]  ;;  %v101_v1 = vld [vmem:[#allocation2 + $0x1f8] sm:$0xff] }
   0x6   :  { %v96_v2 = vld [vmem:[#allocation2 + $0x1d0] sm:$0xff]  ;;  %194 = vmatpush.msra.mxu2 %v100_v0  ;;  %235 = vmatpush.msra.mxu3 %v101_v1  ;;  %v97_v3 = vld [vmem:[#allocation2 + $0x1d8] sm:$0xff]  ;;  %v98_v6 = vld [vmem:[#allocation2 + $0x1e0] sm:$0xff] }
   0x7   :  { %v92_v4 = vld [vmem:[#allocation2 + $0x1b0] sm:$0xff]  ;;  %v93_v5 = vld [vmem:[#allocation2 + $0x1b8] sm:$0xff]  ;;  %v99_v7 = vld [vmem:[#allocation2 + $0x1e8] sm:$0xff]  ;;  %112 = vmatpush.msra.mxu0 %v98_v6 }
   0x8   :  { %195 = vmatpush.msra.mxu2 %v96_v2  ;;  %236 = vmatpush.msra.mxu3 %v97_v3  ;;  %v94_v8 = vld [vmem:[#allocation2 + $0x1c0] sm:$0xff]  ;;  %v95_v9 = vld [vmem:[#allocation2 + $0x1c8] sm:$0xff]  ;;  %v88_v10 = vld [vmem:[#allocation2 + $0x190] sm:$0xff] }
   0x9   :  { %153 = vmatpush.msra.mxu1 %v99_v7  ;;  %v89_v11 = vld [vmem:[#allocation2 + $0x198] sm:$0xff]  ;;  %v90_v12 = vld [vmem:[#allocation2 + $0x1a0] sm:$0xff]  ;;  %v91_v13 = vld [vmem:[#allocation2 + $0x1a8] sm:$0xff]  ;;  %113 = vmatpush.msra.mxu0 %v94_v8 }
   0xa   :  { %196 = vmatpush.msra.mxu2 %v92_v4  ;;  %237 = vmatpush.msra.mxu3 %v93_v5  ;;  %v84_v14 = vld [vmem:[#allocation2 + $0x170] sm:$0xff]  ;;  %v85_v15 = vld [vmem:[#allocation2 + $0x178] sm:$0xff]  ;;  %v86_v16 = vld [vmem:[#allocation2 + $0x180] sm:$0xff] }
   0xb   :  { %154 = vmatpush.msra.mxu1 %v95_v9  ;;  %v87_v17 = vld [vmem:[#allocation2 + $0x188] sm:$0xff]  ;;  %114 = vmatpush.msra.mxu0 %v90_v12  ;;  %v80_v18 = vld [vmem:[#allocation2 + $0x150] sm:$0xff]  ;;  %v81_v19 = vld [vmem:[#allocation2 + $0x158] sm:$0xff] }
   0xc   :  { %197 = vmatpush.msra.mxu2 %v88_v10  ;;  %238 = vmatpush.msra.mxu3 %v89_v11  ;;  %v82_v20 = vld [vmem:[#allocation2 + $0x160] sm:$0xff]  ;;  %v83_v21 = vld [vmem:[#allocation2 + $0x168] sm:$0xff]  ;;  %v76_v22 = vld [vmem:[#allocation2 + $0x130] sm:$0xff] }
   0xd   :  { %155 = vmatpush.msra.mxu1 %v91_v13  ;;  %115 = vmatpush.msra.mxu0 %v86_v16  ;;  %v77_v23 = vld [vmem:[#allocation2 + $0x138] sm:$0xff]  ;;  %v78_v24 = vld [vmem:[#allocation2 + $0x140] sm:$0xff]  ;;  %v79_v25 = vld [vmem:[#allocation2 + $0x148] sm:$0xff] }
   0xe   :  { %198 = vmatpush.msra.mxu2 %v84_v14  ;;  %239 = vmatpush.msra.mxu3 %v85_v15  ;;  %v72_v26 = vld [vmem:[#allocation2 + $0x110] sm:$0xff]  ;;  %v73_v27 = vld [vmem:[#allocation2 + $0x118] sm:$0xff]  ;;  %v74_v28 = vld [vmem:[#allocation2 + $0x120] sm:$0xff] }
   0xf   :  { %156 = vmatpush.msra.mxu1 %v87_v17  ;;  %116 = vmatpush.msra.mxu0 %v82_v20  ;;  %v75_v29 = vld [vmem:[#allocation2 + $0x128] sm:$0xff]  ;;  %v68_v30 = vld [vmem:[#allocation2 + $0xf0] sm:$0xff]  ;;  %v69_v31 = vld [vmem:[#allocation2 + $0xf8] sm:$0xff] }
  0x10   :  { %199 = vmatpush.msra.mxu2 %v80_v18  ;;  %240 = vmatpush.msra.mxu3 %v81_v19  ;;  %v70_v32 = vld [vmem:[#allocation2 + $0x100] sm:$0xff]  ;;  %v71_v33 = vld [vmem:[#allocation2 + $0x108] sm:$0xff]  ;;  %v64_v34 = vld [vmem:[#allocation2 + $0xd0] sm:$0xff] }
  0x11   :  { %157 = vmatpush.msra.mxu1 %v83_v21  ;;  %117 = vmatpush.msra.mxu0 %v78_v24  ;;  %v65_v35 = vld [vmem:[#allocation2 + $0xd8] sm:$0xff]  ;;  %v66_v36 = vld [vmem:[#allocation2 + $0xe0] sm:$0xff]  ;;  %v67_v37 = vld [vmem:[#allocation2 + $0xe8] sm:$0xff] }
  0x12   :  { %200 = vmatpush.msra.mxu2 %v76_v22  ;;  %241 = vmatpush.msra.mxu3 %v77_v23  ;;  %v60_v38 = vld [vmem:[#allocation2 + $0xb0] sm:$0xff]  ;;  %v61_v39 = vld [vmem:[#allocation2 + $0xb8] sm:$0xff]  ;;  %v62_v40 = vld [vmem:[#allocation2 + $0xc0] sm:$0xff] }
  0x13   :  { %158 = vmatpush.msra.mxu1 %v79_v25  ;;  %118 = vmatpush.msra.mxu0 %v74_v28  ;;  %v63_v41 = vld [vmem:[#allocation2 + $0xc8] sm:$0xff]  ;;  %v56_v42 = vld [vmem:[#allocation2 + $0x90] sm:$0xff]  ;;  %v57_v43 = vld [vmem:[#allocation2 + $0x98] sm:$0xff] }
  0x14   :  { %201 = vmatpush.msra.mxu2 %v72_v26  ;;  %242 = vmatpush.msra.mxu3 %v73_v27  ;;  %v58_v44 = vld [vmem:[#allocation2 + $0xa0] sm:$0xff]  ;;  %v59_v45 = vld [vmem:[#allocation2 + $0xa8] sm:$0xff]  ;;  %v52_v46 = vld [vmem:[#allocation2 + $0x70] sm:$0xff] }
  0x15   :  { %159 = vmatpush.msra.mxu1 %v75_v29  ;;  %119 = vmatpush.msra.mxu0 %v70_v32  ;;  %v53_v47 = vld [vmem:[#allocation2 + $0x78] sm:$0xff]  ;;  %v54_v48 = vld [vmem:[#allocation2 + $0x80] sm:$0xff]  ;;  %v55_v49 = vld [vmem:[#allocation2 + $0x88] sm:$0xff] }
  0x16   :  { %202 = vmatpush.msra.mxu2 %v68_v30  ;;  %243 = vmatpush.msra.mxu3 %v69_v31  ;;  %v48_v50 = vld [vmem:[#allocation2 + $0x50] sm:$0xff]  ;;  %v49_v51 = vld [vmem:[#allocation2 + $0x58] sm:$0xff]  ;;  %v50_v52 = vld [vmem:[#allocation2 + $0x60] sm:$0xff] }
  0x17   :  { %160 = vmatpush.msra.mxu1 %v71_v33  ;;  %120 = vmatpush.msra.mxu0 %v66_v36  ;;  %v51_v53 = vld [vmem:[#allocation2 + $0x68] sm:$0xff]  ;;  %v44_v54 = vld [vmem:[#allocation2 + $0x30] sm:$0xff]  ;;  %v45_v55 = vld [vmem:[#allocation2 + $0x38] sm:$0xff] }
  0x18   :  { %203 = vmatpush.msra.mxu2 %v64_v34  ;;  %244 = vmatpush.msra.mxu3 %v65_v35  ;;  %v46_v56 = vld [vmem:[#allocation2 + $0x40] sm:$0xff]  ;;  %v47_v57 = vld [vmem:[#allocation2 + $0x48] sm:$0xff]  ;;  %v40_v58 = vld [vmem:[#allocation2 + $0x10] sm:$0xff] }
  0x19   :  { %161 = vmatpush.msra.mxu1 %v67_v37  ;;  %121 = vmatpush.msra.mxu0 %v62_v40  ;;  %v41_v59 = vld [vmem:[#allocation2 + $0x18] sm:$0xff]  ;;  %v30_v60 = vld [vmem:[%s531_s0] sm:$0xff]  ;;  %v43_v62 = vld [vmem:[#allocation2 + $0x28] sm:$0xff] }
  0x1a   :  { %204 = vmatpush.msra.mxu2 %v60_v38  ;;  %245 = vmatpush.msra.mxu3 %v61_v39  ;;  %v42_v61 = vld [vmem:[#allocation2 + $0x20] sm:$0xff]  ;;  %v39_v0 = vld [vmem:[#allocation2 + $0x8] sm:$0xff]  ;;  %v32_v2 = vld [vmem:[%s531_s0 + $0x10] sm:$0xff] }
  0x1b   :  { %162 = vmatpush.msra.mxu1 %v63_v41  ;;  %122 = vmatpush.msra.mxu0 %v58_v44  ;;  %v38_v63 = vld [vmem:[#allocation2] sm:$0xff]  ;;  %v31_v1 = vld [vmem:[%s531_s0 + $0x8] sm:$0xff]  ;;  %v33_v3 = vld [vmem:[%s531_s0 + $0x18] sm:$0xff] }
  0x1c   :  { %205 = vmatpush.msra.mxu2 %v56_v42  ;;  %246 = vmatpush.msra.mxu3 %v57_v43  ;;  %v34_v4 = vld [vmem:[%s531_s0 + $0x20] sm:$0xff]  ;;  %v35_v5 = vld [vmem:[%s531_s0 + $0x28] sm:$0xff]  ;;  %v36_v6 = vld [vmem:[%s531_s0 + $0x30] sm:$0xff] }
  0x1d   :  { %163 = vmatpush.msra.mxu1 %v59_v45  ;;  %123 = vmatpush.msra.mxu0 %v54_v48  ;;  %v37_v7 = vld [vmem:[%s531_s0 + $0x38] sm:$0xff]  ;;  %v102_v8 = vld [vmem:[%s533_s2] sm:$0xf] }
  0x1e   :  { %206 = vmatpush.msra.mxu2 %v52_v46  ;;  %247 = vmatpush.msra.mxu3 %v53_v47  ;;  %v395_v9 = vperm.slane %v102_v8, 0  ;;  %v397_v10 = vperm.slane %v102_v8, 1  ;;  %v399_v11 = vperm.slane %v102_v8, 2  ;;  %v401_v12 = vperm.slane %v102_v8, 3 }
  0x1f   :  { %164 = vmatpush.msra.mxu1 %v55_v49  ;;  %124 = vmatpush.msra.mxu0 %v50_v52 }
  0x20   :  { %207 = vmatpush.msra.mxu2 %v48_v50  ;;  %248 = vmatpush.msra.mxu3 %v49_v51 }
  0x21   :  { %165 = vmatpush.msra.mxu1 %v51_v53  ;;  %125 = vmatpush.msra.mxu0 %v46_v56 }
  0x22   :  { %208 = vmatpush.msra.mxu2 %v44_v54  ;;  %249 = vmatpush.msra.mxu3 %v45_v55 }
  0x23   :  { %166 = vmatpush.msra.mxu1 %v47_v57  ;;  %126 = vmatpush.msra.mxu0 %v42_v61 }
  0x24   :  { %209 = vmatpush.msra.mxu2 %v40_v58  ;;  %250 = vmatpush.msra.mxu3 %v41_v59 }
  0x25   :  { %210 = vmatmul.f32.vlgmr.msra.gmra.mxu2 %v30_v60  ;;  %251 = vmatmul.f32.vlgmr.msra.gmra.mxu3 %v30_v60 }
  0x26   :  { %167 = vmatpush.msra.mxu1 %v43_v62  ;;  %127 = vmatpush.msra.mxu0 %v38_v63 }
  0x27   :  { %128 = vmatmul.f32.vlgmr.msra.gmra.mxu0 %v30_v60 }
  0x28   :  { %168 = vmatpush.msra.mxu1 %v39_v0 }
  0x29   :  { %169 = vmatmul.f32.vlgmr.msra.gmra.mxu1 %v30_v60 }
  0x2d   :  { %213 = vmatmul.f32.gmra.mxu2 %v31_v1  ;;  %254 = vmatmul.f32.gmra.mxu3 %v31_v1 }
  0x2f   :  { %131 = vmatmul.f32.gmra.mxu0 %v31_v1 }
  0x31   :  { %172 = vmatmul.f32.gmra.mxu1 %v31_v1 }
  0x35   :  { %216 = vmatmul.f32.gmra.mxu2 %v32_v2  ;;  %257 = vmatmul.f32.gmra.mxu3 %v32_v2 }
  0x37   :  { %134 = vmatmul.f32.gmra.mxu0 %v32_v2 }
  0x39   :  { %175 = vmatmul.f32.gmra.mxu1 %v32_v2 }
  0x3d   :  { %219 = vmatmul.f32.gmra.mxu2 %v33_v3  ;;  %260 = vmatmul.f32.gmra.mxu3 %v33_v3 }
  0x3f   :  { %137 = vmatmul.f32.gmra.mxu0 %v33_v3 }
  0x41   :  { %178 = vmatmul.f32.gmra.mxu1 %v33_v3 }
  0x45   :  { %222 = vmatmul.f32.gmra.mxu2 %v34_v4  ;;  %263 = vmatmul.f32.gmra.mxu3 %v34_v4 }
  0x47   :  { %140 = vmatmul.f32.gmra.mxu0 %v34_v4 }
  0x49   :  { %181 = vmatmul.f32.gmra.mxu1 %v34_v4 }
  0x4d   :  { %225 = vmatmul.f32.gmra.mxu2 %v35_v5  ;;  %266 = vmatmul.f32.gmra.mxu3 %v35_v5 }
  0x4f   :  { %143 = vmatmul.f32.gmra.mxu0 %v35_v5 }
  0x51   :  { %184 = vmatmul.f32.gmra.mxu1 %v35_v5 }
  0x55   :  { %228 = vmatmul.f32.gmra.mxu2 %v36_v6  ;;  %269 = vmatmul.f32.gmra.mxu3 %v36_v6 }
  0x57   :  { %146 = vmatmul.f32.gmra.mxu0 %v36_v6 }
  0x59   :  { %187 = vmatmul.f32.gmra.mxu1 %v36_v6 }
  0x5d   :  { %231 = vmatmul.f32.gmra.mxu2 %v37_v7  ;;  %272 = vmatmul.f32.gmra.mxu3 %v37_v7 }
  0x5f   :  { %149 = vmatmul.f32.gmra.mxu0 %v37_v7 }
  0x61   :  { %190 = vmatmul.f32.gmra.mxu1 %v37_v7 }
  0xa4   :  { %v129_v13 = vpop.f32.mrf.mxu0 }
  0xa5   :  { %v130_v15 = vadd.f32 %v129_v13, %v395_v9 }
  0xa6   :  { %v170_v14 = vpop.f32.mrf.mxu1 }
  0xa7   :  { %v171_v16 = vadd.f32 %v170_v14, %v397_v10  ;;  %276 = vst [vmem:[%s534_s3] sm:$0xff] %v130_v15 }
  0xa8   :  { %v211_v17 = vpop.f32.mrf.mxu2  ;;  %v252_v18 = vpop.f32.mrf.mxu3 }
  0xa9   :  { %v212_v19 = vadd.f32 %v211_v17, %v399_v11  ;;  %v253_v20 = vadd.f32 %v252_v18, %v401_v12  ;;  %277 = vst [vmem:[%s534_s3 + $0x8] sm:$0xff] %v171_v16 }
  0xab   :  { %278 = vst [vmem:[%s534_s3 + $0x10] sm:$0xff] %v212_v19 }
  0xac   :  { %279 = vst [vmem:[%s534_s3 + $0x18] sm:$0xff] %v253_v20  ;;  %v132_v21 = vpop.f32.mrf.mxu0 }
  0xad   :  { %v133_v23 = vadd.f32 %v132_v21, %v395_v9 }
  0xae   :  { %v173_v22 = vpop.f32.mrf.mxu1 }
  0xaf   :  { %v174_v24 = vadd.f32 %v173_v22, %v397_v10  ;;  %280 = vst [vmem:[%s534_s3 + $0x20] sm:$0xff] %v133_v23 }
  0xb0   :  { %v214_v25 = vpop.f32.mrf.mxu2  ;;  %v255_v26 = vpop.f32.mrf.mxu3 }
  0xb1   :  { %v215_v27 = vadd.f32 %v214_v25, %v399_v11  ;;  %v256_v28 = vadd.f32 %v255_v26, %v401_v12  ;;  %281 = vst [vmem:[%s534_s3 + $0x28] sm:$0xff] %v174_v24 }
  0xb3   :  { %282 = vst [vmem:[%s534_s3 + $0x30] sm:$0xff] %v215_v27 }
  0xb4   :  { %283 = vst [vmem:[%s534_s3 + $0x38] sm:$0xff] %v256_v28  ;;  %v135_v29 = vpop.f32.mrf.mxu0 }
  0xb5   :  { %v136_v31 = vadd.f32 %v135_v29, %v395_v9 }
  0xb6   :  { %v176_v30 = vpop.f32.mrf.mxu1 }
  0xb7   :  { %v177_v32 = vadd.f32 %v176_v30, %v397_v10  ;;  %284 = vst [vmem:[%s534_s3 + $0x40] sm:$0xff] %v136_v31 }
  0xb8   :  { %v217_v33 = vpop.f32.mrf.mxu2  ;;  %v258_v34 = vpop.f32.mrf.mxu3 }
  0xb9   :  { %v218_v35 = vadd.f32 %v217_v33, %v399_v11  ;;  %v259_v36 = vadd.f32 %v258_v34, %v401_v12  ;;  %285 = vst [vmem:[%s534_s3 + $0x48] sm:$0xff] %v177_v32 }
  0xbb   :  { %286 = vst [vmem:[%s534_s3 + $0x50] sm:$0xff] %v218_v35 }
  0xbc   :  { %287 = vst [vmem:[%s534_s3 + $0x58] sm:$0xff] %v259_v36  ;;  %v138_v37 = vpop.f32.mrf.mxu0 }
  0xbd   :  { %v139_v39 = vadd.f32 %v138_v37, %v395_v9 }
  0xbe   :  { %v179_v38 = vpop.f32.mrf.mxu1 }
  0xbf   :  { %v180_v40 = vadd.f32 %v179_v38, %v397_v10  ;;  %288 = vst [vmem:[%s534_s3 + $0x60] sm:$0xff] %v139_v39 }
  0xc0   :  { %v220_v41 = vpop.f32.mrf.mxu2  ;;  %v261_v42 = vpop.f32.mrf.mxu3 }
  0xc1   :  { %v221_v43 = vadd.f32 %v220_v41, %v399_v11  ;;  %v262_v44 = vadd.f32 %v261_v42, %v401_v12  ;;  %289 = vst [vmem:[%s534_s3 + $0x68] sm:$0xff] %v180_v40 }
  0xc3   :  { %290 = vst [vmem:[%s534_s3 + $0x70] sm:$0xff] %v221_v43 }
  0xc4   :  { %291 = vst [vmem:[%s534_s3 + $0x78] sm:$0xff] %v262_v44  ;;  %v141_v45 = vpop.f32.mrf.mxu0 }
  0xc5   :  { %v142_v47 = vadd.f32 %v141_v45, %v395_v9 }
  0xc6   :  { %v182_v46 = vpop.f32.mrf.mxu1 }
  0xc7   :  { %v183_v48 = vadd.f32 %v182_v46, %v397_v10  ;;  %292 = vst [vmem:[%s534_s3 + $0x80] sm:$0xff] %v142_v47 }
  0xc8   :  { %v223_v49 = vpop.f32.mrf.mxu2  ;;  %v264_v50 = vpop.f32.mrf.mxu3 }
  0xc9   :  { %v224_v51 = vadd.f32 %v223_v49, %v399_v11  ;;  %v265_v52 = vadd.f32 %v264_v50, %v401_v12  ;;  %293 = vst [vmem:[%s534_s3 + $0x88] sm:$0xff] %v183_v48 }
  0xcb   :  { %294 = vst [vmem:[%s534_s3 + $0x90] sm:$0xff] %v224_v51 }
  0xcc   :  { %295 = vst [vmem:[%s534_s3 + $0x98] sm:$0xff] %v265_v52  ;;  %v144_v53 = vpop.f32.mrf.mxu0 }
  0xcd   :  { %v145_v55 = vadd.f32 %v144_v53, %v395_v9 }
  0xce   :  { %v185_v54 = vpop.f32.mrf.mxu1 }
  0xcf   :  { %v186_v56 = vadd.f32 %v185_v54, %v397_v10  ;;  %296 = vst [vmem:[%s534_s3 + $0xa0] sm:$0xff] %v145_v55 }
  0xd0   :  { %v226_v57 = vpop.f32.mrf.mxu2  ;;  %v267_v58 = vpop.f32.mrf.mxu3 }
  0xd1   :  { %v227_v59 = vadd.f32 %v226_v57, %v399_v11  ;;  %v268_v60 = vadd.f32 %v267_v58, %v401_v12  ;;  %297 = vst [vmem:[%s534_s3 + $0xa8] sm:$0xff] %v186_v56 }
  0xd3   :  { %298 = vst [vmem:[%s534_s3 + $0xb0] sm:$0xff] %v227_v59 }
  0xd4   :  { %299 = vst [vmem:[%s534_s3 + $0xb8] sm:$0xff] %v268_v60  ;;  %v147_v61 = vpop.f32.mrf.mxu0 }
  0xd5   :  { %v148_v63 = vadd.f32 %v147_v61, %v395_v9 }
  0xd6   :  { %v188_v62 = vpop.f32.mrf.mxu1 }
  0xd7   :  { %v189_v0 = vadd.f32 %v188_v62, %v397_v10  ;;  %300 = vst [vmem:[%s534_s3 + $0xc0] sm:$0xff] %v148_v63 }
  0xd8   :  { %v229_v1 = vpop.f32.mrf.mxu2  ;;  %v270_v2 = vpop.f32.mrf.mxu3 }
  0xd9   :  { %v230_v3 = vadd.f32 %v229_v1, %v399_v11  ;;  %v271_v4 = vadd.f32 %v270_v2, %v401_v12  ;;  %301 = vst [vmem:[%s534_s3 + $0xc8] sm:$0xff] %v189_v0 }
  0xdb   :  { %302 = vst [vmem:[%s534_s3 + $0xd0] sm:$0xff] %v230_v3 }
  0xdc   :  { %303 = vst [vmem:[%s534_s3 + $0xd8] sm:$0xff] %v271_v4  ;;  %v150_v5 = vpop.f32.mrf.mxu0 }
  0xdd   :  { %v151_v7 = vadd.f32 %v150_v5, %v395_v9 }
  0xde   :  { %v191_v6 = vpop.f32.mrf.mxu1 }
  0xdf   :  { %v192_v8 = vadd.f32 %v191_v6, %v397_v10  ;;  %304 = vst [vmem:[%s534_s3 + $0xe0] sm:$0xff] %v151_v7 }
  0xe0   :  { %v232_v13 = vpop.f32.mrf.mxu2  ;;  %v273_v14 = vpop.f32.mrf.mxu3 }
  0xe1   :  { %v233_v15 = vadd.f32 %v232_v13, %v399_v11  ;;  %v274_v16 = vadd.f32 %v273_v14, %v401_v12  ;;  %305 = vst [vmem:[%s534_s3 + $0xe8] sm:$0xff] %v192_v8 }
  0xe3   :  { %306 = vst [vmem:[%s534_s3 + $0xf0] sm:$0xff] %v233_v15 }
  0xe4   :  { %307 = vst [vmem:[%s534_s3 + $0xf8] sm:$0xff] %v274_v16 }
  0xe5   :  { %312 = vsyncpa [#allocation3], 1 }

// kernel: lstm_network_forward.5
= control target key start
LH: loop header
LB: loop body
LE: loop exit
PB: predicated region body
PF: predicated region fallthrough
CT: control target
= control target key end

     0   :  { %7 = vsyncpa [#allocation5], 0  ;;  %s1617_s12 = smov [#allocation4]   ;;  %s1618_s14 = smov 512   ;;  %s2555_s0 = inlined_call_operand.vmem [shape: f32[8,8,512], index: 0, kind: input, shape index: {}]   ;;  %s2556_s1 = inlined_call_operand.hbm [shape: f32[128,512], index: 1, kind: input, shape index: {}]   ;;  %s2557_s2 = inlined_call_operand.vmem [shape: f32[8,8,128], index: 2, kind: output, shape index: {}]  }
   0x1   :  { %s14_s11 = sshll.u32 %s2556_s1, 4  ;;  %s16_s13 = sshll.u32 %s1617_s12, 4  ;;  %s15_s11 = int_to_ptr.hbm [resolvable:$true] %s14_s11  ;;  %s17_s13 = int_to_ptr.vmem [resolvable:$true] %s16_s13 }
   0x2   :  { %s1619_s15 = smov 32  }
   0x3   :  { %22 = dma.hbm_to_vmem [thread:$0]  %s15_s11, 8192, %s17_s13, [#allocation5], %s1618_s14, %s1618_s14, %s1619_s15  }
   0x4   :  { %1615 = dma.done.wait [#allocation5], 8192  }
   0x5   :  { %1616 = vsyncadd [#allocation5], 4294959104  ;;  %v1639_v0 = vld [vmem:[#allocation4 + $0x1e0] sm:$0xff]  ;;  %v1641_v1 = vld [vmem:[#allocation4 + $0x1e8] sm:$0xff]  ;;  %v1620_v60 = vmov 0.0  }
   0x6   :  { %2664 = vst [vmem:[#allocation7_spill] sm:$0xff] %v1639_v0  ;;  %v1643_v2 = vld [vmem:[#allocation4 + $0x1f8] sm:$0xff]  ;;  %103 = vmatpush.msra.mxu0 %v1639_v0  ;;  %123 = vmatpush.msra.mxu1 %v1641_v1  ;;  %v1647_v3 = vld [vmem:[#allocation4 + $0x1c0] sm:$0xff]  ;;  %v1649_v4 = vld [vmem:[#allocation4 + $0x1c8] sm:$0xff] }
   0x7   :  { %v1651_v5 = vld [vmem:[#allocation4 + $0x1d8] sm:$0xff]  ;;  %163 = vmatpush.msra.mxu3 %v1643_v2  ;;  %v1654_v6 = vld [vmem:[#allocation4 + $0x1a0] sm:$0xff]  ;;  %v1656_v7 = vld [vmem:[#allocation4 + $0x1a8] sm:$0xff] }
   0x8   :  { %104 = vmatpush.msra.mxu0 %v1647_v3  ;;  %124 = vmatpush.msra.mxu1 %v1649_v4  ;;  %v1660_v8 = vld [vmem:[#allocation4 + $0x1b8] sm:$0xff]  ;;  %v1663_v9 = vld [vmem:[#allocation4 + $0x180] sm:$0xff]  ;;  %v1665_v10 = vld [vmem:[#allocation4 + $0x188] sm:$0xff] }
   0x9   :  { %164 = vmatpush.msra.mxu3 %v1651_v5  ;;  %v1669_v11 = vld [vmem:[#allocation4 + $0x198] sm:$0xff]  ;;  %v1672_v12 = vld [vmem:[#allocation4 + $0x160] sm:$0xff]  ;;  %v1674_v13 = vld [vmem:[#allocation4 + $0x168] sm:$0xff] }
   0xa   :  { %105 = vmatpush.msra.mxu0 %v1654_v6  ;;  %125 = vmatpush.msra.mxu1 %v1656_v7  ;;  %v1678_v14 = vld [vmem:[#allocation4 + $0x178] sm:$0xff]  ;;  %v1681_v15 = vld [vmem:[#allocation4 + $0x140] sm:$0xff]  ;;  %v1683_v16 = vld [vmem:[#allocation4 + $0x148] sm:$0xff] }
   0xb   :  { %165 = vmatpush.msra.mxu3 %v1660_v8  ;;  %v1685_v17 = vld [vmem:[#allocation4 + $0x1f0] sm:$0xff]  ;;  %v1689_v18 = vld [vmem:[#allocation4 + $0x158] sm:$0xff]  ;;  %v1694_v20 = vld [vmem:[#allocation4 + $0x120] sm:$0xff] }
   0xc   :  { %106 = vmatpush.msra.mxu0 %v1663_v9  ;;  %126 = vmatpush.msra.mxu1 %v1665_v10  ;;  %v1691_v19 = vld [vmem:[#allocation4 + $0x1d0] sm:$0xff]  ;;  %v1696_v21 = vld [vmem:[#allocation4 + $0x128] sm:$0xff]  ;;  %v1701_v22 = vld [vmem:[#allocation4 + $0x138] sm:$0xff] }
   0xd   :  { %166 = vmatpush.msra.mxu3 %v1669_v11  ;;  %143 = vmatpush.msra.mxu2 %v1685_v17  ;;  %v1703_v23 = vld [vmem:[#allocation4 + $0x1b0] sm:$0xff]  ;;  %v1706_v24 = vld [vmem:[#allocation4 + $0x100] sm:$0xff]  ;;  %v1708_v25 = vld [vmem:[#allocation4 + $0x108] sm:$0xff] }
   0xe   :  { %107 = vmatpush.msra.mxu0 %v1672_v12  ;;  %127 = vmatpush.msra.mxu1 %v1674_v13  ;;  %v1713_v26 = vld [vmem:[#allocation4 + $0x118] sm:$0xff]  ;;  %v1715_v27 = vld [vmem:[#allocation4 + $0x190] sm:$0xff]  ;;  %v1718_v28 = vld [vmem:[#allocation4 + $0xe0] sm:$0xff] }
   0xf   :  { %167 = vmatpush.msra.mxu3 %v1678_v14  ;;  %144 = vmatpush.msra.mxu2 %v1691_v19  ;;  %v1720_v29 = vld [vmem:[#allocation4 + $0xe8] sm:$0xff]  ;;  %v1725_v30 = vld [vmem:[#allocation4 + $0xf8] sm:$0xff]  ;;  %v1727_v31 = vld [vmem:[#allocation4 + $0x170] sm:$0xff] }
  0x10   :  { %108 = vmatpush.msra.mxu0 %v1681_v15  ;;  %128 = vmatpush.msra.mxu1 %v1683_v16  ;;  %v1730_v32 = vld [vmem:[#allocation4 + $0xc0] sm:$0xff]  ;;  %v1732_v33 = vld [vmem:[#allocation4 + $0xc8] sm:$0xff]  ;;  %v1737_v34 = vld [vmem:[#allocation4 + $0xd8] sm:$0xff] }
  0x11   :  { %168 = vmatpush.msra.mxu3 %v1689_v18  ;;  %145 = vmatpush.msra.mxu2 %v1703_v23  ;;  %2665 = vst [vmem:[#allocation8_spill] sm:$0xff] %v1737_v34  ;;  %v1739_v35 = vld [vmem:[#allocation4 + $0x150] sm:$0xff]  ;;  %v1742_v36 = vld [vmem:[#allocation4 + $0xa0] sm:$0xff]  ;;  %v1744_v37 = vld [vmem:[#allocation4 + $0xa8] sm:$0xff] }
  0x12   :  { %109 = vmatpush.msra.mxu0 %v1694_v20  ;;  %129 = vmatpush.msra.mxu1 %v1696_v21  ;;  %2666 = vst [vmem:[#allocation9_spill] sm:$0xff] %v1742_v36  ;;  %v1749_v38 = vld [vmem:[#allocation4 + $0xb8] sm:$0xff]  ;;  %v1751_v39 = vld [vmem:[#allocation4 + $0x130] sm:$0xff]  ;;  %v1754_v40 = vld [vmem:[#allocation4 + $0x80] sm:$0xff] }
  0x13   :  { %169 = vmatpush.msra.mxu3 %v1701_v22  ;;  %146 = vmatpush.msra.mxu2 %v1715_v27  ;;  %2667 = vst [vmem:[#allocation10_spill] sm:$0xff] %v1744_v37  ;;  %v1756_v41 = vld [vmem:[#allocation4 + $0x88] sm:$0xff]  ;;  %v1761_v42 = vld [vmem:[#allocation4 + $0x98] sm:$0xff]  ;;  %v1763_v43 = vld [vmem:[#allocation4 + $0x110] sm:$0xff] }
  0x14   :  { %110 = vmatpush.msra.mxu0 %v1706_v24  ;;  %130 = vmatpush.msra.mxu1 %v1708_v25  ;;  %2668 = vst [vmem:[#allocation11_spill] sm:$0xff] %v1749_v38  ;;  %v1766_v44 = vld [vmem:[#allocation4 + $0x60] sm:$0xff]  ;;  %v1768_v45 = vld [vmem:[#allocation4 + $0x68] sm:$0xff]  ;;  %v1773_v46 = vld [vmem:[#allocation4 + $0x78] sm:$0xff] }
  0x15   :  { %170 = vmatpush.msra.mxu3 %v1713_v26  ;;  %147 = vmatpush.msra.mxu2 %v1727_v31  ;;  %2669 = vst [vmem:[#allocation12_spill] sm:$0xff] %v1754_v40  ;;  %v1775_v47 = vld [vmem:[#allocation4 + $0xf0] sm:$0xff]  ;;  %v1778_v48 = vld [vmem:[#allocation4 + $0x40] sm:$0xff]  ;;  %v1780_v49 = vld [vmem:[#allocation4 + $0x48] sm:$0xff] }
  0x16   :  { %111 = vmatpush.msra.mxu0 %v1718_v28  ;;  %131 = vmatpush.msra.mxu1 %v1720_v29  ;;  %2670 = vst [vmem:[#allocation13_spill] sm:$0xff] %v1756_v41  ;;  %v1785_v50 = vld [vmem:[#allocation4 + $0x58] sm:$0xff]  ;;  %v1787_v51 = vld [vmem:[#allocation4 + $0xd0] sm:$0xff]  ;;  %v1790_v52 = vld [vmem:[#allocation4 + $0x20] sm:$0xff] }
  0x17   :  { %171 = vmatpush.msra.mxu3 %v1725_v30  ;;  %148 = vmatpush.msra.mxu2 %v1739_v35  ;;  %2671 = vst [vmem:[#allocation14_spill] sm:$0xff] %v1761_v42  ;;  %v1792_v53 = vld [vmem:[#allocation4 + $0x28] sm:$0xff]  ;;  %v1797_v54 = vld [vmem:[#allocation4 + $0x38] sm:$0xff]  ;;  %v1799_v55 = vld [vmem:[#allocation4 + $0xb0] sm:$0xff] }
  0x18   :  { %112 = vmatpush.msra.mxu0 %v1730_v32  ;;  %132 = vmatpush.msra.mxu1 %v1732_v33  ;;  %2672 = vst [vmem:[#allocation15_spill] sm:$0xff] %v1766_v44  ;;  %v1802_v56 = vld [vmem:[#allocation4] sm:$0xff]  ;;  %v1804_v57 = vld [vmem:[#allocation4 + $0x8] sm:$0xff]  ;;  %v1809_v58 = vld [vmem:[#allocation4 + $0x18] sm:$0xff] }
  0x19   :  { %172 = vmatpush.msra.mxu3 %v1737_v34  ;;  %2673 = vst [vmem:[#allocation16_spill] sm:$0xff] %v1768_v45  ;;  %149 = vmatpush.msra.mxu2 %v1751_v39  ;;  %v1815_v59 = vld [vmem:[#allocation4 + $0x90] sm:$0xff] }
  0x1a   :  { %113 = vmatpush.msra.mxu0 %v1742_v36  ;;  %133 = vmatpush.msra.mxu1 %v1744_v37  ;;  %2674 = vst [vmem:[#allocation17_spill] sm:$0xff] %v1773_v46  ;;  %v1818_v61 = vld [vmem:[#allocation4 + $0x70] sm:$0xff] }
  0x1b   :  { %173 = vmatpush.msra.mxu3 %v1749_v38  ;;  %2675 = vst [vmem:[#allocation18_spill] sm:$0xff] %v1778_v48  ;;  %150 = vmatpush.msra.mxu2 %v1763_v43  ;;  %v1822_v62 = vld [vmem:[#allocation4 + $0x50] sm:$0xff] }
  0x1c   :  { %114 = vmatpush.msra.mxu0 %v1754_v40  ;;  %134 = vmatpush.msra.mxu1 %v1756_v41  ;;  %2676 = vst [vmem:[#allocation19_spill] sm:$0xff] %v1780_v49  ;;  %v1828_v63 = vld [vmem:[#allocation4 + $0x30] sm:$0xff] }
  0x1d   :  { %174 = vmatpush.msra.mxu3 %v1761_v42  ;;  %2677 = vst [vmem:[#allocation20_spill] sm:$0xff] %v1785_v50  ;;  %151 = vmatpush.msra.mxu2 %v1775_v47 }
  0x1e   :  { %115 = vmatpush.msra.mxu0 %v1766_v44  ;;  %135 = vmatpush.msra.mxu1 %v1768_v45  ;;  %2678 = vst [vmem:[#allocation21_spill] sm:$0xff] %v1787_v51 }
  0x1f   :  { %175 = vmatpush.msra.mxu3 %v1773_v46  ;;  %2679 = vst [vmem:[#allocation22_spill] sm:$0xff] %v1790_v52  ;;  %152 = vmatpush.msra.mxu2 %v1787_v51 }
  0x20   :  { %2680 = vst [vmem:[#allocation23_spill] sm:$0xff] %v1792_v53  ;;  %116 = vmatpush.msra.mxu0 %v1778_v48  ;;  %136 = vmatpush.msra.mxu1 %v1780_v49 }
  0x21   :  { %2681 = vst [vmem:[#allocation24_spill] sm:$0xff] %v1797_v54  ;;  %176 = vmatpush.msra.mxu3 %v1785_v50  ;;  %153 = vmatpush.msra.mxu2 %v1799_v55 }
  0x22   :  { %2682 = vst [vmem:[#allocation25_spill] sm:$0xff] %v1799_v55  ;;  %117 = vmatpush.msra.mxu0 %v1790_v52  ;;  %137 = vmatpush.msra.mxu1 %v1792_v53 }
  0x23   :  { %2683 = vst [vmem:[#allocation26_spill] sm:$0xff] %v1802_v56  ;;  %177 = vmatpush.msra.mxu3 %v1797_v54  ;;  %154 = vmatpush.msra.mxu2 %v1815_v59 }
  0x24   :  { %2684 = vst [vmem:[#allocation27_spill] sm:$0xff] %v1804_v57  ;;  %118 = vmatpush.msra.mxu0 %v1802_v56  ;;  %138 = vmatpush.msra.mxu1 %v1804_v57 }
  0x25   :  { %2685 = vst [vmem:[#allocation28_spill] sm:$0xff] %v1809_v58  ;;  %178 = vmatpush.msra.mxu3 %v1809_v58  ;;  %119 = vmatmul.f32.vlgmr.msra.gmra.mxu0 %v1620_v60 }
  0x26   :  { %2686 = vst [vmem:[#allocation29_spill] sm:$0xff] %v1815_v59  ;;  %139 = vmatmul.f32.vlgmr.msra.gmra.mxu1 %v1620_v60  ;;  %179 = vmatmul.f32.vlgmr.msra.gmra.mxu3 %v1620_v60 }
  0x27   :  { %2687 = vst [vmem:[#allocation30_spill] sm:$0xff] %v1818_v61  ;;  %256 = vmatpush.msrb.mxu0 %v1639_v0  ;;  %276 = vmatpush.msrb.mxu1 %v1641_v1  ;;  %v1834_v0 = vld [vmem:[#allocation4 + $0x10] sm:$0xff] }
  0x28   :  { %2688 = vst [vmem:[#allocation31_spill] sm:$0xff] %v1822_v62  ;;  %316 = vmatpush.msrb.mxu3 %v1643_v2  ;;  %155 = vmatpush.msra.mxu2 %v1818_v61 }
  0x29   :  { %257 = vmatpush.msrb.mxu0 %v1647_v3  ;;  %2689 = vst [vmem:[#allocation32_spill] sm:$0xff] %v1828_v63  ;;  %277 = vmatpush.msrb.mxu1 %v1649_v4 }
  0x2a   :  { %317 = vmatpush.msrb.mxu3 %v1651_v5  ;;  %156 = vmatpush.msra.mxu2 %v1822_v62  ;;  %2690 = vst [vmem:[#allocation33_spill] sm:$0xff] %v1834_v0 }
  0x2b   :  { %258 = vmatpush.msrb.mxu0 %v1654_v6  ;;  %278 = vmatpush.msrb.mxu1 %v1656_v7 }
  0x2c   :  { %318 = vmatpush.msrb.mxu3 %v1660_v8  ;;  %157 = vmatpush.msra.mxu2 %v1828_v63 }
  0x2d   :  { %259 = vmatpush.msrb.mxu0 %v1663_v9  ;;  %279 = vmatpush.msrb.mxu1 %v1665_v10 }
  0x2e   :  { %319 = vmatpush.msrb.mxu3 %v1669_v11  ;;  %158 = vmatpush.msra.mxu2 %v1834_v0 }
  0x2f   :  { %260 = vmatpush.msrb.mxu0 %v1672_v12  ;;  %159 = vmatmul.f32.vlgmr.msra.gmra.mxu2 %v1620_v60  ;;  %v2691_v60 = vld [vmem:[#allocation7_spill] sm:$0xff] }
  0x30   :  { %280 = vmatpush.msrb.mxu1 %v1674_v13  ;;  %296 = vmatpush.msrb.mxu2 %v1685_v17 }
  0x31   :  { %320 = vmatpush.msrb.mxu3 %v1678_v14  ;;  %261 = vmatpush.msrb.mxu0 %v1681_v15 }
  0x32   :  { %281 = vmatpush.msrb.mxu1 %v1683_v16  ;;  %297 = vmatpush.msrb.mxu2 %v1691_v19 }
  0x33   :  { %321 = vmatpush.msrb.mxu3 %v1689_v18  ;;  %262 = vmatpush.msrb.mxu0 %v1694_v20 }
  0x34   :  { %282 = vmatpush.msrb.mxu1 %v1696_v21  ;;  %298 = vmatpush.msrb.mxu2 %v1703_v23 }
  0x35   :  { %322 = vmatpush.msrb.mxu3 %v1701_v22  ;;  %263 = vmatpush.msrb.mxu0 %v1706_v24 }
  0x36   :  { %283 = vmatpush.msrb.mxu1 %v1708_v25  ;;  %299 = vmatpush.msrb.mxu2 %v1715_v27 }
  0x37   :  { %323 = vmatpush.msrb.mxu3 %v1713_v26  ;;  %264 = vmatpush.msrb.mxu0 %v1718_v28 }
  0x38   :  { %284 = vmatpush.msrb.mxu1 %v1720_v29  ;;  %300 = vmatpush.msrb.mxu2 %v1727_v31 }
  0x39   :  { %324 = vmatpush.msrb.mxu3 %v1725_v30  ;;  %265 = vmatpush.msrb.mxu0 %v1730_v32 }
  0x3a   :  { %285 = vmatpush.msrb.mxu1 %v1732_v33  ;;  %301 = vmatpush.msrb.mxu2 %v1739_v35 }
  0x3b   :  { %325 = vmatpush.msrb.mxu3 %v1737_v34  ;;  %266 = vmatpush.msrb.mxu0 %v1742_v36 }
  0x3c   :  { %286 = vmatpush.msrb.mxu1 %v1744_v37  ;;  %302 = vmatpush.msrb.mxu2 %v1751_v39 }
  0x3d   :  { %326 = vmatpush.msrb.mxu3 %v1749_v38  ;;  %267 = vmatpush.msrb.mxu0 %v1754_v40 }
  0x3e   :  { %287 = vmatpush.msrb.mxu1 %v1756_v41  ;;  %303 = vmatpush.msrb.mxu2 %v1763_v43 }
  0x3f   :  { %327 = vmatpush.msrb.mxu3 %v1761_v42  ;;  %268 = vmatpush.msrb.mxu0 %v1766_v44 }
  0x40   :  { %288 = vmatpush.msrb.mxu1 %v1768_v45  ;;  %304 = vmatpush.msrb.mxu2 %v1775_v47 }
  0x41   :  { %328 = vmatpush.msrb.mxu3 %v1773_v46  ;;  %269 = vmatpush.msrb.mxu0 %v1778_v48 }
  0x42   :  { %289 = vmatpush.msrb.mxu1 %v1780_v49  ;;  %305 = vmatpush.msrb.mxu2 %v1787_v51 }
  0x43   :  { %329 = vmatpush.msrb.mxu3 %v1785_v50  ;;  %270 = vmatpush.msrb.mxu0 %v1790_v52 }
  0x44   :  { %290 = vmatpush.msrb.mxu1 %v1792_v53  ;;  %306 = vmatpush.msrb.mxu2 %v1799_v55 }
  0x45   :  { %330 = vmatpush.msrb.mxu3 %v1797_v54  ;;  %271 = vmatpush.msrb.mxu0 %v1802_v56 }
  0x46   :  { %291 = vmatpush.msrb.mxu1 %v1804_v57  ;;  %307 = vmatpush.msrb.mxu2 %v1815_v59 }
  0x47   :  { %331 = vmatpush.msrb.mxu3 %v1809_v58  ;;  %410 = vmatpush.msra.mxu0 %v2691_v60 }
  0x48   :  { %430 = vmatpush.msra.mxu1 %v1641_v1  ;;  %308 = vmatpush.msrb.mxu2 %v1818_v61 }
  0x49   :  { %470 = vmatpush.msra.mxu3 %v1643_v2  ;;  %411 = vmatpush.msra.mxu0 %v1647_v3 }
  0x4a   :  { %431 = vmatpush.msra.mxu1 %v1649_v4  ;;  %309 = vmatpush.msrb.mxu2 %v1822_v62 }
  0x4b   :  { %471 = vmatpush.msra.mxu3 %v1651_v5  ;;  %412 = vmatpush.msra.mxu0 %v1654_v6 }
  0x4c   :  { %432 = vmatpush.msra.mxu1 %v1656_v7  ;;  %310 = vmatpush.msrb.mxu2 %v1828_v63 }
  0x4d   :  { %472 = vmatpush.msra.mxu3 %v1660_v8  ;;  %413 = vmatpush.msra.mxu0 %v1663_v9 }
  0x4e   :  { %433 = vmatpush.msra.mxu1 %v1665_v10  ;;  %311 = vmatpush.msrb.mxu2 %v1834_v0 }
  0x4f   :  { %473 = vmatpush.msra.mxu3 %v1669_v11  ;;  %414 = vmatpush.msra.mxu0 %v1672_v12 }
  0x50   :  { %450 = vmatpush.msra.mxu2 %v1685_v17  ;;  %434 = vmatpush.msra.mxu1 %v1674_v13 }
  0x51   :  { %474 = vmatpush.msra.mxu3 %v1678_v14  ;;  %415 = vmatpush.msra.mxu0 %v1681_v15 }
  0x52   :  { %451 = vmatpush.msra.mxu2 %v1691_v19  ;;  %435 = vmatpush.msra.mxu1 %v1683_v16 }
  0x53   :  { %475 = vmatpush.msra.mxu3 %v1689_v18  ;;  %416 = vmatpush.msra.mxu0 %v1694_v20 }
  0x54   :  { %452 = vmatpush.msra.mxu2 %v1703_v23  ;;  %436 = vmatpush.msra.mxu1 %v1696_v21 }
  0x55   :  { %476 = vmatpush.msra.mxu3 %v1701_v22  ;;  %417 = vmatpush.msra.mxu0 %v1706_v24 }
  0x56   :  { %453 = vmatpush.msra.mxu2 %v1715_v27  ;;  %437 = vmatpush.msra.mxu1 %v1708_v25 }
  0x57   :  { %477 = vmatpush.msra.mxu3 %v1713_v26  ;;  %418 = vmatpush.msra.mxu0 %v1718_v28 }
  0x58   :  { %454 = vmatpush.msra.mxu2 %v1727_v31  ;;  %438 = vmatpush.msra.mxu1 %v1720_v29 }
  0x59   :  { %478 = vmatpush.msra.mxu3 %v1725_v30  ;;  %419 = vmatpush.msra.mxu0 %v1730_v32 }
  0x5a   :  { %455 = vmatpush.msra.mxu2 %v1739_v35  ;;  %439 = vmatpush.msra.mxu1 %v1732_v33 }
  0x5b   :  { %479 = vmatpush.msra.mxu3 %v1737_v34  ;;  %420 = vmatpush.msra.mxu0 %v1742_v36 }
  0x5c   :  { %456 = vmatpush.msra.mxu2 %v1751_v39  ;;  %440 = vmatpush.msra.mxu1 %v1744_v37 }
  0x5d   :  { %480 = vmatpush.msra.mxu3 %v1749_v38  ;;  %421 = vmatpush.msra.mxu0 %v1754_v40 }
  0x5e   :  { %457 = vmatpush.msra.mxu2 %v1763_v43  ;;  %441 = vmatpush.msra.mxu1 %v1756_v41 }
  0x5f   :  { %481 = vmatpush.msra.mxu3 %v1761_v42  ;;  %422 = vmatpush.msra.mxu0 %v1766_v44 }
  0x60   :  { %458 = vmatpush.msra.mxu2 %v1775_v47  ;;  %442 = vmatpush.msra.mxu1 %v1768_v45 }
  0x61   :  { %482 = vmatpush.msra.mxu3 %v1773_v46  ;;  %423 = vmatpush.msra.mxu0 %v1778_v48 }
  0x62   :  { %459 = vmatpush.msra.mxu2 %v1787_v51  ;;  %443 = vmatpush.msra.mxu1 %v1780_v49 }
  0x63   :  { %483 = vmatpush.msra.mxu3 %v1785_v50  ;;  %424 = vmatpush.msra.mxu0 %v1790_v52 }
  0x64   :  { %460 = vmatpush.msra.mxu2 %v1799_v55  ;;  %444 = vmatpush.msra.mxu1 %v1792_v53 }
  0x65   :  { %484 = vmatpush.msra.mxu3 %v1797_v54  ;;  %425 = vmatpush.msra.mxu0 %v1802_v56  ;;  %v99_v54 = vld [vmem:[%s2555_s0] sm:$0xff]  ;;  %v100_v56 = vld [vmem:[%s2555_s0 + $0x8] sm:$0xff] }
  0x66   :  { %461 = vmatpush.msra.mxu2 %v1815_v59  ;;  %445 = vmatpush.msra.mxu1 %v1804_v57 }
  0x67   :  { %485 = vmatpush.msra.mxu3 %v1809_v58 }
  0x68   :  { %462 = vmatpush.msra.mxu2 %v1818_v61 }
  0x6a   :  { %463 = vmatpush.msra.mxu2 %v1822_v62 }
  0x6c   :  { %464 = vmatpush.msra.mxu2 %v1828_v63  ;;  %v102_v63 = vld [vmem:[%s2555_s0 + $0x18] sm:$0xff] }
  0x6e   :  { %465 = vmatpush.msra.mxu2 %v1834_v0 }
  0xa2   :  { %v120_v53 = vpop.f32.mrf.mxu0 }
  0xa3   :  { %v183_v57 = vadd.f32 %v120_v53, %v99_v54  ;;  %v140_v52 = vpop.f32.mrf.mxu1 }
  0xa4   :  { %v184_v58 = vadd.f32 %v140_v52, %v100_v56  ;;  %v101_v52 = vld [vmem:[%s2555_s0 + $0x10] sm:$0xff] }
  0xa5   :  { %v1336_v50 = vmul.f32 -1.442695, %v183_v57 }
  0xa6   :  { %v1337_v49 = vmul.f32 -1.442695, %v184_v58 }
  0xa7   :  { %1399 = vpow2.f32 %v1336_v50 }
  0xa8   :  { %1401 = vpow2.f32 %v1337_v49 }
  0xa9   :  { %v180_v0 = vpop.f32.mrf.mxu3 }
  0xaa   :  { %v186_v62 = vadd.f32 %v180_v0, %v102_v63 }
  0xac   :  { %v1338_v48 = vmul.f32 -1.442695, %v186_v62 }
  0xad   :  { %v1400_v46 = vpop.eup %1399 }
  0xae   :  { %v1402_v61 = vpop.eup %1401  ;;  %v190_v45 = vadd.f32 1.0, %v1400_v46  ;;  %1403 = vpow2.f32 %v1338_v48 }
  0xaf   :  { %v209_v44 = vadd.f32 1.0, %v1402_v61 }
  0xb0   :  { %1405 = vrcp.f32 %v190_v45  ;;  %v202_v48 = vand.u32 2147483648, %v190_v45  ;;  %v200_v42 = vand.u32 2147483647, %v190_v45  ;;  %vm196_vm2 = vweird.f32 %v190_v45 }
  0xb1   :  { %1407 = vrcp.f32 %v209_v44  ;;  %v221_v61 = vand.u32 2147483648, %v209_v44  ;;  %v219_v41 = vand.u32 2147483647, %v209_v44  ;;  %vm215_vm3 = vweird.f32 %v209_v44 }
  0xb2   :  { %v160_v50 = vpop.f32.mrf.mxu2  ;;  %vm201_vm5 = vcmp.eq.f32.partialorder %v200_v42, 8.507059e+37 }
  0xb3   :  { %v185_v54 = vadd.f32 %v160_v50, %v101_v52  ;;  %vm220_vm7 = vcmp.eq.f32.partialorder %v219_v41, 8.507059e+37 }
  0xb4   :  { %v1404_v53 = vpop.eup %1403 }
  0xb5   :  { %v229_v56 = vadd.f32 1.0, %v1404_v53  ;;  %v203_v53 = vor.u32 1.1754944e-38, %v202_v48  ;;  %v2699_v48 = vld [vmem:[#allocation13_spill] sm:$0xff] }
  0xb6   :  { %v1406_v57 = vpop.eup %1405 }
  0xb7   :  { %v1408_v49 = vpop.eup %1407  ;;  %v192_v58 = vmul.f32 %v1406_v57, %v190_v45  ;;  %1409 = vrcp.f32 %v229_v56  ;;  %vm197_vm0 = vweird.f32 %v1406_v57  ;;  %v241_v45 = vand.u32 2147483648, %v229_v56 }
  0xb8   :  { %v211_v0 = vmul.f32 %v1408_v49, %v209_v44  ;;  %1411 = vtanh.f32 %v185_v54  ;;  %vm216_vm1 = vweird.f32 %v1408_v49  ;;  %vm198_vm4 = vmor %vm196_vm2, %vm197_vm0  ;;  %v222_v54 = vor.u32 1.1754944e-38, %v221_v61  ;;  %v2700_v61 = vld [vmem:[#allocation29_spill] sm:$0xff] }
  0xb9   :  { %v193_v62 = vsub.f32 1.0, %v192_v58  ;;  %vm217_vm6 = vmor %vm215_vm3, %vm216_vm1  ;;  %vm235_vm9 = vweird.f32 %v229_v56  ;;  %v242_v42 = vor.u32 1.1754944e-38, %v241_v45  ;;  %v2710_v45 = vld [vmem:[#allocation22_spill] sm:$0xff] }
  0xba   :  { %v212_v46 = vsub.f32 1.0, %v211_v0 }
  0xbb   :  { %v194_v63 = vmul.f32 %v1406_v57, %v193_v62 }
  0xbc   :  { %v213_v59 = vmul.f32 %v1408_v49, %v212_v46 }
  0xbd   :  { %v1410_v40 = vpop.eup %1409  ;;  %v195_v38 = vadd.f32 %v1406_v57, %v194_v63 }
  0xbe   :  { %v1412_v52 = vpop.eup %1411  ;;  %v231_v50 = vmul.f32 %v1410_v40, %v229_v56  ;;  %v214_v55 = vadd.f32 %v1408_v49, %v213_v59  ;;  %vm236_vm8 = vweird.f32 %v1410_v40  ;;  %v239_v59 = vand.u32 2147483647, %v229_v56  ;;  %v2697_v56 = vld [vmem:[#allocation11_spill] sm:$0xff] }
  0xbf   :  { %v199_v58 = vsel %vm198_vm4, %v1406_v57, %v195_v38  ;;  %vm237_vm10 = vmor %vm235_vm9, %vm236_vm8 }
  0xc0   :  { %v232_v0 = vsub.f32 1.0, %v231_v50  ;;  %v204_v62 = vsel %vm201_vm5, %v203_v53, %v199_v58  ;;  %v218_v37 = vsel %vm217_vm6, %v1408_v49, %v214_v55  ;;  %vm240_vm11 = vcmp.eq.f32.partialorder %v239_v59, 8.507059e+37  ;;  %v2698_v49 = vld [vmem:[#allocation12_spill] sm:$0xff]  ;;  %v2702_v50 = vld [vmem:[#allocation15_spill] sm:$0xff]  ;;  %v2705_v58 = vld [vmem:[#allocation17_spill] sm:$0xff] }
  0xc1   :  { %v223_v46 = vsel %vm220_vm7, %v222_v54, %v218_v37  ;;  %v246_v36 = vmul.f32 %v1412_v52, %v204_v62  ;;  %v2694_v37 = vld [vmem:[#allocation9_spill] sm:$0xff]  ;;  %v2701_v52 = vld [vmem:[#allocation14_spill] sm:$0xff]  ;;  %v2703_v53 = vld [vmem:[#allocation16_spill] sm:$0xff] }
  0xc2   :  { %v233_v34 = vmul.f32 %v1410_v40, %v232_v0  ;;  %v245_v51 = vmul.f32 0.0, %v223_v46  ;;  %v2704_v54 = vld [vmem:[#allocation30_spill] sm:$0xff]  ;;  %v2707_v62 = vld [vmem:[#allocation19_spill] sm:$0xff] }
  0xc3   :  { %v2706_v0 = vld [vmem:[#allocation18_spill] sm:$0xff]  ;;  %v2708_v46 = vld [vmem:[#allocation31_spill] sm:$0xff] }
  0xc4   :  { %v1971_v63 = vadd.f32 %v246_v36, %v245_v51  ;;  %v234_v44 = vadd.f32 %v1410_v40, %v233_v34  ;;  %v2692_v34 = vld [vmem:[#allocation21_spill] sm:$0xff]  ;;  %v2693_v36 = vld [vmem:[#allocation8_spill] sm:$0xff]  ;;  %v2711_v59 = vld [vmem:[#allocation23_spill] sm:$0xff] }
  0xc5   :  { %v2696_v51 = vld [vmem:[#allocation25_spill] sm:$0xff] }
  0xc6   :  { %1413 = vtanh.f32 %v1971_v63  ;;  %v238_v38 = vsel %vm237_vm10, %v1410_v40, %v234_v44  ;;  %v2695_v40 = vld [vmem:[#allocation10_spill] sm:$0xff]  ;;  %v2709_v44 = vld [vmem:[#allocation20_spill] sm:$0xff] }
  0xc7   :  { %v243_v55 = vsel %vm240_vm11, %v242_v42, %v238_v38  ;;  %v2712_v38 = vld [vmem:[#allocation32_spill] sm:$0xff] }
  0xc8   :  { %v2713_v42 = vld [vmem:[#allocation24_spill] sm:$0xff] }
  0xcc   :  { %v1414_v57 = vpop.eup %1413 }
  0xcd   :  { %v249_v41 = vmul.f32 %v1414_v57, %v243_v55  ;;  %v2714_v57 = vld [vmem:[#allocation26_spill] sm:$0xff]  ;;  %v2715_v55 = vld [vmem:[#allocation27_spill] sm:$0xff] }
  0xcf   :  { %250 = vst [vmem:[%s2557_s2] sm:$0xff] %v249_v41  ;;  %272 = vmatmul.f32.vlgmr.msrb.gmra.mxu0 %v249_v41  ;;  %292 = vmatmul.f32.vlgmr.msrb.gmra.mxu1 %v249_v41 }
  0xd0   :  { %312 = vmatmul.f32.vlgmr.msrb.gmra.mxu2 %v249_v41  ;;  %332 = vmatmul.f32.vlgmr.msrb.gmra.mxu3 %v249_v41  ;;  %v2716_v41 = vld [vmem:[#allocation33_spill] sm:$0xff] }
  0xd1   :  { %564 = vmatpush.msrb.mxu0 %v2691_v60  ;;  %584 = vmatpush.msrb.mxu1 %v1641_v1 }
  0xd2   :  { %604 = vmatpush.msrb.mxu2 %v1685_v17  ;;  %624 = vmatpush.msrb.mxu3 %v1643_v2 }
  0xd3   :  { %565 = vmatpush.msrb.mxu0 %v1647_v3  ;;  %585 = vmatpush.msrb.mxu1 %v1649_v4 }
  0xd4   :  { %605 = vmatpush.msrb.mxu2 %v1691_v19  ;;  %625 = vmatpush.msrb.mxu3 %v1651_v5 }
  0xd5   :  { %566 = vmatpush.msrb.mxu0 %v1654_v6  ;;  %586 = vmatpush.msrb.mxu1 %v1656_v7 }
  0xd6   :  { %606 = vmatpush.msrb.mxu2 %v1703_v23  ;;  %626 = vmatpush.msrb.mxu3 %v1660_v8 }
  0xd7   :  { %567 = vmatpush.msrb.mxu0 %v1663_v9  ;;  %587 = vmatpush.msrb.mxu1 %v1665_v10 }
  0xd8   :  { %607 = vmatpush.msrb.mxu2 %v1715_v27  ;;  %627 = vmatpush.msrb.mxu3 %v1669_v11 }
  0xd9   :  { %568 = vmatpush.msrb.mxu0 %v1672_v12  ;;  %588 = vmatpush.msrb.mxu1 %v1674_v13 }
  0xda   :  { %608 = vmatpush.msrb.mxu2 %v1727_v31  ;;  %628 = vmatpush.msrb.mxu3 %v1678_v14 }
  0xdb   :  { %569 = vmatpush.msrb.mxu0 %v1681_v15  ;;  %589 = vmatpush.msrb.mxu1 %v1683_v16 }
  0xdc   :  { %609 = vmatpush.msrb.mxu2 %v1739_v35  ;;  %629 = vmatpush.msrb.mxu3 %v1689_v18 }
  0xdd   :  { %570 = vmatpush.msrb.mxu0 %v1694_v20  ;;  %590 = vmatpush.msrb.mxu1 %v1696_v21 }
  0xde   :  { %610 = vmatpush.msrb.mxu2 %v1751_v39  ;;  %630 = vmatpush.msrb.mxu3 %v1701_v22 }
  0xdf   :  { %571 = vmatpush.msrb.mxu0 %v1706_v24  ;;  %591 = vmatpush.msrb.mxu1 %v1708_v25 }
  0xe0   :  { %611 = vmatpush.msrb.mxu2 %v1763_v43  ;;  %631 = vmatpush.msrb.mxu3 %v1713_v26 }
  0xe1   :  { %572 = vmatpush.msrb.mxu0 %v1718_v28  ;;  %592 = vmatpush.msrb.mxu1 %v1720_v29 }
  0xe2   :  { %612 = vmatpush.msrb.mxu2 %v1775_v47  ;;  %632 = vmatpush.msrb.mxu3 %v1725_v30 }
  0xe3   :  { %573 = vmatpush.msrb.mxu0 %v1730_v32  ;;  %593 = vmatpush.msrb.mxu1 %v1732_v33 }
  0xe4   :  { %613 = vmatpush.msrb.mxu2 %v2692_v34  ;;  %633 = vmatpush.msrb.mxu3 %v2693_v36 }
  0xe5   :  { %574 = vmatpush.msrb.mxu0 %v2694_v37  ;;  %594 = vmatpush.msrb.mxu1 %v2695_v40 }
  0xe6   :  { %614 = vmatpush.msrb.mxu2 %v2696_v51  ;;  %634 = vmatpush.msrb.mxu3 %v2697_v56 }
  0xe7   :  { %575 = vmatpush.msrb.mxu0 %v2698_v49  ;;  %595 = vmatpush.msrb.mxu1 %v2699_v48 }
  0xe8   :  { %615 = vmatpush.msrb.mxu2 %v2700_v61  ;;  %635 = vmatpush.msrb.mxu3 %v2701_v52 }
  0xe9   :  { %576 = vmatpush.msrb.mxu0 %v2702_v50  ;;  %596 = vmatpush.msrb.mxu1 %v2703_v53 }
  0xea   :  { %616 = vmatpush.msrb.mxu2 %v2704_v54  ;;  %636 = vmatpush.msrb.mxu3 %v2705_v58 }
  0xeb   :  { %577 = vmatpush.msrb.mxu0 %v2706_v0  ;;  %597 = vmatpush.msrb.mxu1 %v2707_v62  ;;  %v2717_v0 = vld [vmem:[#allocation28_spill] sm:$0xff] }
  0xec   :  { %617 = vmatpush.msrb.mxu2 %v2708_v46  ;;  %637 = vmatpush.msrb.mxu3 %v2709_v44  ;;  %v1339_v44 = vld [vmem:[%s2555_s0 + $0x20] sm:$0xff] }
  0xed   :  { %578 = vmatpush.msrb.mxu0 %v2710_v45  ;;  %598 = vmatpush.msrb.mxu1 %v2711_v59  ;;  %v1340_v59 = vld [vmem:[%s2555_s0 + $0x28] sm:$0xff] }
  0xee   :  { %618 = vmatpush.msrb.mxu2 %v2712_v38  ;;  %638 = vmatpush.msrb.mxu3 %v2713_v42 }
  0xef   :  { %579 = vmatpush.msrb.mxu0 %v2714_v57  ;;  %599 = vmatpush.msrb.mxu1 %v2715_v55 }
  0xf0   :  { %619 = vmatpush.msrb.mxu2 %v2716_v41  ;;  %639 = vmatpush.msrb.mxu3 %v2717_v0  ;;  %v1342_v41 = vld [vmem:[%s2555_s0 + $0x38] sm:$0xff] }
 0x14c   :  { %v273_v45 = vpop.f32.mrf.mxu0  ;;  %v293_v38 = vpop.f32.mrf.mxu1 }
 0x14d   :  { %v336_v46 = vadd.f32 %v1339_v44, %v273_v45  ;;  %v337_v42 = vadd.f32 %v1340_v59, %v293_v38 }
 0x14f   :  { %v1343_v62 = vmul.f32 -1.442695, %v336_v46  ;;  %v1344_v57 = vmul.f32 -1.442695, %v337_v42  ;;  %v1341_v46 = vld [vmem:[%s2555_s0 + $0x30] sm:$0xff] }
 0x151   :  { %1415 = vpow2.f32 %v1343_v62 }
 0x152   :  { %1417 = vpow2.f32 %v1344_v57 }
 0x153   :  { %v333_v0 = vpop.f32.mrf.mxu3  ;;  %v313_v62 = vpop.f32.mrf.mxu2 }
 0x154   :  { %v339_v55 = vadd.f32 %v1342_v41, %v333_v0  ;;  %v338_v38 = vadd.f32 %v1341_v46, %v313_v62 }
 0x156   :  { %v1345_v58 = vmul.f32 -1.442695, %v339_v55 }
 0x157   :  { %v1416_v54 = vpop.eup %1415 }
 0x158   :  { %v1418_v53 = vpop.eup %1417  ;;  %v343_v50 = vadd.f32 1.0, %v1416_v54  ;;  %1419 = vpow2.f32 %v1345_v58 }
 0x159   :  { %v362_v52 = vadd.f32 1.0, %v1418_v53 }
 0x15a   :  { %1421 = vrcp.f32 %v343_v50  ;;  %v355_v54 = vand.u32 2147483648, %v343_v50  ;;  %v353_v61 = vand.u32 2147483647, %v343_v50  ;;  %vm349_vm14 = vweird.f32 %v343_v50 }
 0x15b   :  { %1423 = vrcp.f32 %v362_v52  ;;  %v374_v53 = vand.u32 2147483648, %v362_v52  ;;  %v372_v49 = vand.u32 2147483647, %v362_v52  ;;  %vm368_vm15 = vweird.f32 %v362_v52 }
 0x15c   :  { %v356_v46 = vor.u32 1.1754944e-38, %v355_v54  ;;  %vm354_vm2 = vcmp.eq.f32.partialorder %v353_v61, 8.507059e+37 }
 0x15d   :  { %vm373_vm3 = vcmp.eq.f32.partialorder %v372_v49, 8.507059e+37 }
 0x15e   :  { %v1420_v44 = vpop.eup %1419 }
 0x15f   :  { %v382_v45 = vadd.f32 1.0, %v1420_v44 }
 0x160   :  { %v1422_v59 = vpop.eup %1421 }
 0x161   :  { %v1424_v42 = vpop.eup %1423  ;;  %v345_v57 = vmul.f32 %v1422_v59, %v343_v50  ;;  %1425 = vrcp.f32 %v382_v45  ;;  %vm350_vm12 = vweird.f32 %v1422_v59  ;;  %vm388_vm5 = vweird.f32 %v382_v45 }
 0x162   :  { %v364_v0 = vmul.f32 %v1424_v42, %v362_v52  ;;  %1427 = vtanh.f32 %v338_v38  ;;  %vm369_vm13 = vweird.f32 %v1424_v42  ;;  %vm351_vm0 = vmor %vm349_vm14, %vm350_vm12 }
 0x163   :  { %v346_v55 = vsub.f32 1.0, %v345_v57  ;;  %vm370_vm1 = vmor %vm368_vm15, %vm369_vm13  ;;  %v375_v57 = vor.u32 1.1754944e-38, %v374_v53 }
 0x164   :  { %v365_v41 = vsub.f32 1.0, %v364_v0 }
 0x165   :  { %v347_v58 = vmul.f32 %v1422_v59, %v346_v55 }
 0x166   :  { %v366_v48 = vmul.f32 %v1424_v42, %v365_v41 }
 0x167   :  { %v1426_v56 = vpop.eup %1425  ;;  %v348_v51 = vadd.f32 %v1422_v59, %v347_v58 }
 0x168   :  { %v367_v62 = vadd.f32 %v1424_v42, %v366_v48  ;;  %v384_v44 = vmul.f32 %v1426_v56, %v382_v45  ;;  %v1428_v38 = vpop.eup %1427  ;;  %vm389_vm4 = vweird.f32 %v1426_v56  ;;  %v394_v48 = vand.u32 2147483648, %v382_v45 }
 0x169   :  { %v352_v0 = vsel %vm351_vm0, %v1422_v59, %v348_v51  ;;  %v392_v51 = vand.u32 2147483647, %v382_v45  ;;  %vm390_vm6 = vmor %vm388_vm5, %vm389_vm4 }
 0x16a   :  { %v357_v40 = vsel %vm354_vm2, %v356_v46, %v352_v0  ;;  %v371_v55 = vsel %vm370_vm1, %v1424_v42, %v367_v62  ;;  %v385_v37 = vsub.f32 1.0, %v384_v44  ;;  %v395_v59 = vor.u32 1.1754944e-38, %v394_v48 }
 0x16b   :  { %v376_v41 = vsel %vm373_vm3, %v375_v57, %v371_v55  ;;  %v399_v36 = vmul.f32 %v1428_v38, %v357_v40  ;;  %vm393_vm7 = vcmp.eq.f32.partialorder %v392_v51, 8.507059e+37  ;;  %v1349_v40 = vld [vmem:[%s2555_s0 + $0x50] sm:$0xff] }
 0x16c   :  { %v398_v34 = vmul.f32 %v376_v41, %v1971_v63  ;;  %v386_v58 = vmul.f32 %v1426_v56, %v385_v37 }
 0x16e   :  { %v2054_v50 = vadd.f32 %v399_v36, %v398_v34  ;;  %v387_v52 = vadd.f32 %v1426_v56, %v386_v58 }
 0x170   :  { %1429 = vtanh.f32 %v2054_v50  ;;  %v391_v61 = vsel %vm390_vm6, %v1426_v56, %v387_v52 }
 0x171   :  { %v396_v42 = vsel %vm393_vm7, %v395_v59, %v391_v61 }
 0x176   :  { %v1430_v49 = vpop.eup %1429 }
 0x177   :  { %v402_v54 = vmul.f32 %v1430_v49, %v396_v42 }
 0x179   :  { %1346 = vst [vmem:[%s2557_s2 + $0x8] sm:$0xff] %v402_v54  ;;  %426 = vmatmul.f32.vlgmr.msra.gmra.mxu0 %v402_v54  ;;  %446 = vmatmul.f32.vlgmr.msra.gmra.mxu1 %v402_v54 }
 0x17a   :  { %466 = vmatmul.f32.vlgmr.msra.gmra.mxu2 %v402_v54  ;;  %486 = vmatmul.f32.vlgmr.msra.gmra.mxu3 %v402_v54 }
 0x17b   :  { %718 = vmatpush.msra.mxu0 %v2691_v60  ;;  %738 = vmatpush.msra.mxu1 %v1641_v1  ;;  %v2718_v1 = vld [vmem:[#allocation21_spill] sm:$0xff] }
 0x17c   :  { %758 = vmatpush.msra.mxu2 %v1685_v17  ;;  %778 = vmatpush.msra.mxu3 %v1643_v2  ;;  %v2719_v2 = vld [vmem:[#allocation8_spill] sm:$0xff]  ;;  %v2734_v17 = vld [vmem:[#allocation31_spill] sm:$0xff] }
 0x17d   :  { %719 = vmatpush.msra.mxu0 %v1647_v3  ;;  %739 = vmatpush.msra.mxu1 %v1649_v4  ;;  %v2720_v3 = vld [vmem:[#allocation9_spill] sm:$0xff]  ;;  %v2721_v4 = vld [vmem:[#allocation10_spill] sm:$0xff] }
 0x17e   :  { %759 = vmatpush.msra.mxu2 %v1691_v19  ;;  %779 = vmatpush.msra.mxu3 %v1651_v5  ;;  %v2722_v5 = vld [vmem:[#allocation25_spill] sm:$0xff]  ;;  %v2736_v19 = vld [vmem:[#allocation22_spill] sm:$0xff] }
 0x17f   :  { %720 = vmatpush.msra.mxu0 %v1654_v6  ;;  %740 = vmatpush.msra.mxu1 %v1656_v7  ;;  %v2723_v6 = vld [vmem:[#allocation11_spill] sm:$0xff]  ;;  %v2724_v7 = vld [vmem:[#allocation12_spill] sm:$0xff] }
 0x180   :  { %760 = vmatpush.msra.mxu2 %v1703_v23  ;;  %780 = vmatpush.msra.mxu3 %v1660_v8  ;;  %v2725_v8 = vld [vmem:[#allocation13_spill] sm:$0xff]  ;;  %v2740_v23 = vld [vmem:[#allocation26_spill] sm:$0xff] }
 0x181   :  { %721 = vmatpush.msra.mxu0 %v1663_v9  ;;  %741 = vmatpush.msra.mxu1 %v1665_v10  ;;  %v2726_v9 = vld [vmem:[#allocation29_spill] sm:$0xff]  ;;  %v2727_v10 = vld [vmem:[#allocation14_spill] sm:$0xff] }
 0x182   :  { %761 = vmatpush.msra.mxu2 %v1715_v27  ;;  %781 = vmatpush.msra.mxu3 %v1669_v11  ;;  %v2728_v11 = vld [vmem:[#allocation15_spill] sm:$0xff] }
 0x183   :  { %722 = vmatpush.msra.mxu0 %v1672_v12  ;;  %742 = vmatpush.msra.mxu1 %v1674_v13  ;;  %v2729_v12 = vld [vmem:[#allocation16_spill] sm:$0xff]  ;;  %v2730_v13 = vld [vmem:[#allocation30_spill] sm:$0xff]  ;;  %v1347_v27 = vld [vmem:[%s2555_s0 + $0x40] sm:$0xff] }
 0x184   :  { %762 = vmatpush.msra.mxu2 %v1727_v31  ;;  %782 = vmatpush.msra.mxu3 %v1678_v14  ;;  %v2731_v14 = vld [vmem:[#allocation17_spill] sm:$0xff] }
 0x185   :  { %723 = vmatpush.msra.mxu0 %v1681_v15  ;;  %743 = vmatpush.msra.mxu1 %v1683_v16  ;;  %v2732_v15 = vld [vmem:[#allocation18_spill] sm:$0xff]  ;;  %v2733_v16 = vld [vmem:[#allocation19_spill] sm:$0xff] }
 0x186   :  { %763 = vmatpush.msra.mxu2 %v1739_v35  ;;  %783 = vmatpush.msra.mxu3 %v1689_v18  ;;  %v2735_v18 = vld [vmem:[#allocation20_spill] sm:$0xff] }
 0x187   :  { %724 = vmatpush.msra.mxu0 %v1694_v20  ;;  %744 = vmatpush.msra.mxu1 %v1696_v21  ;;  %v2737_v20 = vld [vmem:[#allocation23_spill] sm:$0xff]  ;;  %v2738_v21 = vld [vmem:[#allocation32_spill] sm:$0xff] }
 0x188   :  { %764 = vmatpush.msra.mxu2 %v1751_v39  ;;  %784 = vmatpush.msra.mxu3 %v1701_v22  ;;  %v2739_v22 = vld [vmem:[#allocation24_spill] sm:$0xff]  ;;  %v1350_v39 = vld [vmem:[%s2555_s0 + $0x58] sm:$0xff] }
 0x189   :  { %725 = vmatpush.msra.mxu0 %v1706_v24  ;;  %745 = vmatpush.msra.mxu1 %v1708_v25  ;;  %v2741_v24 = vld [vmem:[#allocation27_spill] sm:$0xff]  ;;  %v2742_v25 = vld [vmem:[#allocation33_spill] sm:$0xff] }
 0x18a   :  { %765 = vmatpush.msra.mxu2 %v1763_v43  ;;  %785 = vmatpush.msra.mxu3 %v1713_v26  ;;  %v2743_v26 = vld [vmem:[#allocation28_spill] sm:$0xff] }
 0x18b   :  { %726 = vmatpush.msra.mxu0 %v1718_v28  ;;  %746 = vmatpush.msra.mxu1 %v1720_v29  ;;  %v1348_v28 = vld [vmem:[%s2555_s0 + $0x48] sm:$0xff] }
 0x18c   :  { %766 = vmatpush.msra.mxu2 %v1775_v47  ;;  %786 = vmatpush.msra.mxu3 %v1725_v30 }
 0x18d   :  { %727 = vmatpush.msra.mxu0 %v1730_v32  ;;  %747 = vmatpush.msra.mxu1 %v1732_v33 }
 0x18e   :  { %767 = vmatpush.msra.mxu2 %v2718_v1  ;;  %787 = vmatpush.msra.mxu3 %v2719_v2 }
 0x18f   :  { %728 = vmatpush.msra.mxu0 %v2720_v3  ;;  %748 = vmatpush.msra.mxu1 %v2721_v4 }
 0x190   :  { %768 = vmatpush.msra.mxu2 %v2722_v5  ;;  %788 = vmatpush.msra.mxu3 %v2723_v6 }
 0x191   :  { %729 = vmatpush.msra.mxu0 %v2724_v7  ;;  %749 = vmatpush.msra.mxu1 %v2725_v8 }
 0x192   :  { %769 = vmatpush.msra.mxu2 %v2726_v9  ;;  %789 = vmatpush.msra.mxu3 %v2727_v10 }
 0x193   :  { %730 = vmatpush.msra.mxu0 %v2728_v11  ;;  %750 = vmatpush.msra.mxu1 %v2729_v12 }
 0x194   :  { %770 = vmatpush.msra.mxu2 %v2730_v13  ;;  %790 = vmatpush.msra.mxu3 %v2731_v14 }
 0x195   :  { %731 = vmatpush.msra.mxu0 %v2732_v15  ;;  %751 = vmatpush.msra.mxu1 %v2733_v16 }
 0x196   :  { %771 = vmatpush.msra.mxu2 %v2734_v17  ;;  %791 = vmatpush.msra.mxu3 %v2735_v18 }
 0x197   :  { %732 = vmatpush.msra.mxu0 %v2736_v19  ;;  %752 = vmatpush.msra.mxu1 %v2737_v20 }
 0x198   :  { %772 = vmatpush.msra.mxu2 %v2738_v21  ;;  %792 = vmatpush.msra.mxu3 %v2739_v22  ;;  %v2146_v21 = vld [vmem:[#allocation4 + $0x1e8] sm:$0xff]  ;;  %v2149_v22 = vld [vmem:[#allocation4 + $0x1f0] sm:$0xff] }
 0x199   :  { %733 = vmatpush.msra.mxu0 %v2740_v23  ;;  %753 = vmatpush.msra.mxu1 %v2741_v24  ;;  %v2152_v23 = vld [vmem:[#allocation4 + $0x1f8] sm:$0xff]  ;;  %v2155_v24 = vld [vmem:[#allocation4 + $0x1c0] sm:$0xff] }
 0x19a   :  { %773 = vmatpush.msra.mxu2 %v2742_v25  ;;  %793 = vmatpush.msra.mxu3 %v2743_v26  ;;  %v2158_v25 = vld [vmem:[#allocation4 + $0x1c8] sm:$0xff]  ;;  %v2161_v26 = vld [vmem:[#allocation4 + $0x1d0] sm:$0xff] }
 0x1f6   :  { %v427_v29 = vpop.f32.mrf.mxu0  ;;  %v447_v30 = vpop.f32.mrf.mxu1 }
 0x1f7   :  { %v490_v31 = vadd.f32 %v1347_v27, %v427_v29  ;;  %v491_v32 = vadd.f32 %v1348_v28, %v447_v30  ;;  %v2164_v27 = vld [vmem:[#allocation4 + $0x1d8] sm:$0xff]  ;;  %v2167_v28 = vld [vmem:[#allocation4 + $0x1a0] sm:$0xff]  ;;  %v2170_v29 = vld [vmem:[#allocation4 + $0x1a8] sm:$0xff] }
 0x1f8   :  { %v2173_v30 = vld [vmem:[#allocation4 + $0x1b0] sm:$0xff] }
 0x1f9   :  { %v1351_v33 = vmul.f32 -1.442695, %v490_v31  ;;  %v1352_v35 = vmul.f32 -1.442695, %v491_v32  ;;  %v2176_v31 = vld [vmem:[#allocation4 + $0x1b8] sm:$0xff]  ;;  %v2179_v32 = vld [vmem:[#allocation4 + $0x180] sm:$0xff] }
 0x1fb   :  { %1431 = vpow2.f32 %v1351_v33  ;;  %v2182_v33 = vld [vmem:[#allocation4 + $0x188] sm:$0xff] }
 0x1fc   :  { %1433 = vpow2.f32 %v1352_v35  ;;  %v2185_v35 = vld [vmem:[#allocation4 + $0x190] sm:$0xff] }
 0x1fd   :  { %v487_v43 = vpop.f32.mrf.mxu3  ;;  %v467_v56 = vpop.f32.mrf.mxu2 }
 0x1fe   :  { %v493_v47 = vadd.f32 %v1350_v39, %v487_v43  ;;  %v492_v62 = vadd.f32 %v1349_v40, %v467_v56  ;;  %v2188_v39 = vld [vmem:[#allocation4 + $0x198] sm:$0xff]  ;;  %v2191_v43 = vld [vmem:[#allocation4 + $0x160] sm:$0xff] }
 0x1ff   :  { %v2212_v40 = vld [vmem:[#allocation4 + $0x158] sm:$0xff]  ;;  %v2215_v56 = vld [vmem:[#allocation4 + $0x120] sm:$0xff] }
 0x200   :  { %v1353_v60 = vmul.f32 -1.442695, %v493_v47  ;;  %v2194_v47 = vld [vmem:[#allocation4 + $0x168] sm:$0xff] }
 0x201   :  { %v1432_v63 = vpop.eup %1431 }
 0x202   :  { %v1434_v34 = vpop.eup %1433  ;;  %v497_v36 = vadd.f32 1.0, %v1432_v63  ;;  %1435 = vpow2.f32 %v1353_v60  ;;  %v2197_v60 = vld [vmem:[#allocation4 + $0x170] sm:$0xff]  ;;  %v2200_v63 = vld [vmem:[#allocation4 + $0x178] sm:$0xff] }
 0x203   :  { %v516_v37 = vadd.f32 1.0, %v1434_v34  ;;  %v2203_v34 = vld [vmem:[#allocation4 + $0x140] sm:$0xff] }
 0x204   :  { %1437 = vrcp.f32 %v497_v36  ;;  %v509_v41 = vand.u32 2147483648, %v497_v36  ;;  %v507_v48 = vand.u32 2147483647, %v497_v36  ;;  %vm503_vm10 = vweird.f32 %v497_v36 }
 0x205   :  { %1439 = vrcp.f32 %v516_v37  ;;  %v528_v58 = vand.u32 2147483648, %v516_v37  ;;  %v526_v61 = vand.u32 2147483647, %v516_v37  ;;  %vm522_vm11 = vweird.f32 %v516_v37 }
 0x206   :  { %v510_v42 = vor.u32 1.1754944e-38, %v509_v41  ;;  %vm508_vm14 = vcmp.eq.f32.partialorder %v507_v48, 8.507059e+37  ;;  %v2245_v41 = vld [vmem:[#allocation4 + $0xf0] sm:$0xff]  ;;  %v2254_v48 = vld [vmem:[#allocation4 + $0xc8] sm:$0xff] }
 0x207   :  { %v529_v2 = vor.u32 1.1754944e-38, %v528_v58  ;;  %vm527_vm15 = vcmp.eq.f32.partialorder %v526_v61, 8.507059e+37  ;;  %v2248_v58 = vld [vmem:[#allocation4 + $0xf8] sm:$0xff] }
 0x208   :  { %v1436_v45 = vpop.eup %1435  ;;  %v2260_v61 = vld [vmem:[#allocation4 + $0xd8] sm:$0xff] }
 0x209   :  { %v536_v53 = vadd.f32 1.0, %v1436_v45  ;;  %v2218_v45 = vld [vmem:[#allocation4 + $0x128] sm:$0xff]  ;;  %2745 = vst [vmem:[#allocation21_spill] sm:$0xff] %v2260_v61 }
 0x20a   :  { %v1438_v46 = vpop.eup %1437 }
 0x20b   :  { %v1440_v44 = vpop.eup %1439  ;;  %v499_v57 = vmul.f32 %v1438_v46, %v497_v36  ;;  %1441 = vrcp.f32 %v536_v53  ;;  %vm504_vm8 = vweird.f32 %v1438_v46  ;;  %v548_v14 = vand.u32 2147483648, %v536_v53  ;;  %v2206_v36 = vld [vmem:[#allocation4 + $0x148] sm:$0xff] }
 0x20c   :  { %v518_v0 = vmul.f32 %v1440_v44, %v516_v37  ;;  %1443 = vtanh.f32 %v492_v62  ;;  %vm523_vm9 = vweird.f32 %v1440_v44  ;;  %vm505_vm12 = vmor %vm503_vm10, %vm504_vm8  ;;  %vm542_vm1 = vweird.f32 %v536_v53  ;;  %v2209_v37 = vld [vmem:[#allocation4 + $0x150] sm:$0xff]  ;;  %v2227_v62 = vld [vmem:[#allocation4 + $0x100] sm:$0xff] }
 0x20d   :  { %v500_v38 = vsub.f32 1.0, %v499_v57  ;;  %vm524_vm13 = vmor %vm522_vm11, %vm523_vm9  ;;  %v546_v15 = vand.u32 2147483647, %v536_v53  ;;  %v549_v17 = vor.u32 1.1754944e-38, %v548_v14  ;;  %v2233_v57 = vld [vmem:[#allocation4 + $0x110] sm:$0xff]  ;;  %v2311_v14 = vld [vmem:[#allocation4 + $0x20] sm:$0xff] }
 0x20e   :  { %v519_v55 = vsub.f32 1.0, %v518_v0  ;;  %v2236_v0 = vld [vmem:[#allocation4 + $0x118] sm:$0xff]  ;;  %2762 = vst [vmem:[#allocation20_spill] sm:$0xff] %v2311_v14 }
 0x20f   :  { %v501_v52 = vmul.f32 %v1438_v46, %v500_v38  ;;  %vm547_vm3 = vcmp.eq.f32.partialorder %v546_v15, 8.507059e+37  ;;  %v2239_v38 = vld [vmem:[#allocation4 + $0xe0] sm:$0xff]  ;;  %v2314_v15 = vld [vmem:[#allocation4 + $0x28] sm:$0xff] }
 0x210   :  { %v520_v51 = vmul.f32 %v1440_v44, %v519_v55  ;;  %v2242_v55 = vld [vmem:[#allocation4 + $0xe8] sm:$0xff]  ;;  %2763 = vst [vmem:[#allocation22_spill] sm:$0xff] %v2314_v15 }
 0x211   :  { %v1442_v59 = vpop.eup %1441  ;;  %v502_v49 = vadd.f32 %v1438_v46, %v501_v52  ;;  %v2251_v52 = vld [vmem:[#allocation4 + $0xc0] sm:$0xff] }
 0x212   :  { %v521_v54 = vadd.f32 %v1440_v44, %v520_v51  ;;  %v538_v1 = vmul.f32 %v1442_v59, %v536_v53  ;;  %v1444_v4 = vpop.eup %1443  ;;  %vm543_vm0 = vweird.f32 %v1442_v59  ;;  %v2221_v53 = vld [vmem:[#allocation4 + $0x130] sm:$0xff] }
 0x213   :  { %v506_v3 = vsel %vm505_vm12, %v1438_v46, %v502_v49  ;;  %vm544_vm2 = vmor %vm542_vm1, %vm543_vm0  ;;  %v2224_v46 = vld [vmem:[#allocation4 + $0x138] sm:$0xff]  ;;  %v2257_v51 = vld [vmem:[#allocation4 + $0xd0] sm:$0xff] }
 0x214   :  { %v511_v5 = vsel %vm508_vm14, %v510_v42, %v506_v3  ;;  %v525_v6 = vsel %vm524_vm13, %v1440_v44, %v521_v54  ;;  %v539_v7 = vsub.f32 1.0, %v538_v1  ;;  %v2230_v44 = vld [vmem:[#allocation4 + $0x108] sm:$0xff]  ;;  %2744 = vst [vmem:[#allocation7_spill] sm:$0xff] %v2257_v51  ;;  %v2269_v42 = vld [vmem:[#allocation4 + $0xb0] sm:$0xff]  ;;  %v2272_v54 = vld [vmem:[#allocation4 + $0xb8] sm:$0xff] }
 0x215   :  { %v530_v8 = vsel %vm527_vm15, %v529_v2, %v525_v6  ;;  %v553_v9 = vmul.f32 %v1444_v4, %v511_v5  ;;  %v2266_v49 = vld [vmem:[#allocation4 + $0xa8] sm:$0xff]  ;;  %2748 = vst [vmem:[#allocation10_spill] sm:$0xff] %v2269_v42  ;;  %v2275_v1 = vld [vmem:[#allocation4 + $0x80] sm:$0xff]  ;;  %v2281_v3 = vld [vmem:[#allocation4 + $0x90] sm:$0xff] }
 0x216   :  { %v552_v10 = vmul.f32 %v530_v8, %v2054_v50  ;;  %v540_v11 = vmul.f32 %v1442_v59, %v539_v7  ;;  %v2143_v50 = vld [vmem:[#allocation4 + $0x1e0] sm:$0xff]  ;;  %2747 = vst [vmem:[#allocation9_spill] sm:$0xff] %v2266_v49  ;;  %v2278_v2 = vld [vmem:[#allocation4 + $0x88] sm:$0xff]  ;;  %v2284_v4 = vld [vmem:[#allocation4 + $0x98] sm:$0xff] }
 0x217   :  { %2749 = vst [vmem:[#allocation25_spill] sm:$0xff] %v2272_v54  ;;  %v2287_v5 = vld [vmem:[#allocation4 + $0x60] sm:$0xff]  ;;  %v2290_v6 = vld [vmem:[#allocation4 + $0x68] sm:$0xff]  ;;  %v2293_v7 = vld [vmem:[#allocation4 + $0x70] sm:$0xff] }
 0x218   :  { %v2137_v12 = vadd.f32 %v553_v9, %v552_v10  ;;  %v541_v13 = vadd.f32 %v1442_v59, %v540_v11  ;;  %2750 = vst [vmem:[#allocation11_spill] sm:$0xff] %v2275_v1  ;;  %v2296_v8 = vld [vmem:[#allocation4 + $0x78] sm:$0xff]  ;;  %v2299_v9 = vld [vmem:[#allocation4 + $0x40] sm:$0xff]  ;;  %v2302_v10 = vld [vmem:[#allocation4 + $0x48] sm:$0xff] }
 0x219   :  { %2751 = vst [vmem:[#allocation12_spill] sm:$0xff] %v2278_v2  ;;  %v2305_v11 = vld [vmem:[#allocation4 + $0x50] sm:$0xff] }
 0x21a   :  { %1445 = vtanh.f32 %v2137_v12  ;;  %v545_v16 = vsel %vm544_vm2, %v1442_v59, %v541_v13  ;;  %v2263_v59 = vld [vmem:[#allocation4 + $0xa0] sm:$0xff]  ;;  %2752 = vst [vmem:[#allocation13_spill] sm:$0xff] %v2281_v3  ;;  %v2308_v13 = vld [vmem:[#allocation4 + $0x58] sm:$0xff] }
 0x21b   :  { %v550_v19 = vsel %vm547_vm3, %v549_v17, %v545_v16  ;;  %2746 = vst [vmem:[#allocation8_spill] sm:$0xff] %v2263_v59  ;;  %v2317_v16 = vld [vmem:[#allocation4 + $0x30] sm:$0xff]  ;;  %v2320_v17 = vld [vmem:[#allocation4 + $0x38] sm:$0xff] }
 0x21c   :  { %2753 = vst [vmem:[#allocation29_spill] sm:$0xff] %v2284_v4 }
 0x21d   :  { %2754 = vst [vmem:[#allocation14_spill] sm:$0xff] %v2287_v5 }
 0x21e   :  { %2755 = vst [vmem:[#allocation15_spill] sm:$0xff] %v2290_v6 }
 0x21f   :  { %2756 = vst [vmem:[#allocation16_spill] sm:$0xff] %v2293_v7 }
 0x220   :  { %v1446_v18 = vpop.eup %1445  ;;  %2757 = vst [vmem:[#allocation30_spill] sm:$0xff] %v2296_v8 }
 0x221   :  { %v556_v20 = vmul.f32 %v1446_v18, %v550_v19  ;;  %2758 = vst [vmem:[#allocation17_spill] sm:$0xff] %v2299_v9  ;;  %v2323_v18 = vld [vmem:[#allocation4] sm:$0xff]  ;;  %v2326_v19 = vld [vmem:[#allocation4 + $0x8] sm:$0xff] }
 0x222   :  { %2759 = vst [vmem:[#allocation18_spill] sm:$0xff] %v2302_v10 }
 0x223   :  { %1354 = vst [vmem:[%s2557_s2 + $0x10] sm:$0xff] %v556_v20  ;;  %580 = vmatmul.f32.vlgmr.msrb.gmra.mxu0 %v556_v20  ;;  %600 = vmatmul.f32.vlgmr.msrb.gmra.mxu1 %v556_v20 }
 0x224   :  { %620 = vmatmul.f32.vlgmr.msrb.gmra.mxu2 %v556_v20  ;;  %640 = vmatmul.f32.vlgmr.msrb.gmra.mxu3 %v556_v20  ;;  %2760 = vst [vmem:[#allocation19_spill] sm:$0xff] %v2305_v11  ;;  %v2329_v20 = vld [vmem:[#allocation4 + $0x10] sm:$0xff] }
 0x225   :  { %872 = vmatpush.msrb.mxu0 %v2143_v50  ;;  %892 = vmatpush.msrb.mxu1 %v2146_v21  ;;  %2761 = vst [vmem:[#allocation31_spill] sm:$0xff] %v2308_v13 }
 0x226   :  { %912 = vmatpush.msrb.mxu2 %v2149_v22  ;;  %932 = vmatpush.msrb.mxu3 %v2152_v23  ;;  %2764 = vst [vmem:[#allocation23_spill] sm:$0xff] %v2317_v16 }
 0x227   :  { %873 = vmatpush.msrb.mxu0 %v2155_v24  ;;  %893 = vmatpush.msrb.mxu1 %v2158_v25  ;;  %2765 = vst [vmem:[#allocation32_spill] sm:$0xff] %v2320_v17 }
 0x228   :  { %913 = vmatpush.msrb.mxu2 %v2161_v26  ;;  %933 = vmatpush.msrb.mxu3 %v2164_v27  ;;  %2766 = vst [vmem:[#allocation24_spill] sm:$0xff] %v2323_v18 }
 0x229   :  { %874 = vmatpush.msrb.mxu0 %v2167_v28  ;;  %894 = vmatpush.msrb.mxu1 %v2170_v29  ;;  %2767 = vst [vmem:[#allocation26_spill] sm:$0xff] %v2326_v19 }
 0x22a   :  { %914 = vmatpush.msrb.mxu2 %v2173_v30  ;;  %934 = vmatpush.msrb.mxu3 %v2176_v31  ;;  %2768 = vst [vmem:[#allocation27_spill] sm:$0xff] %v2329_v20 }
 0x22b   :  { %875 = vmatpush.msrb.mxu0 %v2179_v32  ;;  %895 = vmatpush.msrb.mxu1 %v2182_v33 }
 0x22c   :  { %915 = vmatpush.msrb.mxu2 %v2185_v35  ;;  %935 = vmatpush.msrb.mxu3 %v2188_v39 }
 0x22d   :  { %876 = vmatpush.msrb.mxu0 %v2191_v43  ;;  %896 = vmatpush.msrb.mxu1 %v2194_v47 }
 0x22e   :  { %916 = vmatpush.msrb.mxu2 %v2197_v60  ;;  %936 = vmatpush.msrb.mxu3 %v2200_v63 }
 0x22f   :  { %877 = vmatpush.msrb.mxu0 %v2203_v34  ;;  %897 = vmatpush.msrb.mxu1 %v2206_v36 }
 0x230   :  { %917 = vmatpush.msrb.mxu2 %v2209_v37  ;;  %937 = vmatpush.msrb.mxu3 %v2212_v40 }
 0x231   :  { %878 = vmatpush.msrb.mxu0 %v2215_v56  ;;  %898 = vmatpush.msrb.mxu1 %v2218_v45 }
 0x232   :  { %918 = vmatpush.msrb.mxu2 %v2221_v53  ;;  %938 = vmatpush.msrb.mxu3 %v2224_v46 }
 0x233   :  { %879 = vmatpush.msrb.mxu0 %v2227_v62  ;;  %899 = vmatpush.msrb.mxu1 %v2230_v44 }
 0x234   :  { %919 = vmatpush.msrb.mxu2 %v2233_v57  ;;  %939 = vmatpush.msrb.mxu3 %v2236_v0 }
 0x235   :  { %880 = vmatpush.msrb.mxu0 %v2239_v38  ;;  %900 = vmatpush.msrb.mxu1 %v2242_v55 }
 0x236   :  { %920 = vmatpush.msrb.mxu2 %v2245_v41  ;;  %940 = vmatpush.msrb.mxu3 %v2248_v58 }
 0x237   :  { %881 = vmatpush.msrb.mxu0 %v2251_v52  ;;  %901 = vmatpush.msrb.mxu1 %v2254_v48 }
 0x238   :  { %921 = vmatpush.msrb.mxu2 %v2257_v51  ;;  %941 = vmatpush.msrb.mxu3 %v2260_v61 }
 0x239   :  { %882 = vmatpush.msrb.mxu0 %v2263_v59  ;;  %902 = vmatpush.msrb.mxu1 %v2266_v49 }
 0x23a   :  { %922 = vmatpush.msrb.mxu2 %v2269_v42  ;;  %942 = vmatpush.msrb.mxu3 %v2272_v54 }
 0x23b   :  { %883 = vmatpush.msrb.mxu0 %v2275_v1  ;;  %903 = vmatpush.msrb.mxu1 %v2278_v2 }
 0x23c   :  { %923 = vmatpush.msrb.mxu2 %v2281_v3  ;;  %943 = vmatpush.msrb.mxu3 %v2284_v4 }
 0x23d   :  { %884 = vmatpush.msrb.mxu0 %v2287_v5  ;;  %904 = vmatpush.msrb.mxu1 %v2290_v6 }
 0x23e   :  { %924 = vmatpush.msrb.mxu2 %v2293_v7  ;;  %944 = vmatpush.msrb.mxu3 %v2296_v8 }
 0x23f   :  { %885 = vmatpush.msrb.mxu0 %v2299_v9  ;;  %905 = vmatpush.msrb.mxu1 %v2302_v10 }
 0x240   :  { %925 = vmatpush.msrb.mxu2 %v2305_v11  ;;  %945 = vmatpush.msrb.mxu3 %v2308_v13 }
 0x241   :  { %886 = vmatpush.msrb.mxu0 %v2311_v14  ;;  %906 = vmatpush.msrb.mxu1 %v2314_v15  ;;  %v2332_v15 = vld [vmem:[#allocation4 + $0x18] sm:$0xff] }
 0x242   :  { %926 = vmatpush.msrb.mxu2 %v2317_v16  ;;  %946 = vmatpush.msrb.mxu3 %v2320_v17  ;;  %2769 = vst [vmem:[#allocation33_spill] sm:$0xff] %v2332_v15  ;;  %v1355_v17 = vld [vmem:[%s2555_s0 + $0x60] sm:$0xff] }
 0x243   :  { %887 = vmatpush.msrb.mxu0 %v2323_v18  ;;  %907 = vmatpush.msrb.mxu1 %v2326_v19  ;;  %v1356_v18 = vld [vmem:[%s2555_s0 + $0x68] sm:$0xff] }
 0x244   :  { %927 = vmatpush.msrb.mxu2 %v2329_v20  ;;  %947 = vmatpush.msrb.mxu3 %v2332_v15  ;;  %v1358_v20 = vld [vmem:[%s2555_s0 + $0x78] sm:$0xff] }
 0x2a0   :  { %v581_v16 = vpop.f32.mrf.mxu0  ;;  %v601_v14 = vpop.f32.mrf.mxu1 }
 0x2a1   :  { %v644_v13 = vadd.f32 %v1355_v17, %v581_v16  ;;  %v645_v19 = vadd.f32 %v1356_v18, %v601_v14 }
 0x2a3   :  { %v1359_v11 = vmul.f32 -1.442695, %v644_v13  ;;  %v1360_v10 = vmul.f32 -1.442695, %v645_v19  ;;  %v1357_v13 = vld [vmem:[%s2555_s0 + $0x70] sm:$0xff] }
 0x2a5   :  { %1447 = vpow2.f32 %v1359_v11 }
 0x2a6   :  { %1449 = vpow2.f32 %v1360_v10 }
 0x2a7   :  { %v641_v15 = vpop.f32.mrf.mxu3  ;;  %v621_v11 = vpop.f32.mrf.mxu2 }
 0x2a8   :  { %v647_v9 = vadd.f32 %v1358_v20, %v641_v15  ;;  %v646_v18 = vadd.f32 %v1357_v13, %v621_v11 }
 0x2aa   :  { %v1361_v8 = vmul.f32 -1.442695, %v647_v9 }
 0x2ab   :  { %v1448_v7 = vpop.eup %1447 }
 0x2ac   :  { %v1450_v6 = vpop.eup %1449  ;;  %v651_v5 = vadd.f32 1.0, %v1448_v7  ;;  %1451 = vpow2.f32 %v1361_v8 }
 0x2ad   :  { %v670_v4 = vadd.f32 1.0, %v1450_v6 }
 0x2ae   :  { %1453 = vrcp.f32 %v651_v5  ;;  %v663_v7 = vand.u32 2147483648, %v651_v5  ;;  %v661_v3 = vand.u32 2147483647, %v651_v5  ;;  %vm657_vm6 = vweird.f32 %v651_v5 }
 0x2af   :  { %1455 = vrcp.f32 %v670_v4  ;;  %v682_v6 = vand.u32 2147483648, %v670_v4  ;;  %v680_v1 = vand.u32 2147483647, %v670_v4  ;;  %vm676_vm7 = vweird.f32 %v670_v4 }
 0x2b0   :  { %v664_v13 = vor.u32 1.1754944e-38, %v663_v7  ;;  %vm662_vm10 = vcmp.eq.f32.partialorder %v661_v3, 8.507059e+37 }
 0x2b1   :  { %vm681_vm11 = vcmp.eq.f32.partialorder %v680_v1, 8.507059e+37 }
 0x2b2   :  { %v1452_v14 = vpop.eup %1451 }
 0x2b3   :  { %v690_v16 = vadd.f32 1.0, %v1452_v14 }
 0x2b4   :  { %v1454_v17 = vpop.eup %1453 }
 0x2b5   :  { %v1456_v10 = vpop.eup %1455  ;;  %v653_v19 = vmul.f32 %v1454_v17, %v651_v5  ;;  %1457 = vrcp.f32 %v690_v16  ;;  %vm658_vm4 = vweird.f32 %v1454_v17  ;;  %vm696_vm13 = vweird.f32 %v690_v16 }
 0x2b6   :  { %v672_v9 = vmul.f32 %v1456_v10, %v670_v4  ;;  %1459 = vtanh.f32 %v646_v18  ;;  %vm677_vm5 = vweird.f32 %v1456_v10  ;;  %vm659_vm8 = vmor %vm657_vm6, %vm658_vm4 }
 0x2b7   :  { %v654_v15 = vsub.f32 1.0, %v653_v19  ;;  %vm678_vm9 = vmor %vm676_vm7, %vm677_vm5  ;;  %v683_v19 = vor.u32 1.1754944e-38, %v682_v6  ;;  %v2777_v6 = vld [vmem:[#allocation12_spill] sm:$0xff] }
 0x2b8   :  { %v673_v20 = vsub.f32 1.0, %v672_v9 }
 0x2b9   :  { %v655_v8 = vmul.f32 %v1454_v17, %v654_v15 }
 0x2ba   :  { %v674_v2 = vmul.f32 %v1456_v10, %v673_v20 }
 0x2bb   :  { %v1458_v54 = vpop.eup %1457  ;;  %v656_v42 = vadd.f32 %v1454_v17, %v655_v8 }
 0x2bc   :  { %v675_v11 = vadd.f32 %v1456_v10, %v674_v2  ;;  %v692_v14 = vmul.f32 %v1458_v54, %v690_v16  ;;  %v1460_v18 = vpop.eup %1459  ;;  %vm697_vm12 = vweird.f32 %v1458_v54  ;;  %v702_v2 = vand.u32 2147483648, %v690_v16 }
 0x2bd   :  { %v660_v9 = vsel %vm659_vm8, %v1454_v17, %v656_v42  ;;  %v700_v42 = vand.u32 2147483647, %v690_v16  ;;  %vm698_vm14 = vmor %vm696_vm13, %vm697_vm12  ;;  %v2776_v16 = vld [vmem:[#allocation11_spill] sm:$0xff] }
 0x2be   :  { %v665_v49 = vsel %vm662_vm10, %v664_v13, %v660_v9  ;;  %v679_v15 = vsel %vm678_vm9, %v1456_v10, %v675_v11  ;;  %v693_v59 = vsub.f32 1.0, %v692_v14  ;;  %v703_v17 = vor.u32 1.1754944e-38, %v702_v2  ;;  %v2778_v13 = vld [vmem:[#allocation13_spill] sm:$0xff]  ;;  %v2780_v14 = vld [vmem:[#allocation14_spill] sm:$0xff]  ;;  %v2782_v9 = vld [vmem:[#allocation16_spill] sm:$0xff] }
 0x2bf   :  { %v684_v20 = vsel %vm681_vm11, %v683_v19, %v679_v15  ;;  %v707_v61 = vmul.f32 %v1460_v18, %v665_v49  ;;  %vm701_vm15 = vcmp.eq.f32.partialorder %v700_v42, 8.507059e+37  ;;  %v2774_v49 = vld [vmem:[#allocation10_spill] sm:$0xff]  ;;  %v2779_v11 = vld [vmem:[#allocation29_spill] sm:$0xff]  ;;  %v2781_v19 = vld [vmem:[#allocation15_spill] sm:$0xff] }
 0x2c0   :  { %v706_v51 = vmul.f32 %v684_v20, %v2137_v12  ;;  %v694_v8 = vmul.f32 %v1458_v54, %v693_v59  ;;  %v2770_v12 = vld [vmem:[#allocation7_spill] sm:$0xff]  ;;  %v2773_v59 = vld [vmem:[#allocation9_spill] sm:$0xff]  ;;  %v2783_v18 = vld [vmem:[#allocation30_spill] sm:$0xff] }
 0x2c1   :  { %v2784_v15 = vld [vmem:[#allocation17_spill] sm:$0xff]  ;;  %v2785_v20 = vld [vmem:[#allocation18_spill] sm:$0xff]  ;;  %v2788_v2 = vld [vmem:[#allocation20_spill] sm:$0xff] }
 0x2c2   :  { %v2348_v5 = vadd.f32 %v707_v61, %v706_v51  ;;  %v695_v4 = vadd.f32 %v1458_v54, %v694_v8  ;;  %v2771_v51 = vld [vmem:[#allocation21_spill] sm:$0xff]  ;;  %v2772_v61 = vld [vmem:[#allocation8_spill] sm:$0xff]  ;;  %v2786_v8 = vld [vmem:[#allocation19_spill] sm:$0xff] }
 0x2c3   :  { %v2789_v42 = vld [vmem:[#allocation22_spill] sm:$0xff] }
 0x2c4   :  { %1461 = vtanh.f32 %v2348_v5  ;;  %v699_v3 = vsel %vm698_vm14, %v1458_v54, %v695_v4  ;;  %v2775_v54 = vld [vmem:[#allocation25_spill] sm:$0xff]  ;;  %v2787_v4 = vld [vmem:[#allocation31_spill] sm:$0xff] }
 0x2c5   :  { %v704_v10 = vsel %vm701_vm15, %v703_v17, %v699_v3  ;;  %v2790_v3 = vld [vmem:[#allocation23_spill] sm:$0xff]  ;;  %v2791_v17 = vld [vmem:[#allocation32_spill] sm:$0xff] }
 0x2ca   :  { %v1462_v1 = vpop.eup %1461 }
 0x2cb   :  { %v710_v7 = vmul.f32 %v1462_v1, %v704_v10  ;;  %v2792_v1 = vld [vmem:[#allocation24_spill] sm:$0xff]  ;;  %v2793_v10 = vld [vmem:[#allocation26_spill] sm:$0xff] }
 0x2cd   :  { %1362 = vst [vmem:[%s2557_s2 + $0x18] sm:$0xff] %v710_v7  ;;  %734 = vmatmul.f32.vlgmr.msra.gmra.mxu0 %v710_v7  ;;  %754 = vmatmul.f32.vlgmr.msra.gmra.mxu1 %v710_v7 }
 0x2ce   :  { %774 = vmatmul.f32.vlgmr.msra.gmra.mxu2 %v710_v7  ;;  %794 = vmatmul.f32.vlgmr.msra.gmra.mxu3 %v710_v7  ;;  %v2794_v7 = vld [vmem:[#allocation27_spill] sm:$0xff] }
 0x2cf   :  { %1026 = vmatpush.msra.mxu0 %v2143_v50  ;;  %1046 = vmatpush.msra.mxu1 %v2146_v21 }
 0x2d0   :  { %1066 = vmatpush.msra.mxu2 %v2149_v22  ;;  %1086 = vmatpush.msra.mxu3 %v2152_v23 }
 0x2d1   :  { %1027 = vmatpush.msra.mxu0 %v2155_v24  ;;  %1047 = vmatpush.msra.mxu1 %v2158_v25 }
 0x2d2   :  { %1067 = vmatpush.msra.mxu2 %v2161_v26  ;;  %1087 = vmatpush.msra.mxu3 %v2164_v27 }
 0x2d3   :  { %1028 = vmatpush.msra.mxu0 %v2167_v28  ;;  %1048 = vmatpush.msra.mxu1 %v2170_v29 }
 0x2d4   :  { %1068 = vmatpush.msra.mxu2 %v2173_v30  ;;  %1088 = vmatpush.msra.mxu3 %v2176_v31 }
 0x2d5   :  { %1029 = vmatpush.msra.mxu0 %v2179_v32  ;;  %1049 = vmatpush.msra.mxu1 %v2182_v33 }
 0x2d6   :  { %1069 = vmatpush.msra.mxu2 %v2185_v35  ;;  %1089 = vmatpush.msra.mxu3 %v2188_v39 }
 0x2d7   :  { %1030 = vmatpush.msra.mxu0 %v2191_v43  ;;  %1050 = vmatpush.msra.mxu1 %v2194_v47 }
 0x2d8   :  { %1070 = vmatpush.msra.mxu2 %v2197_v60  ;;  %1090 = vmatpush.msra.mxu3 %v2200_v63 }
 0x2d9   :  { %1031 = vmatpush.msra.mxu0 %v2203_v34  ;;  %1051 = vmatpush.msra.mxu1 %v2206_v36 }
 0x2da   :  { %1071 = vmatpush.msra.mxu2 %v2209_v37  ;;  %1091 = vmatpush.msra.mxu3 %v2212_v40 }
 0x2db   :  { %1032 = vmatpush.msra.mxu0 %v2215_v56  ;;  %1052 = vmatpush.msra.mxu1 %v2218_v45 }
 0x2dc   :  { %1072 = vmatpush.msra.mxu2 %v2221_v53  ;;  %1092 = vmatpush.msra.mxu3 %v2224_v46 }
 0x2dd   :  { %1033 = vmatpush.msra.mxu0 %v2227_v62  ;;  %1053 = vmatpush.msra.mxu1 %v2230_v44 }
 0x2de   :  { %1073 = vmatpush.msra.mxu2 %v2233_v57  ;;  %1093 = vmatpush.msra.mxu3 %v2236_v0 }
 0x2df   :  { %1034 = vmatpush.msra.mxu0 %v2239_v38  ;;  %1054 = vmatpush.msra.mxu1 %v2242_v55 }
 0x2e0   :  { %1074 = vmatpush.msra.mxu2 %v2245_v41  ;;  %1094 = vmatpush.msra.mxu3 %v2248_v58 }
 0x2e1   :  { %1035 = vmatpush.msra.mxu0 %v2251_v52  ;;  %1055 = vmatpush.msra.mxu1 %v2254_v48 }
 0x2e2   :  { %1075 = vmatpush.msra.mxu2 %v2770_v12  ;;  %1095 = vmatpush.msra.mxu3 %v2771_v51 }
 0x2e3   :  { %1036 = vmatpush.msra.mxu0 %v2772_v61  ;;  %1056 = vmatpush.msra.mxu1 %v2773_v59 }
 0x2e4   :  { %1076 = vmatpush.msra.mxu2 %v2774_v49  ;;  %1096 = vmatpush.msra.mxu3 %v2775_v54 }
 0x2e5   :  { %1037 = vmatpush.msra.mxu0 %v2776_v16  ;;  %1057 = vmatpush.msra.mxu1 %v2777_v6 }
 0x2e6   :  { %1077 = vmatpush.msra.mxu2 %v2778_v13  ;;  %1097 = vmatpush.msra.mxu3 %v2779_v11 }
 0x2e7   :  { %1038 = vmatpush.msra.mxu0 %v2780_v14  ;;  %1058 = vmatpush.msra.mxu1 %v2781_v19 }
 0x2e8   :  { %1078 = vmatpush.msra.mxu2 %v2782_v9  ;;  %1098 = vmatpush.msra.mxu3 %v2783_v18 }
 0x2e9   :  { %1039 = vmatpush.msra.mxu0 %v2784_v15  ;;  %1059 = vmatpush.msra.mxu1 %v2785_v20  ;;  %v2795_v15 = vld [vmem:[#allocation33_spill] sm:$0xff] }
 0x2ea   :  { %1079 = vmatpush.msra.mxu2 %v2786_v8  ;;  %1099 = vmatpush.msra.mxu3 %v2787_v4  ;;  %v1363_v4 = vld [vmem:[%s2555_s0 + $0x80] sm:$0xff] }
 0x2eb   :  { %1040 = vmatpush.msra.mxu0 %v2788_v2  ;;  %1060 = vmatpush.msra.mxu1 %v2789_v42  ;;  %v1364_v42 = vld [vmem:[%s2555_s0 + $0x88] sm:$0xff] }
 0x2ec   :  { %1080 = vmatpush.msra.mxu2 %v2790_v3  ;;  %1100 = vmatpush.msra.mxu3 %v2791_v17 }
 0x2ed   :  { %1041 = vmatpush.msra.mxu0 %v2792_v1  ;;  %1061 = vmatpush.msra.mxu1 %v2793_v10 }
 0x2ee   :  { %1081 = vmatpush.msra.mxu2 %v2794_v7  ;;  %1101 = vmatpush.msra.mxu3 %v2795_v15  ;;  %v1366_v7 = vld [vmem:[%s2555_s0 + $0x98] sm:$0xff] }
 0x34a   :  { %v735_v2 = vpop.f32.mrf.mxu0  ;;  %v755_v3 = vpop.f32.mrf.mxu1 }
 0x34b   :  { %v798_v8 = vadd.f32 %v1363_v4, %v735_v2  ;;  %v799_v17 = vadd.f32 %v1364_v42, %v755_v3 }
 0x34d   :  { %v1367_v20 = vmul.f32 -1.442695, %v798_v8  ;;  %v1368_v1 = vmul.f32 -1.442695, %v799_v17  ;;  %v1365_v8 = vld [vmem:[%s2555_s0 + $0x90] sm:$0xff] }
 0x34f   :  { %1463 = vpow2.f32 %v1367_v20 }
 0x350   :  { %1465 = vpow2.f32 %v1368_v1 }
 0x351   :  { %v795_v15 = vpop.f32.mrf.mxu3  ;;  %v775_v20 = vpop.f32.mrf.mxu2 }
 0x352   :  { %v801_v10 = vadd.f32 %v1366_v7, %v795_v15  ;;  %v800_v3 = vadd.f32 %v1365_v8, %v775_v20 }
 0x354   :  { %v1369_v18 = vmul.f32 -1.442695, %v801_v10 }
 0x355   :  { %v1464_v9 = vpop.eup %1463 }
 0x356   :  { %v1466_v19 = vpop.eup %1465  ;;  %v805_v14 = vadd.f32 1.0, %v1464_v9  ;;  %1467 = vpow2.f32 %v1369_v18 }
 0x357   :  { %v824_v11 = vadd.f32 1.0, %v1466_v19 }
 0x358   :  { %1469 = vrcp.f32 %v805_v14  ;;  %v817_v9 = vand.u32 2147483648, %v805_v14  ;;  %v815_v13 = vand.u32 2147483647, %v805_v14  ;;  %vm811_vm2 = vweird.f32 %v805_v14 }
 0x359   :  { %1471 = vrcp.f32 %v824_v11  ;;  %v836_v19 = vand.u32 2147483648, %v824_v11  ;;  %v834_v16 = vand.u32 2147483647, %v824_v11  ;;  %vm830_vm3 = vweird.f32 %v824_v11 }
 0x35a   :  { %v818_v8 = vor.u32 1.1754944e-38, %v817_v9  ;;  %vm816_vm6 = vcmp.eq.f32.partialorder %v815_v13, 8.507059e+37 }
 0x35b   :  { %vm835_vm7 = vcmp.eq.f32.partialorder %v834_v16, 8.507059e+37 }
 0x35c   :  { %v1468_v4 = vpop.eup %1467 }
 0x35d   :  { %v844_v2 = vadd.f32 1.0, %v1468_v4 }
 0x35e   :  { %v1470_v42 = vpop.eup %1469 }
 0x35f   :  { %v1472_v17 = vpop.eup %1471  ;;  %v807_v1 = vmul.f32 %v1470_v42, %v805_v14  ;;  %1473 = vrcp.f32 %v844_v2  ;;  %vm812_vm0 = vweird.f32 %v1470_v42  ;;  %vm850_vm9 = vweird.f32 %v844_v2 }
 0x360   :  { %v826_v15 = vmul.f32 %v1472_v17, %v824_v11  ;;  %1475 = vtanh.f32 %v800_v3  ;;  %vm831_vm1 = vweird.f32 %v1472_v17  ;;  %vm813_vm4 = vmor %vm811_vm2, %vm812_vm0 }
 0x361   :  { %v808_v10 = vsub.f32 1.0, %v807_v1  ;;  %vm832_vm5 = vmor %vm830_vm3, %vm831_vm1  ;;  %v837_v1 = vor.u32 1.1754944e-38, %v836_v19 }
 0x362   :  { %v827_v7 = vsub.f32 1.0, %v826_v15 }
 0x363   :  { %v809_v18 = vmul.f32 %v1470_v42, %v808_v10 }
 0x364   :  { %v828_v6 = vmul.f32 %v1472_v17, %v827_v7 }
 0x365   :  { %v1474_v54 = vpop.eup %1473  ;;  %v810_v49 = vadd.f32 %v1470_v42, %v809_v18 }
 0x366   :  { %v829_v20 = vadd.f32 %v1472_v17, %v828_v6  ;;  %v846_v4 = vmul.f32 %v1474_v54, %v844_v2  ;;  %v1476_v3 = vpop.eup %1475  ;;  %vm851_vm8 = vweird.f32 %v1474_v54  ;;  %v856_v6 = vand.u32 2147483648, %v844_v2 }
 0x367   :  { %v814_v15 = vsel %vm813_vm4, %v1470_v42, %v810_v49  ;;  %v854_v49 = vand.u32 2147483647, %v844_v2  ;;  %vm852_vm10 = vmor %vm850_vm9, %vm851_vm8 }
 0x368   :  { %v819_v59 = vsel %vm816_vm6, %v818_v8, %v814_v15  ;;  %v833_v10 = vsel %vm832_vm5, %v1472_v17, %v829_v20  ;;  %v847_v61 = vsub.f32 1.0, %v846_v4  ;;  %v857_v42 = vor.u32 1.1754944e-38, %v856_v6 }
 0x369   :  { %v838_v7 = vsel %vm835_vm7, %v837_v1, %v833_v10  ;;  %v861_v51 = vmul.f32 %v1476_v3, %v819_v59  ;;  %vm855_vm11 = vcmp.eq.f32.partialorder %v854_v49, 8.507059e+37  ;;  %v1373_v59 = vld [vmem:[%s2555_s0 + $0xb0] sm:$0xff] }
 0x36a   :  { %v860_v12 = vmul.f32 %v838_v7, %v2348_v5  ;;  %v848_v18 = vmul.f32 %v1474_v54, %v847_v61 }
 0x36c   :  { %v2431_v14 = vadd.f32 %v861_v51, %v860_v12  ;;  %v849_v11 = vadd.f32 %v1474_v54, %v848_v18 }
 0x36e   :  { %1477 = vtanh.f32 %v2431_v14  ;;  %v853_v13 = vsel %vm852_vm10, %v1474_v54, %v849_v11 }
 0x36f   :  { %v858_v17 = vsel %vm855_vm11, %v857_v42, %v853_v13 }
 0x374   :  { %v1478_v16 = vpop.eup %1477 }
 0x375   :  { %v864_v9 = vmul.f32 %v1478_v16, %v858_v17 }
 0x377   :  { %1370 = vst [vmem:[%s2557_s2 + $0x20] sm:$0xff] %v864_v9  ;;  %888 = vmatmul.f32.vlgmr.msrb.gmra.mxu0 %v864_v9  ;;  %908 = vmatmul.f32.vlgmr.msrb.gmra.mxu1 %v864_v9 }
 0x378   :  { %928 = vmatmul.f32.vlgmr.msrb.gmra.mxu2 %v864_v9  ;;  %948 = vmatmul.f32.vlgmr.msrb.gmra.mxu3 %v864_v9 }
 0x379   :  { %1180 = vmatpush.msrb.mxu0 %v2143_v50  ;;  %1200 = vmatpush.msrb.mxu1 %v2146_v21  ;;  %v2796_v50 = vld [vmem:[#allocation7_spill] sm:$0xff]  ;;  %v2797_v21 = vld [vmem:[#allocation21_spill] sm:$0xff] }
 0x37a   :  { %1220 = vmatpush.msrb.mxu2 %v2149_v22  ;;  %1240 = vmatpush.msrb.mxu3 %v2152_v23  ;;  %v2798_v22 = vld [vmem:[#allocation8_spill] sm:$0xff]  ;;  %v2799_v23 = vld [vmem:[#allocation9_spill] sm:$0xff] }
 0x37b   :  { %1181 = vmatpush.msrb.mxu0 %v2155_v24  ;;  %1201 = vmatpush.msrb.mxu1 %v2158_v25  ;;  %v2800_v24 = vld [vmem:[#allocation10_spill] sm:$0xff]  ;;  %v2801_v25 = vld [vmem:[#allocation25_spill] sm:$0xff] }
 0x37c   :  { %1221 = vmatpush.msrb.mxu2 %v2161_v26  ;;  %1241 = vmatpush.msrb.mxu3 %v2164_v27  ;;  %v2802_v26 = vld [vmem:[#allocation11_spill] sm:$0xff]  ;;  %v2803_v27 = vld [vmem:[#allocation12_spill] sm:$0xff] }
 0x37d   :  { %1182 = vmatpush.msrb.mxu0 %v2167_v28  ;;  %1202 = vmatpush.msrb.mxu1 %v2170_v29  ;;  %v2804_v28 = vld [vmem:[#allocation13_spill] sm:$0xff] }
 0x37e   :  { %1222 = vmatpush.msrb.mxu2 %v2173_v30  ;;  %1242 = vmatpush.msrb.mxu3 %v2176_v31  ;;  %v2805_v29 = vld [vmem:[#allocation29_spill] sm:$0xff]  ;;  %v2806_v30 = vld [vmem:[#allocation14_spill] sm:$0xff]  ;;  %v2807_v31 = vld [vmem:[#allocation15_spill] sm:$0xff] }
 0x37f   :  { %1183 = vmatpush.msrb.mxu0 %v2179_v32  ;;  %1203 = vmatpush.msrb.mxu1 %v2182_v33  ;;  %v2808_v32 = vld [vmem:[#allocation16_spill] sm:$0xff]  ;;  %v2809_v33 = vld [vmem:[#allocation30_spill] sm:$0xff] }
 0x380   :  { %1223 = vmatpush.msrb.mxu2 %v2185_v35  ;;  %1243 = vmatpush.msrb.mxu3 %v2188_v39  ;;  %v2810_v35 = vld [vmem:[#allocation17_spill] sm:$0xff]  ;;  %v2811_v39 = vld [vmem:[#allocation18_spill] sm:$0xff] }
 0x381   :  { %1184 = vmatpush.msrb.mxu0 %v2191_v43  ;;  %1204 = vmatpush.msrb.mxu1 %v2194_v47  ;;  %v2812_v43 = vld [vmem:[#allocation19_spill] sm:$0xff] }
 0x382   :  { %1224 = vmatpush.msrb.mxu2 %v2197_v60  ;;  %1244 = vmatpush.msrb.mxu3 %v2200_v63  ;;  %v2813_v47 = vld [vmem:[#allocation31_spill] sm:$0xff]  ;;  %v2814_v60 = vld [vmem:[#allocation20_spill] sm:$0xff]  ;;  %v2815_v63 = vld [vmem:[#allocation22_spill] sm:$0xff] }
 0x383   :  { %1185 = vmatpush.msrb.mxu0 %v2203_v34  ;;  %1205 = vmatpush.msrb.mxu1 %v2206_v36  ;;  %v2816_v34 = vld [vmem:[#allocation23_spill] sm:$0xff]  ;;  %v2817_v36 = vld [vmem:[#allocation32_spill] sm:$0xff] }
 0x384   :  { %1225 = vmatpush.msrb.mxu2 %v2209_v37  ;;  %1245 = vmatpush.msrb.mxu3 %v2212_v40  ;;  %v2818_v37 = vld [vmem:[#allocation24_spill] sm:$0xff]  ;;  %v2819_v40 = vld [vmem:[#allocation26_spill] sm:$0xff] }
 0x385   :  { %1186 = vmatpush.msrb.mxu0 %v2215_v56  ;;  %1206 = vmatpush.msrb.mxu1 %v2218_v45  ;;  %v2820_v56 = vld [vmem:[#allocation27_spill] sm:$0xff]  ;;  %v2821_v45 = vld [vmem:[#allocation33_spill] sm:$0xff] }
 0x386   :  { %1226 = vmatpush.msrb.mxu2 %v2221_v53  ;;  %1246 = vmatpush.msrb.mxu3 %v2224_v46  ;;  %v1371_v53 = vld [vmem:[%s2555_s0 + $0xa0] sm:$0xff]  ;;  %v1372_v46 = vld [vmem:[%s2555_s0 + $0xa8] sm:$0xff] }
 0x387   :  { %1187 = vmatpush.msrb.mxu0 %v2227_v62  ;;  %1207 = vmatpush.msrb.mxu1 %v2230_v44 }
 0x388   :  { %1227 = vmatpush.msrb.mxu2 %v2233_v57  ;;  %1247 = vmatpush.msrb.mxu3 %v2236_v0 }
 0x389   :  { %1188 = vmatpush.msrb.mxu0 %v2239_v38  ;;  %1208 = vmatpush.msrb.mxu1 %v2242_v55 }
 0x38a   :  { %1228 = vmatpush.msrb.mxu2 %v2245_v41  ;;  %1248 = vmatpush.msrb.mxu3 %v2248_v58  ;;  %v1374_v41 = vld [vmem:[%s2555_s0 + $0xb8] sm:$0xff] }
 0x38b   :  { %1189 = vmatpush.msrb.mxu0 %v2251_v52  ;;  %1209 = vmatpush.msrb.mxu1 %v2254_v48 }
 0x38c   :  { %1229 = vmatpush.msrb.mxu2 %v2796_v50  ;;  %1249 = vmatpush.msrb.mxu3 %v2797_v21 }
 0x38d   :  { %1190 = vmatpush.msrb.mxu0 %v2798_v22  ;;  %1210 = vmatpush.msrb.mxu1 %v2799_v23 }
 0x38e   :  { %1230 = vmatpush.msrb.mxu2 %v2800_v24  ;;  %1250 = vmatpush.msrb.mxu3 %v2801_v25 }
 0x38f   :  { %1191 = vmatpush.msrb.mxu0 %v2802_v26  ;;  %1211 = vmatpush.msrb.mxu1 %v2803_v27 }
 0x390   :  { %1231 = vmatpush.msrb.mxu2 %v2804_v28  ;;  %1251 = vmatpush.msrb.mxu3 %v2805_v29 }
 0x391   :  { %1192 = vmatpush.msrb.mxu0 %v2806_v30  ;;  %1212 = vmatpush.msrb.mxu1 %v2807_v31 }
 0x392   :  { %1232 = vmatpush.msrb.mxu2 %v2808_v32  ;;  %1252 = vmatpush.msrb.mxu3 %v2809_v33 }
 0x393   :  { %1193 = vmatpush.msrb.mxu0 %v2810_v35  ;;  %1213 = vmatpush.msrb.mxu1 %v2811_v39 }
 0x394   :  { %1233 = vmatpush.msrb.mxu2 %v2812_v43  ;;  %1253 = vmatpush.msrb.mxu3 %v2813_v47 }
 0x395   :  { %1194 = vmatpush.msrb.mxu0 %v2814_v60  ;;  %1214 = vmatpush.msrb.mxu1 %v2815_v63 }
 0x396   :  { %1234 = vmatpush.msrb.mxu2 %v2816_v34  ;;  %1254 = vmatpush.msrb.mxu3 %v2817_v36  ;;  %v1380_v34 = vld [vmem:[%s2555_s0 + $0xc8] sm:$0xff] }
 0x397   :  { %1195 = vmatpush.msrb.mxu0 %v2818_v37  ;;  %1215 = vmatpush.msrb.mxu1 %v2819_v40 }
 0x398   :  { %1235 = vmatpush.msrb.mxu2 %v2820_v56  ;;  %1255 = vmatpush.msrb.mxu3 %v2821_v45 }
 0x3f4   :  { %v889_v62 = vpop.f32.mrf.mxu0  ;;  %v909_v44 = vpop.f32.mrf.mxu1 }
 0x3f5   :  { %v952_v57 = vadd.f32 %v1371_v53, %v889_v62  ;;  %v953_v0 = vadd.f32 %v1372_v46, %v909_v44  ;;  %v1382_v46 = vld [vmem:[%s2555_s0 + $0xd8] sm:$0xff] }
 0x3f7   :  { %v1375_v38 = vmul.f32 -1.442695, %v952_v57  ;;  %v1376_v55 = vmul.f32 -1.442695, %v953_v0 }
 0x3f9   :  { %1479 = vpow2.f32 %v1375_v38 }
 0x3fa   :  { %1481 = vpow2.f32 %v1376_v55 }
 0x3fb   :  { %v949_v58 = vpop.f32.mrf.mxu3  ;;  %v929_v54 = vpop.f32.mrf.mxu2 }
 0x3fc   :  { %v955_v52 = vadd.f32 %v1374_v41, %v949_v58  ;;  %v954_v20 = vadd.f32 %v1373_v59, %v929_v54  ;;  %v1381_v58 = vld [vmem:[%s2555_s0 + $0xd0] sm:$0xff] }
 0x3fe   :  { %v1377_v48 = vmul.f32 -1.442695, %v955_v52 }
 0x3ff   :  { %v1480_v5 = vpop.eup %1479 }
 0x400   :  { %v1482_v12 = vpop.eup %1481  ;;  %v959_v51 = vadd.f32 1.0, %v1480_v5  ;;  %1483 = vpow2.f32 %v1377_v48 }
 0x401   :  { %v978_v61 = vadd.f32 1.0, %v1482_v12 }
 0x402   :  { %1485 = vrcp.f32 %v959_v51  ;;  %v971_v7 = vand.u32 2147483648, %v959_v51  ;;  %v969_v6 = vand.u32 2147483647, %v959_v51  ;;  %vm965_vm14 = vweird.f32 %v959_v51 }
 0x403   :  { %1487 = vrcp.f32 %v978_v61  ;;  %v990_v18 = vand.u32 2147483648, %v978_v61  ;;  %v988_v13 = vand.u32 2147483647, %v978_v61  ;;  %vm984_vm15 = vweird.f32 %v978_v61 }
 0x404   :  { %v972_v17 = vor.u32 1.1754944e-38, %v971_v7  ;;  %vm970_vm2 = vcmp.eq.f32.partialorder %v969_v6, 8.507059e+37 }
 0x405   :  { %v991_v21 = vor.u32 1.1754944e-38, %v990_v18  ;;  %vm989_vm3 = vcmp.eq.f32.partialorder %v988_v13, 8.507059e+37 }
 0x406   :  { %v1484_v2 = vpop.eup %1483 }
 0x407   :  { %v998_v19 = vadd.f32 1.0, %v1484_v2 }
 0x408   :  { %v1486_v8 = vpop.eup %1485 }
 0x409   :  { %v1488_v4 = vpop.eup %1487  ;;  %v961_v1 = vmul.f32 %v1486_v8, %v959_v51  ;;  %1489 = vrcp.f32 %v998_v19  ;;  %vm966_vm12 = vweird.f32 %v1486_v8  ;;  %v1010_v33 = vand.u32 2147483648, %v998_v19 }
 0x40a   :  { %v980_v15 = vmul.f32 %v1488_v4, %v978_v61  ;;  %1491 = vtanh.f32 %v954_v20  ;;  %vm985_vm13 = vweird.f32 %v1488_v4  ;;  %vm967_vm0 = vmor %vm965_vm14, %vm966_vm12  ;;  %vm1004_vm5 = vweird.f32 %v998_v19 }
 0x40b   :  { %v962_v3 = vsub.f32 1.0, %v961_v1  ;;  %vm986_vm1 = vmor %vm984_vm15, %vm985_vm13  ;;  %v1008_v35 = vand.u32 2147483647, %v998_v19  ;;  %v1011_v43 = vor.u32 1.1754944e-38, %v1010_v33 }
 0x40c   :  { %v981_v10 = vsub.f32 1.0, %v980_v15 }
 0x40d   :  { %v963_v11 = vmul.f32 %v1486_v8, %v962_v3  ;;  %vm1009_vm7 = vcmp.eq.f32.partialorder %v1008_v35, 8.507059e+37  ;;  %v1388_v35 = vld [vmem:[%s2555_s0 + $0xe8] sm:$0xff] }
 0x40e   :  { %v982_v49 = vmul.f32 %v1488_v4, %v981_v10 }
 0x40f   :  { %v1490_v42 = vpop.eup %1489  ;;  %v964_v16 = vadd.f32 %v1486_v8, %v963_v11 }
 0x410   :  { %v983_v9 = vadd.f32 %v1488_v4, %v982_v49  ;;  %v1000_v50 = vmul.f32 %v1490_v42, %v998_v19  ;;  %v1492_v23 = vpop.eup %1491  ;;  %vm1005_vm4 = vweird.f32 %v1490_v42 }
 0x411   :  { %v968_v22 = vsel %vm967_vm0, %v1486_v8, %v964_v16  ;;  %vm1006_vm6 = vmor %vm1004_vm5, %vm1005_vm4 }
 0x412   :  { %v973_v24 = vsel %vm970_vm2, %v972_v17, %v968_v22  ;;  %v987_v25 = vsel %vm986_vm1, %v1488_v4, %v983_v9  ;;  %v1001_v26 = vsub.f32 1.0, %v1000_v50 }
 0x413   :  { %v992_v27 = vsel %vm989_vm3, %v991_v21, %v987_v25  ;;  %v1015_v28 = vmul.f32 %v1492_v23, %v973_v24 }
 0x414   :  { %v1014_v29 = vmul.f32 %v992_v27, %v2431_v14  ;;  %v1002_v30 = vmul.f32 %v1490_v42, %v1001_v26  ;;  %v1379_v14 = vld [vmem:[%s2555_s0 + $0xc0] sm:$0xff] }
 0x416   :  { %v2514_v31 = vadd.f32 %v1015_v28, %v1014_v29  ;;  %v1003_v32 = vadd.f32 %v1490_v42, %v1002_v30 }
 0x418   :  { %1493 = vtanh.f32 %v2514_v31  ;;  %v1007_v39 = vsel %vm1006_vm6, %v1490_v42, %v1003_v32 }
 0x419   :  { %v1012_v60 = vsel %vm1009_vm7, %v1011_v43, %v1007_v39 }
 0x41e   :  { %v1494_v47 = vpop.eup %1493 }
 0x41f   :  { %v1018_v63 = vmul.f32 %v1494_v47, %v1012_v60 }
 0x421   :  { %1378 = vst [vmem:[%s2557_s2 + $0x28] sm:$0xff] %v1018_v63  ;;  %1042 = vmatmul.f32.vlgmr.msra.gmra.mxu0 %v1018_v63  ;;  %1062 = vmatmul.f32.vlgmr.msra.gmra.mxu1 %v1018_v63 }
 0x422   :  { %1082 = vmatmul.f32.vlgmr.msra.gmra.mxu2 %v1018_v63  ;;  %1102 = vmatmul.f32.vlgmr.msra.gmra.mxu3 %v1018_v63 }
 0x49e   :  { %v1043_v36 = vpop.f32.mrf.mxu0  ;;  %v1063_v37 = vpop.f32.mrf.mxu1 }
 0x49f   :  { %v1106_v40 = vadd.f32 %v1379_v14, %v1043_v36  ;;  %v1107_v56 = vadd.f32 %v1380_v34, %v1063_v37  ;;  %v1390_v34 = vld [vmem:[%s2555_s0 + $0xf8] sm:$0xff] }
 0x4a1   :  { %v1383_v45 = vmul.f32 -1.442695, %v1106_v40  ;;  %v1384_v53 = vmul.f32 -1.442695, %v1107_v56 }
 0x4a3   :  { %1495 = vpow2.f32 %v1383_v45 }
 0x4a4   :  { %1497 = vpow2.f32 %v1384_v53 }
 0x4a5   :  { %v1103_v62 = vpop.f32.mrf.mxu3  ;;  %v1083_v52 = vpop.f32.mrf.mxu2 }
 0x4a6   :  { %v1109_v44 = vadd.f32 %v1382_v46, %v1103_v62  ;;  %v1108_v51 = vadd.f32 %v1381_v58, %v1083_v52  ;;  %v1389_v62 = vld [vmem:[%s2555_s0 + $0xf0] sm:$0xff] }
 0x4a8   :  { %v1385_v57 = vmul.f32 -1.442695, %v1109_v44 }
 0x4a9   :  { %v1496_v0 = vpop.eup %1495 }
 0x4aa   :  { %v1498_v38 = vpop.eup %1497  ;;  %v1113_v55 = vadd.f32 1.0, %v1496_v0  ;;  %1499 = vpow2.f32 %v1385_v57 }
 0x4ab   :  { %v1132_v41 = vadd.f32 1.0, %v1498_v38 }
 0x4ac   :  { %1501 = vrcp.f32 %v1113_v55  ;;  %v1125_v8 = vand.u32 2147483648, %v1113_v55  ;;  %v1123_v1 = vand.u32 2147483647, %v1113_v55  ;;  %vm1119_vm10 = vweird.f32 %v1113_v55 }
 0x4ad   :  { %1503 = vrcp.f32 %v1132_v41  ;;  %v1144_v20 = vand.u32 2147483648, %v1132_v41  ;;  %v1142_v3 = vand.u32 2147483647, %v1132_v41  ;;  %vm1138_vm11 = vweird.f32 %v1132_v41 }
 0x4ae   :  { %v1126_v18 = vor.u32 1.1754944e-38, %v1125_v8  ;;  %vm1124_vm14 = vcmp.eq.f32.partialorder %v1123_v1, 8.507059e+37 }
 0x4af   :  { %v1145_v49 = vor.u32 1.1754944e-38, %v1144_v20  ;;  %vm1143_vm15 = vcmp.eq.f32.partialorder %v1142_v3, 8.507059e+37 }
 0x4b0   :  { %v1500_v48 = vpop.eup %1499 }
 0x4b1   :  { %v1152_v5 = vadd.f32 1.0, %v1500_v48 }
 0x4b2   :  { %v1502_v12 = vpop.eup %1501 }
 0x4b3   :  { %v1504_v61 = vpop.eup %1503  ;;  %v1115_v59 = vmul.f32 %v1502_v12, %v1113_v55  ;;  %1505 = vrcp.f32 %v1152_v5  ;;  %vm1120_vm8 = vweird.f32 %v1502_v12  ;;  %v1164_v26 = vand.u32 2147483648, %v1152_v5 }
 0x4b4   :  { %v1134_v54 = vmul.f32 %v1504_v61, %v1132_v41  ;;  %1507 = vtanh.f32 %v1108_v51  ;;  %vm1139_vm9 = vweird.f32 %v1504_v61  ;;  %vm1121_vm12 = vmor %vm1119_vm10, %vm1120_vm8  ;;  %vm1158_vm1 = vweird.f32 %v1152_v5 }
 0x4b5   :  { %v1116_v2 = vsub.f32 1.0, %v1115_v59  ;;  %vm1140_vm13 = vmor %vm1138_vm11, %vm1139_vm9  ;;  %v1162_v27 = vand.u32 2147483647, %v1152_v5  ;;  %v1165_v29 = vor.u32 1.1754944e-38, %v1164_v26 }
 0x4b6   :  { %v1135_v19 = vsub.f32 1.0, %v1134_v54 }
 0x4b7   :  { %v1117_v4 = vmul.f32 %v1502_v12, %v1116_v2  ;;  %vm1163_vm3 = vcmp.eq.f32.partialorder %v1162_v27, 8.507059e+37 }
 0x4b8   :  { %v1136_v15 = vmul.f32 %v1504_v61, %v1135_v19 }
 0x4b9   :  { %v1506_v10 = vpop.eup %1505  ;;  %v1118_v7 = vadd.f32 %v1502_v12, %v1117_v4 }
 0x4ba   :  { %v1137_v11 = vadd.f32 %v1504_v61, %v1136_v15  ;;  %v1154_v6 = vmul.f32 %v1506_v10, %v1152_v5  ;;  %v1508_v42 = vpop.eup %1507  ;;  %vm1159_vm0 = vweird.f32 %v1506_v10 }
 0x4bb   :  { %v1122_v13 = vsel %vm1121_vm12, %v1502_v12, %v1118_v7  ;;  %vm1160_vm2 = vmor %vm1158_vm1, %vm1159_vm0 }
 0x4bc   :  { %v1127_v16 = vsel %vm1124_vm14, %v1126_v18, %v1122_v13  ;;  %v1141_v17 = vsel %vm1140_vm13, %v1504_v61, %v1137_v11  ;;  %v1155_v9 = vsub.f32 1.0, %v1154_v6 }
 0x4bd   :  { %v1146_v50 = vsel %vm1143_vm15, %v1145_v49, %v1141_v17  ;;  %v1169_v21 = vmul.f32 %v1508_v42, %v1127_v16 }
 0x4be   :  { %v1168_v22 = vmul.f32 %v1146_v50, %v2514_v31  ;;  %v1156_v23 = vmul.f32 %v1506_v10, %v1155_v9  ;;  %v1387_v31 = vld [vmem:[%s2555_s0 + $0xe0] sm:$0xff] }
 0x4c0   :  { %v2533_v24 = vadd.f32 %v1169_v21, %v1168_v22  ;;  %v1157_v25 = vadd.f32 %v1506_v10, %v1156_v23 }
 0x4c2   :  { %1509 = vtanh.f32 %v2533_v24  ;;  %v1161_v28 = vsel %vm1160_vm2, %v1506_v10, %v1157_v25 }
 0x4c3   :  { %v1166_v32 = vsel %vm1163_vm3, %v1165_v29, %v1161_v28 }
 0x4c8   :  { %v1510_v30 = vpop.eup %1509 }
 0x4c9   :  { %v1172_v33 = vmul.f32 %v1510_v30, %v1166_v32 }
 0x4cb   :  { %1386 = vst [vmem:[%s2557_s2 + $0x30] sm:$0xff] %v1172_v33  ;;  %1196 = vmatmul.f32.vlgmr.msrb.gmra.mxu0 %v1172_v33  ;;  %1216 = vmatmul.f32.vlgmr.msrb.gmra.mxu1 %v1172_v33 }
 0x4cc   :  { %1236 = vmatmul.f32.vlgmr.msrb.gmra.mxu2 %v1172_v33  ;;  %1256 = vmatmul.f32.vlgmr.msrb.gmra.mxu3 %v1172_v33 }
 0x548   :  { %v1197_v39 = vpop.f32.mrf.mxu0  ;;  %v1217_v43 = vpop.f32.mrf.mxu1 }
 0x549   :  { %v1260_v47 = vadd.f32 %v1387_v31, %v1197_v39  ;;  %v1261_v60 = vadd.f32 %v1388_v35, %v1217_v43 }
 0x54b   :  { %v1391_v63 = vmul.f32 -1.442695, %v1260_v47  ;;  %v1392_v14 = vmul.f32 -1.442695, %v1261_v60 }
 0x54d   :  { %1511 = vpow2.f32 %v1391_v63 }
 0x54e   :  { %1513 = vpow2.f32 %v1392_v14 }
 0x54f   :  { %v1257_v36 = vpop.f32.mrf.mxu3  ;;  %v1237_v44 = vpop.f32.mrf.mxu2 }
 0x550   :  { %v1263_v37 = vadd.f32 %v1390_v34, %v1257_v36  ;;  %v1262_v55 = vadd.f32 %v1389_v62, %v1237_v44 }
 0x552   :  { %v1393_v40 = vmul.f32 -1.442695, %v1263_v37 }
 0x553   :  { %v1512_v56 = vpop.eup %1511 }
 0x554   :  { %v1514_v45 = vpop.eup %1513  ;;  %v1267_v53 = vadd.f32 1.0, %v1512_v56  ;;  %1515 = vpow2.f32 %v1393_v40 }
 0x555   :  { %v1286_v46 = vadd.f32 1.0, %v1514_v45 }
 0x556   :  { %1517 = vrcp.f32 %v1267_v53  ;;  %v1279_v12 = vand.u32 2147483648, %v1267_v53  ;;  %v1277_v59 = vand.u32 2147483647, %v1267_v53  ;;  %vm1273_vm6 = vweird.f32 %v1267_v53 }
 0x557   :  { %1519 = vrcp.f32 %v1286_v46  ;;  %v1298_v51 = vand.u32 2147483648, %v1286_v46  ;;  %v1296_v2 = vand.u32 2147483647, %v1286_v46  ;;  %vm1292_vm7 = vweird.f32 %v1286_v46 }
 0x558   :  { %v1280_v20 = vor.u32 1.1754944e-38, %v1279_v12  ;;  %vm1278_vm10 = vcmp.eq.f32.partialorder %v1277_v59, 8.507059e+37 }
 0x559   :  { %v1299_v15 = vor.u32 1.1754944e-38, %v1298_v51  ;;  %vm1297_vm11 = vcmp.eq.f32.partialorder %v1296_v2, 8.507059e+37 }
 0x55a   :  { %v1516_v57 = vpop.eup %1515 }
 0x55b   :  { %v1306_v0 = vadd.f32 1.0, %v1516_v57 }
 0x55c   :  { %v1518_v38 = vpop.eup %1517 }
 0x55d   :  { %v1520_v41 = vpop.eup %1519  ;;  %v1269_v58 = vmul.f32 %v1518_v38, %v1267_v53  ;;  %1521 = vrcp.f32 %v1306_v0  ;;  %vm1274_vm4 = vweird.f32 %v1518_v38  ;;  %v1318_v9 = vand.u32 2147483648, %v1306_v0 }
 0x55e   :  { %v1288_v52 = vmul.f32 %v1520_v41, %v1286_v46  ;;  %1523 = vtanh.f32 %v1262_v55  ;;  %vm1293_vm5 = vweird.f32 %v1520_v41  ;;  %vm1275_vm8 = vmor %vm1273_vm6, %vm1274_vm4  ;;  %vm1312_vm13 = vweird.f32 %v1306_v0 }
 0x55f   :  { %v1270_v48 = vsub.f32 1.0, %v1269_v58  ;;  %vm1294_vm9 = vmor %vm1292_vm7, %vm1293_vm5  ;;  %v1316_v50 = vand.u32 2147483647, %v1306_v0  ;;  %v1319_v22 = vor.u32 1.1754944e-38, %v1318_v9 }
 0x560   :  { %v1289_v5 = vsub.f32 1.0, %v1288_v52 }
 0x561   :  { %v1271_v61 = vmul.f32 %v1518_v38, %v1270_v48  ;;  %vm1317_vm15 = vcmp.eq.f32.partialorder %v1316_v50, 8.507059e+37 }
 0x562   :  { %v1290_v54 = vmul.f32 %v1520_v41, %v1289_v5 }
 0x563   :  { %v1522_v19 = vpop.eup %1521  ;;  %v1272_v8 = vadd.f32 %v1518_v38, %v1271_v61 }
 0x564   :  { %v1291_v4 = vadd.f32 %v1520_v41, %v1290_v54  ;;  %v1308_v1 = vmul.f32 %v1522_v19, %v1306_v0  ;;  %v1524_v10 = vpop.eup %1523  ;;  %vm1313_vm12 = vweird.f32 %v1522_v19 }
 0x565   :  { %v1276_v3 = vsel %vm1275_vm8, %v1518_v38, %v1272_v8  ;;  %vm1314_vm14 = vmor %vm1312_vm13, %vm1313_vm12 }
 0x566   :  { %v1281_v7 = vsel %vm1278_vm10, %v1280_v20, %v1276_v3  ;;  %v1295_v18 = vsel %vm1294_vm9, %v1520_v41, %v1291_v4  ;;  %v1309_v11 = vsub.f32 1.0, %v1308_v1 }
 0x567   :  { %v1300_v6 = vsel %vm1297_vm11, %v1299_v15, %v1295_v18  ;;  %v1323_v49 = vmul.f32 %v1524_v10, %v1281_v7 }
 0x568   :  { %v1322_v13 = vmul.f32 %v1300_v6, %v2533_v24  ;;  %v1310_v42 = vmul.f32 %v1522_v19, %v1309_v11 }
 0x56a   :  { %v1324_v16 = vadd.f32 %v1323_v49, %v1322_v13  ;;  %v1311_v17 = vadd.f32 %v1522_v19, %v1310_v42 }
 0x56c   :  { %1525 = vtanh.f32 %v1324_v16  ;;  %v1315_v21 = vsel %vm1314_vm14, %v1522_v19, %v1311_v17 }
 0x56d   :  { %v1320_v25 = vsel %vm1317_vm15, %v1319_v22, %v1315_v21 }
 0x572   :  { %v1526_v23 = vpop.eup %1525 }
 0x573   :  { %v1326_v26 = vmul.f32 %v1526_v23, %v1320_v25 }
 0x575   :  { %1394 = vst [vmem:[%s2557_s2 + $0x38] sm:$0xff] %v1326_v26 }
 0x576   :  { %1335 = vsyncpa [#allocation5], 1 }

// kernel: lstm_network_forward.7
= control target key start
LH: loop header
LB: loop body
LE: loop exit
PB: predicated region body
PF: predicated region fallthrough
CT: control target
= control target key end

     0   :  { %9 = vsyncpa [#allocation5], 0  ;;  %s2628_s0 = inlined_call_operand.vmem [shape: f32[8,8,512], index: 0, kind: input, shape index: {}]   ;;  %s2629_s1 = inlined_call_operand.hbm [shape: f32[128,512], index: 1, kind: input, shape index: {}]   ;;  %s2630_s2 = inlined_call_operand.hbm [shape: f32[128,128], index: 2, kind: input, shape index: {}]   ;;  %s2631_s3 = inlined_call_operand.vmem [shape: f32[1,128], index: 3, kind: input, shape index: {}]   ;;  %s2632_s4 = inlined_call_operand.vmem [shape: f32[8,128], index: 4, kind: output, shape index: {}]  }
   0x1   :  { %s17_s17 = sshll.u32 %s2629_s1, 4  ;;  %s18_s17 = int_to_ptr.hbm [resolvable:$true] %s17_s17 }
   0x2   :  { %10 = vsyncpa [#allocation7], 0  ;;  %s1692_s18 = smov [#allocation4]   ;;  %s30_s22 = sshll.u32 %s2630_s2, 4  ;;  %s31_s22 = int_to_ptr.hbm [resolvable:$true] %s30_s22 }
   0x3   :  { %s19_s19 = sshll.u32 %s1692_s18, 4  ;;  %s1693_s23 = smov 512   ;;  %s20_s19 = int_to_ptr.vmem [resolvable:$true] %s19_s19 }
   0x4   :  { %s1694_s24 = smov 32   ;;  %s1695_s25 = smov [#allocation6]  }
   0x5   :  { %25 = dma.hbm_to_vmem [thread:$0]  %s18_s17, 8192, %s20_s19, [#allocation5], %s1693_s23, %s1693_s23, %s1694_s24  }
   0x6   :  { %s32_s26 = sshll.u32 %s1695_s25, 4  ;;  %s1696_s27 = smov 128   ;;  %s33_s26 = int_to_ptr.vmem [resolvable:$true] %s32_s26 }
   0x7   :  { %s1697_s28 = smov 8  }
   0x8   :  { %38 = dma.hbm_to_vmem [thread:$0]  %s31_s22, 2048, %s33_s26, [#allocation7], %s1696_s27, %s1696_s27, %s1697_s28  }
   0x9   :  { %1688 = dma.done.wait [#allocation5], 8192  }
   0xa   :  { %1689 = vsyncadd [#allocation5], 4294959104 }
   0xb   :  { %1690 = dma.done.wait [#allocation7], 2048  }
   0xc   :  { %1691 = vsyncadd [#allocation7], 4294965248  ;;  %v1730_v0 = vld [vmem:[#allocation4 + $0x1e0] sm:$0xff]  ;;  %v1732_v1 = vld [vmem:[#allocation4 + $0x1e8] sm:$0xff]  ;;  %v1698_v60 = vmov 0.0  }
   0xd   :  { %2739 = vst [vmem:[#allocation10_spill] sm:$0xff] %v1730_v0  ;;  %v1734_v2 = vld [vmem:[#allocation4 + $0x1f8] sm:$0xff]  ;;  %125 = vmatpush.msra.mxu0 %v1730_v0  ;;  %145 = vmatpush.msra.mxu1 %v1732_v1  ;;  %v1738_v3 = vld [vmem:[#allocation4 + $0x1c0] sm:$0xff]  ;;  %v1740_v4 = vld [vmem:[#allocation4 + $0x1c8] sm:$0xff] }
   0xe   :  { %v1742_v5 = vld [vmem:[#allocation4 + $0x1d8] sm:$0xff]  ;;  %185 = vmatpush.msra.mxu3 %v1734_v2  ;;  %v1745_v6 = vld [vmem:[#allocation4 + $0x1a0] sm:$0xff]  ;;  %v1747_v7 = vld [vmem:[#allocation4 + $0x1a8] sm:$0xff] }
   0xf   :  { %126 = vmatpush.msra.mxu0 %v1738_v3  ;;  %146 = vmatpush.msra.mxu1 %v1740_v4  ;;  %v1751_v8 = vld [vmem:[#allocation4 + $0x1b8] sm:$0xff]  ;;  %v1754_v9 = vld [vmem:[#allocation4 + $0x180] sm:$0xff]  ;;  %v1756_v10 = vld [vmem:[#allocation4 + $0x188] sm:$0xff] }
  0x10   :  { %186 = vmatpush.msra.mxu3 %v1742_v5  ;;  %v1760_v11 = vld [vmem:[#allocation4 + $0x198] sm:$0xff]  ;;  %v1763_v12 = vld [vmem:[#allocation4 + $0x160] sm:$0xff]  ;;  %v1765_v13 = vld [vmem:[#allocation4 + $0x168] sm:$0xff] }
  0x11   :  { %127 = vmatpush.msra.mxu0 %v1745_v6  ;;  %147 = vmatpush.msra.mxu1 %v1747_v7  ;;  %v1769_v14 = vld [vmem:[#allocation4 + $0x178] sm:$0xff]  ;;  %v1772_v15 = vld [vmem:[#allocation4 + $0x140] sm:$0xff]  ;;  %v1774_v16 = vld [vmem:[#allocation4 + $0x148] sm:$0xff] }
  0x12   :  { %187 = vmatpush.msra.mxu3 %v1751_v8  ;;  %v1776_v17 = vld [vmem:[#allocation4 + $0x1f0] sm:$0xff]  ;;  %v1780_v18 = vld [vmem:[#allocation4 + $0x158] sm:$0xff]  ;;  %v1785_v20 = vld [vmem:[#allocation4 + $0x120] sm:$0xff] }
  0x13   :  { %128 = vmatpush.msra.mxu0 %v1754_v9  ;;  %148 = vmatpush.msra.mxu1 %v1756_v10  ;;  %v1782_v19 = vld [vmem:[#allocation4 + $0x1d0] sm:$0xff]  ;;  %v1787_v21 = vld [vmem:[#allocation4 + $0x128] sm:$0xff]  ;;  %v1792_v22 = vld [vmem:[#allocation4 + $0x138] sm:$0xff] }
  0x14   :  { %188 = vmatpush.msra.mxu3 %v1760_v11  ;;  %165 = vmatpush.msra.mxu2 %v1776_v17  ;;  %v1794_v23 = vld [vmem:[#allocation4 + $0x1b0] sm:$0xff]  ;;  %v1797_v24 = vld [vmem:[#allocation4 + $0x100] sm:$0xff]  ;;  %v1799_v25 = vld [vmem:[#allocation4 + $0x108] sm:$0xff] }
  0x15   :  { %129 = vmatpush.msra.mxu0 %v1763_v12  ;;  %149 = vmatpush.msra.mxu1 %v1765_v13  ;;  %v1804_v26 = vld [vmem:[#allocation4 + $0x118] sm:$0xff]  ;;  %v1806_v27 = vld [vmem:[#allocation4 + $0x190] sm:$0xff]  ;;  %v1809_v28 = vld [vmem:[#allocation4 + $0xe0] sm:$0xff] }
  0x16   :  { %189 = vmatpush.msra.mxu3 %v1769_v14  ;;  %166 = vmatpush.msra.mxu2 %v1782_v19  ;;  %v1811_v29 = vld [vmem:[#allocation4 + $0xe8] sm:$0xff]  ;;  %v1816_v30 = vld [vmem:[#allocation4 + $0xf8] sm:$0xff]  ;;  %v1818_v31 = vld [vmem:[#allocation4 + $0x170] sm:$0xff] }
  0x17   :  { %130 = vmatpush.msra.mxu0 %v1772_v15  ;;  %150 = vmatpush.msra.mxu1 %v1774_v16  ;;  %v1821_v32 = vld [vmem:[#allocation4 + $0xc0] sm:$0xff]  ;;  %v1823_v33 = vld [vmem:[#allocation4 + $0xc8] sm:$0xff]  ;;  %v1828_v34 = vld [vmem:[#allocation4 + $0xd8] sm:$0xff] }
  0x18   :  { %190 = vmatpush.msra.mxu3 %v1780_v18  ;;  %167 = vmatpush.msra.mxu2 %v1794_v23  ;;  %2740 = vst [vmem:[#allocation11_spill] sm:$0xff] %v1828_v34  ;;  %v1830_v35 = vld [vmem:[#allocation4 + $0x150] sm:$0xff]  ;;  %v1833_v36 = vld [vmem:[#allocation4 + $0xa0] sm:$0xff]  ;;  %v1835_v37 = vld [vmem:[#allocation4 + $0xa8] sm:$0xff] }
  0x19   :  { %131 = vmatpush.msra.mxu0 %v1785_v20  ;;  %151 = vmatpush.msra.mxu1 %v1787_v21  ;;  %2741 = vst [vmem:[#allocation12_spill] sm:$0xff] %v1833_v36  ;;  %v1840_v38 = vld [vmem:[#allocation4 + $0xb8] sm:$0xff]  ;;  %v1842_v39 = vld [vmem:[#allocation4 + $0x130] sm:$0xff]  ;;  %v1845_v40 = vld [vmem:[#allocation4 + $0x80] sm:$0xff] }
  0x1a   :  { %191 = vmatpush.msra.mxu3 %v1792_v22  ;;  %168 = vmatpush.msra.mxu2 %v1806_v27  ;;  %2742 = vst [vmem:[#allocation13_spill] sm:$0xff] %v1835_v37  ;;  %v1847_v41 = vld [vmem:[#allocation4 + $0x88] sm:$0xff]  ;;  %v1852_v42 = vld [vmem:[#allocation4 + $0x98] sm:$0xff]  ;;  %v1854_v43 = vld [vmem:[#allocation4 + $0x110] sm:$0xff] }
  0x1b   :  { %132 = vmatpush.msra.mxu0 %v1797_v24  ;;  %152 = vmatpush.msra.mxu1 %v1799_v25  ;;  %2743 = vst [vmem:[#allocation14_spill] sm:$0xff] %v1840_v38  ;;  %v1857_v44 = vld [vmem:[#allocation4 + $0x60] sm:$0xff]  ;;  %v1859_v45 = vld [vmem:[#allocation4 + $0x68] sm:$0xff]  ;;  %v1864_v46 = vld [vmem:[#allocation4 + $0x78] sm:$0xff] }
  0x1c   :  { %192 = vmatpush.msra.mxu3 %v1804_v26  ;;  %169 = vmatpush.msra.mxu2 %v1818_v31  ;;  %2744 = vst [vmem:[#allocation15_spill] sm:$0xff] %v1845_v40  ;;  %v1866_v47 = vld [vmem:[#allocation4 + $0xf0] sm:$0xff]  ;;  %v1869_v48 = vld [vmem:[#allocation4 + $0x40] sm:$0xff]  ;;  %v1871_v49 = vld [vmem:[#allocation4 + $0x48] sm:$0xff] }
  0x1d   :  { %133 = vmatpush.msra.mxu0 %v1809_v28  ;;  %153 = vmatpush.msra.mxu1 %v1811_v29  ;;  %2745 = vst [vmem:[#allocation16_spill] sm:$0xff] %v1847_v41  ;;  %v1876_v50 = vld [vmem:[#allocation4 + $0x58] sm:$0xff]  ;;  %v1878_v51 = vld [vmem:[#allocation4 + $0xd0] sm:$0xff]  ;;  %v1881_v52 = vld [vmem:[#allocation4 + $0x20] sm:$0xff] }
  0x1e   :  { %193 = vmatpush.msra.mxu3 %v1816_v30  ;;  %170 = vmatpush.msra.mxu2 %v1830_v35  ;;  %2746 = vst [vmem:[#allocation17_spill] sm:$0xff] %v1852_v42  ;;  %v1883_v53 = vld [vmem:[#allocation4 + $0x28] sm:$0xff]  ;;  %v1888_v54 = vld [vmem:[#allocation4 + $0x38] sm:$0xff]  ;;  %v1890_v55 = vld [vmem:[#allocation4 + $0xb0] sm:$0xff] }
  0x1f   :  { %134 = vmatpush.msra.mxu0 %v1821_v32  ;;  %154 = vmatpush.msra.mxu1 %v1823_v33  ;;  %2747 = vst [vmem:[#allocation18_spill] sm:$0xff] %v1857_v44  ;;  %v1893_v56 = vld [vmem:[#allocation4] sm:$0xff]  ;;  %v1895_v57 = vld [vmem:[#allocation4 + $0x8] sm:$0xff]  ;;  %v1900_v58 = vld [vmem:[#allocation4 + $0x18] sm:$0xff] }
  0x20   :  { %194 = vmatpush.msra.mxu3 %v1828_v34  ;;  %2748 = vst [vmem:[#allocation19_spill] sm:$0xff] %v1859_v45  ;;  %171 = vmatpush.msra.mxu2 %v1842_v39  ;;  %v1906_v59 = vld [vmem:[#allocation4 + $0x90] sm:$0xff] }
  0x21   :  { %135 = vmatpush.msra.mxu0 %v1833_v36  ;;  %155 = vmatpush.msra.mxu1 %v1835_v37  ;;  %2749 = vst [vmem:[#allocation20_spill] sm:$0xff] %v1864_v46  ;;  %v1909_v61 = vld [vmem:[#allocation4 + $0x70] sm:$0xff] }
  0x22   :  { %195 = vmatpush.msra.mxu3 %v1840_v38  ;;  %2750 = vst [vmem:[#allocation21_spill] sm:$0xff] %v1869_v48  ;;  %172 = vmatpush.msra.mxu2 %v1854_v43  ;;  %v1913_v62 = vld [vmem:[#allocation4 + $0x50] sm:$0xff] }
  0x23   :  { %136 = vmatpush.msra.mxu0 %v1845_v40  ;;  %156 = vmatpush.msra.mxu1 %v1847_v41  ;;  %2751 = vst [vmem:[#allocation22_spill] sm:$0xff] %v1871_v49  ;;  %v1919_v63 = vld [vmem:[#allocation4 + $0x30] sm:$0xff] }
  0x24   :  { %196 = vmatpush.msra.mxu3 %v1852_v42  ;;  %2752 = vst [vmem:[#allocation23_spill] sm:$0xff] %v1876_v50  ;;  %173 = vmatpush.msra.mxu2 %v1866_v47 }
  0x25   :  { %137 = vmatpush.msra.mxu0 %v1857_v44  ;;  %157 = vmatpush.msra.mxu1 %v1859_v45  ;;  %2753 = vst [vmem:[#allocation24_spill] sm:$0xff] %v1878_v51 }
  0x26   :  { %197 = vmatpush.msra.mxu3 %v1864_v46  ;;  %2754 = vst [vmem:[#allocation25_spill] sm:$0xff] %v1881_v52  ;;  %174 = vmatpush.msra.mxu2 %v1878_v51 }
  0x27   :  { %2755 = vst [vmem:[#allocation26_spill] sm:$0xff] %v1883_v53  ;;  %138 = vmatpush.msra.mxu0 %v1869_v48  ;;  %158 = vmatpush.msra.mxu1 %v1871_v49 }
  0x28   :  { %2756 = vst [vmem:[#allocation27_spill] sm:$0xff] %v1888_v54  ;;  %198 = vmatpush.msra.mxu3 %v1876_v50  ;;  %175 = vmatpush.msra.mxu2 %v1890_v55 }
  0x29   :  { %2757 = vst [vmem:[#allocation28_spill] sm:$0xff] %v1890_v55  ;;  %139 = vmatpush.msra.mxu0 %v1881_v52  ;;  %159 = vmatpush.msra.mxu1 %v1883_v53 }
  0x2a   :  { %2758 = vst [vmem:[#allocation29_spill] sm:$0xff] %v1893_v56  ;;  %199 = vmatpush.msra.mxu3 %v1888_v54  ;;  %176 = vmatpush.msra.mxu2 %v1906_v59 }
  0x2b   :  { %2759 = vst [vmem:[#allocation30_spill] sm:$0xff] %v1895_v57  ;;  %140 = vmatpush.msra.mxu0 %v1893_v56  ;;  %160 = vmatpush.msra.mxu1 %v1895_v57 }
  0x2c   :  { %2760 = vst [vmem:[#allocation31_spill] sm:$0xff] %v1900_v58  ;;  %200 = vmatpush.msra.mxu3 %v1900_v58  ;;  %141 = vmatmul.f32.vlgmr.msra.gmra.mxu0 %v1698_v60 }
  0x2d   :  { %2761 = vst [vmem:[#allocation32_spill] sm:$0xff] %v1906_v59  ;;  %161 = vmatmul.f32.vlgmr.msra.gmra.mxu1 %v1698_v60  ;;  %201 = vmatmul.f32.vlgmr.msra.gmra.mxu3 %v1698_v60 }
  0x2e   :  { %2762 = vst [vmem:[#allocation33_spill] sm:$0xff] %v1909_v61  ;;  %277 = vmatpush.msrb.mxu0 %v1730_v0  ;;  %297 = vmatpush.msrb.mxu1 %v1732_v1  ;;  %v1925_v0 = vld [vmem:[#allocation4 + $0x10] sm:$0xff] }
  0x2f   :  { %2763 = vst [vmem:[#allocation34_spill] sm:$0xff] %v1913_v62  ;;  %337 = vmatpush.msrb.mxu3 %v1734_v2  ;;  %177 = vmatpush.msra.mxu2 %v1909_v61 }
  0x30   :  { %278 = vmatpush.msrb.mxu0 %v1738_v3  ;;  %2764 = vst [vmem:[#allocation35_spill] sm:$0xff] %v1919_v63  ;;  %298 = vmatpush.msrb.mxu1 %v1740_v4 }
  0x31   :  { %338 = vmatpush.msrb.mxu3 %v1742_v5  ;;  %178 = vmatpush.msra.mxu2 %v1913_v62  ;;  %2765 = vst [vmem:[#allocation36_spill] sm:$0xff] %v1925_v0 }
  0x32   :  { %279 = vmatpush.msrb.mxu0 %v1745_v6  ;;  %299 = vmatpush.msrb.mxu1 %v1747_v7 }
  0x33   :  { %339 = vmatpush.msrb.mxu3 %v1751_v8  ;;  %179 = vmatpush.msra.mxu2 %v1919_v63 }
  0x34   :  { %280 = vmatpush.msrb.mxu0 %v1754_v9  ;;  %300 = vmatpush.msrb.mxu1 %v1756_v10 }
  0x35   :  { %340 = vmatpush.msrb.mxu3 %v1760_v11  ;;  %180 = vmatpush.msra.mxu2 %v1925_v0 }
  0x36   :  { %281 = vmatpush.msrb.mxu0 %v1763_v12  ;;  %181 = vmatmul.f32.vlgmr.msra.gmra.mxu2 %v1698_v60  ;;  %v2766_v60 = vld [vmem:[#allocation10_spill] sm:$0xff] }
  0x37   :  { %301 = vmatpush.msrb.mxu1 %v1765_v13  ;;  %317 = vmatpush.msrb.mxu2 %v1776_v17 }
  0x38   :  { %341 = vmatpush.msrb.mxu3 %v1769_v14  ;;  %282 = vmatpush.msrb.mxu0 %v1772_v15 }
  0x39   :  { %302 = vmatpush.msrb.mxu1 %v1774_v16  ;;  %318 = vmatpush.msrb.mxu2 %v1782_v19 }
  0x3a   :  { %342 = vmatpush.msrb.mxu3 %v1780_v18  ;;  %283 = vmatpush.msrb.mxu0 %v1785_v20 }
  0x3b   :  { %303 = vmatpush.msrb.mxu1 %v1787_v21  ;;  %319 = vmatpush.msrb.mxu2 %v1794_v23 }
  0x3c   :  { %343 = vmatpush.msrb.mxu3 %v1792_v22  ;;  %284 = vmatpush.msrb.mxu0 %v1797_v24 }
  0x3d   :  { %304 = vmatpush.msrb.mxu1 %v1799_v25  ;;  %320 = vmatpush.msrb.mxu2 %v1806_v27 }
  0x3e   :  { %344 = vmatpush.msrb.mxu3 %v1804_v26  ;;  %285 = vmatpush.msrb.mxu0 %v1809_v28 }
  0x3f   :  { %305 = vmatpush.msrb.mxu1 %v1811_v29  ;;  %321 = vmatpush.msrb.mxu2 %v1818_v31 }
  0x40   :  { %345 = vmatpush.msrb.mxu3 %v1816_v30  ;;  %286 = vmatpush.msrb.mxu0 %v1821_v32 }
  0x41   :  { %306 = vmatpush.msrb.mxu1 %v1823_v33  ;;  %322 = vmatpush.msrb.mxu2 %v1830_v35 }
  0x42   :  { %346 = vmatpush.msrb.mxu3 %v1828_v34  ;;  %287 = vmatpush.msrb.mxu0 %v1833_v36 }
  0x43   :  { %307 = vmatpush.msrb.mxu1 %v1835_v37  ;;  %323 = vmatpush.msrb.mxu2 %v1842_v39 }
  0x44   :  { %347 = vmatpush.msrb.mxu3 %v1840_v38  ;;  %288 = vmatpush.msrb.mxu0 %v1845_v40 }
  0x45   :  { %308 = vmatpush.msrb.mxu1 %v1847_v41  ;;  %324 = vmatpush.msrb.mxu2 %v1854_v43 }
  0x46   :  { %348 = vmatpush.msrb.mxu3 %v1852_v42  ;;  %289 = vmatpush.msrb.mxu0 %v1857_v44 }
  0x47   :  { %309 = vmatpush.msrb.mxu1 %v1859_v45  ;;  %325 = vmatpush.msrb.mxu2 %v1866_v47 }
  0x48   :  { %349 = vmatpush.msrb.mxu3 %v1864_v46  ;;  %290 = vmatpush.msrb.mxu0 %v1869_v48 }
  0x49   :  { %310 = vmatpush.msrb.mxu1 %v1871_v49  ;;  %326 = vmatpush.msrb.mxu2 %v1878_v51 }
  0x4a   :  { %350 = vmatpush.msrb.mxu3 %v1876_v50  ;;  %291 = vmatpush.msrb.mxu0 %v1881_v52 }
  0x4b   :  { %311 = vmatpush.msrb.mxu1 %v1883_v53  ;;  %327 = vmatpush.msrb.mxu2 %v1890_v55 }
  0x4c   :  { %351 = vmatpush.msrb.mxu3 %v1888_v54  ;;  %292 = vmatpush.msrb.mxu0 %v1893_v56 }
  0x4d   :  { %312 = vmatpush.msrb.mxu1 %v1895_v57  ;;  %328 = vmatpush.msrb.mxu2 %v1906_v59 }
  0x4e   :  { %352 = vmatpush.msrb.mxu3 %v1900_v58  ;;  %429 = vmatpush.msra.mxu0 %v2766_v60 }
  0x4f   :  { %449 = vmatpush.msra.mxu1 %v1732_v1  ;;  %329 = vmatpush.msrb.mxu2 %v1909_v61 }
  0x50   :  { %489 = vmatpush.msra.mxu3 %v1734_v2  ;;  %430 = vmatpush.msra.mxu0 %v1738_v3 }
  0x51   :  { %450 = vmatpush.msra.mxu1 %v1740_v4  ;;  %330 = vmatpush.msrb.mxu2 %v1913_v62 }
  0x52   :  { %490 = vmatpush.msra.mxu3 %v1742_v5  ;;  %431 = vmatpush.msra.mxu0 %v1745_v6 }
  0x53   :  { %451 = vmatpush.msra.mxu1 %v1747_v7  ;;  %331 = vmatpush.msrb.mxu2 %v1919_v63 }
  0x54   :  { %491 = vmatpush.msra.mxu3 %v1751_v8  ;;  %432 = vmatpush.msra.mxu0 %v1754_v9 }
  0x55   :  { %452 = vmatpush.msra.mxu1 %v1756_v10  ;;  %332 = vmatpush.msrb.mxu2 %v1925_v0 }
  0x56   :  { %492 = vmatpush.msra.mxu3 %v1760_v11  ;;  %433 = vmatpush.msra.mxu0 %v1763_v12 }
  0x57   :  { %469 = vmatpush.msra.mxu2 %v1776_v17  ;;  %453 = vmatpush.msra.mxu1 %v1765_v13 }
  0x58   :  { %493 = vmatpush.msra.mxu3 %v1769_v14  ;;  %434 = vmatpush.msra.mxu0 %v1772_v15 }
  0x59   :  { %470 = vmatpush.msra.mxu2 %v1782_v19  ;;  %454 = vmatpush.msra.mxu1 %v1774_v16 }
  0x5a   :  { %494 = vmatpush.msra.mxu3 %v1780_v18  ;;  %435 = vmatpush.msra.mxu0 %v1785_v20 }
  0x5b   :  { %471 = vmatpush.msra.mxu2 %v1794_v23  ;;  %455 = vmatpush.msra.mxu1 %v1787_v21 }
  0x5c   :  { %495 = vmatpush.msra.mxu3 %v1792_v22  ;;  %436 = vmatpush.msra.mxu0 %v1797_v24 }
  0x5d   :  { %472 = vmatpush.msra.mxu2 %v1806_v27  ;;  %456 = vmatpush.msra.mxu1 %v1799_v25 }
  0x5e   :  { %496 = vmatpush.msra.mxu3 %v1804_v26  ;;  %437 = vmatpush.msra.mxu0 %v1809_v28 }
  0x5f   :  { %473 = vmatpush.msra.mxu2 %v1818_v31  ;;  %457 = vmatpush.msra.mxu1 %v1811_v29 }
  0x60   :  { %497 = vmatpush.msra.mxu3 %v1816_v30  ;;  %438 = vmatpush.msra.mxu0 %v1821_v32 }
  0x61   :  { %474 = vmatpush.msra.mxu2 %v1830_v35  ;;  %458 = vmatpush.msra.mxu1 %v1823_v33 }
  0x62   :  { %498 = vmatpush.msra.mxu3 %v1828_v34  ;;  %439 = vmatpush.msra.mxu0 %v1833_v36 }
  0x63   :  { %475 = vmatpush.msra.mxu2 %v1842_v39  ;;  %459 = vmatpush.msra.mxu1 %v1835_v37 }
  0x64   :  { %499 = vmatpush.msra.mxu3 %v1840_v38  ;;  %440 = vmatpush.msra.mxu0 %v1845_v40 }
  0x65   :  { %476 = vmatpush.msra.mxu2 %v1854_v43  ;;  %460 = vmatpush.msra.mxu1 %v1847_v41 }
  0x66   :  { %500 = vmatpush.msra.mxu3 %v1852_v42  ;;  %441 = vmatpush.msra.mxu0 %v1857_v44 }
  0x67   :  { %477 = vmatpush.msra.mxu2 %v1866_v47  ;;  %461 = vmatpush.msra.mxu1 %v1859_v45 }
  0x68   :  { %501 = vmatpush.msra.mxu3 %v1864_v46  ;;  %442 = vmatpush.msra.mxu0 %v1869_v48 }
  0x69   :  { %478 = vmatpush.msra.mxu2 %v1878_v51  ;;  %462 = vmatpush.msra.mxu1 %v1871_v49 }
  0x6a   :  { %502 = vmatpush.msra.mxu3 %v1876_v50  ;;  %443 = vmatpush.msra.mxu0 %v1881_v52 }
  0x6b   :  { %479 = vmatpush.msra.mxu2 %v1890_v55  ;;  %463 = vmatpush.msra.mxu1 %v1883_v53 }
  0x6c   :  { %503 = vmatpush.msra.mxu3 %v1888_v54  ;;  %444 = vmatpush.msra.mxu0 %v1893_v56  ;;  %v121_v54 = vld [vmem:[%s2628_s0] sm:$0xff]  ;;  %v122_v56 = vld [vmem:[%s2628_s0 + $0x8] sm:$0xff] }
  0x6d   :  { %480 = vmatpush.msra.mxu2 %v1906_v59  ;;  %464 = vmatpush.msra.mxu1 %v1895_v57 }
  0x6e   :  { %504 = vmatpush.msra.mxu3 %v1900_v58 }
  0x6f   :  { %481 = vmatpush.msra.mxu2 %v1909_v61 }
  0x71   :  { %482 = vmatpush.msra.mxu2 %v1913_v62 }
  0x73   :  { %483 = vmatpush.msra.mxu2 %v1919_v63  ;;  %v124_v63 = vld [vmem:[%s2628_s0 + $0x18] sm:$0xff] }
  0x75   :  { %484 = vmatpush.msra.mxu2 %v1925_v0 }
  0xa9   :  { %v142_v53 = vpop.f32.mrf.mxu0 }
  0xaa   :  { %v205_v57 = vadd.f32 %v142_v53, %v121_v54  ;;  %v162_v52 = vpop.f32.mrf.mxu1 }
  0xab   :  { %v206_v58 = vadd.f32 %v162_v52, %v122_v56  ;;  %v123_v52 = vld [vmem:[%s2628_s0 + $0x10] sm:$0xff] }
  0xac   :  { %v1388_v50 = vmul.f32 -1.442695, %v205_v57 }
  0xad   :  { %v1389_v49 = vmul.f32 -1.442695, %v206_v58 }
  0xae   :  { %1448 = vpow2.f32 %v1388_v50 }
  0xaf   :  { %1450 = vpow2.f32 %v1389_v49 }
  0xb0   :  { %v202_v0 = vpop.f32.mrf.mxu3 }
  0xb1   :  { %v208_v62 = vadd.f32 %v202_v0, %v124_v63 }
  0xb3   :  { %v1390_v48 = vmul.f32 -1.442695, %v208_v62 }
  0xb4   :  { %v1449_v46 = vpop.eup %1448 }
  0xb5   :  { %v1451_v61 = vpop.eup %1450  ;;  %v212_v45 = vadd.f32 1.0, %v1449_v46  ;;  %1452 = vpow2.f32 %v1390_v48 }
  0xb6   :  { %v231_v44 = vadd.f32 1.0, %v1451_v61 }
  0xb7   :  { %1454 = vrcp.f32 %v212_v45  ;;  %v224_v48 = vand.u32 2147483648, %v212_v45  ;;  %v222_v42 = vand.u32 2147483647, %v212_v45  ;;  %vm218_vm2 = vweird.f32 %v212_v45 }
  0xb8   :  { %1456 = vrcp.f32 %v231_v44  ;;  %v243_v61 = vand.u32 2147483648, %v231_v44  ;;  %v241_v41 = vand.u32 2147483647, %v231_v44  ;;  %vm237_vm3 = vweird.f32 %v231_v44 }
  0xb9   :  { %v182_v50 = vpop.f32.mrf.mxu2  ;;  %vm223_vm5 = vcmp.eq.f32.partialorder %v222_v42, 8.507059e+37 }
  0xba   :  { %v207_v54 = vadd.f32 %v182_v50, %v123_v52  ;;  %vm242_vm7 = vcmp.eq.f32.partialorder %v241_v41, 8.507059e+37 }
  0xbb   :  { %v1453_v53 = vpop.eup %1452 }
  0xbc   :  { %v251_v56 = vadd.f32 1.0, %v1453_v53  ;;  %v225_v53 = vor.u32 1.1754944e-38, %v224_v48  ;;  %v2774_v48 = vld [vmem:[#allocation16_spill] sm:$0xff] }
  0xbd   :  { %v1455_v57 = vpop.eup %1454 }
  0xbe   :  { %v1457_v49 = vpop.eup %1456  ;;  %v214_v58 = vmul.f32 %v1455_v57, %v212_v45  ;;  %1458 = vrcp.f32 %v251_v56  ;;  %vm219_vm0 = vweird.f32 %v1455_v57  ;;  %vm257_vm9 = vweird.f32 %v251_v56 }
  0xbf   :  { %v233_v0 = vmul.f32 %v1457_v49, %v231_v44  ;;  %1460 = vtanh.f32 %v207_v54  ;;  %vm238_vm1 = vweird.f32 %v1457_v49  ;;  %vm220_vm4 = vmor %vm218_vm2, %vm219_vm0  ;;  %v244_v54 = vor.u32 1.1754944e-38, %v243_v61  ;;  %v2775_v61 = vld [vmem:[#allocation32_spill] sm:$0xff] }
  0xc0   :  { %v215_v62 = vsub.f32 1.0, %v214_v58  ;;  %vm239_vm6 = vmor %vm237_vm3, %vm238_vm1  ;;  %v263_v44 = vand.u32 2147483648, %v251_v56 }
  0xc1   :  { %v234_v46 = vsub.f32 1.0, %v233_v0 }
  0xc2   :  { %v216_v63 = vmul.f32 %v1455_v57, %v215_v62  ;;  %v264_v42 = vor.u32 1.1754944e-38, %v263_v44  ;;  %v2785_v44 = vld [vmem:[#allocation25_spill] sm:$0xff] }
  0xc3   :  { %v235_v59 = vmul.f32 %v1457_v49, %v234_v46 }
  0xc4   :  { %v1459_v40 = vpop.eup %1458  ;;  %v217_v38 = vadd.f32 %v1455_v57, %v216_v63 }
  0xc5   :  { %v1461_v52 = vpop.eup %1460  ;;  %v253_v50 = vmul.f32 %v1459_v40, %v251_v56  ;;  %v236_v55 = vadd.f32 %v1457_v49, %v235_v59  ;;  %vm258_vm8 = vweird.f32 %v1459_v40  ;;  %v261_v59 = vand.u32 2147483647, %v251_v56  ;;  %v2772_v56 = vld [vmem:[#allocation14_spill] sm:$0xff] }
  0xc6   :  { %v221_v58 = vsel %vm220_vm4, %v1455_v57, %v217_v38  ;;  %vm259_vm10 = vmor %vm257_vm9, %vm258_vm8 }
  0xc7   :  { %v254_v0 = vsub.f32 1.0, %v253_v50  ;;  %v226_v62 = vsel %vm223_vm5, %v225_v53, %v221_v58  ;;  %v240_v37 = vsel %vm239_vm6, %v1457_v49, %v236_v55  ;;  %vm262_vm11 = vcmp.eq.f32.partialorder %v261_v59, 8.507059e+37  ;;  %v2773_v49 = vld [vmem:[#allocation15_spill] sm:$0xff]  ;;  %v2777_v50 = vld [vmem:[#allocation18_spill] sm:$0xff]  ;;  %v2780_v58 = vld [vmem:[#allocation20_spill] sm:$0xff] }
  0xc8   :  { %v245_v46 = vsel %vm242_vm7, %v244_v54, %v240_v37  ;;  %v268_v36 = vmul.f32 %v1461_v52, %v226_v62  ;;  %v2769_v37 = vld [vmem:[#allocation12_spill] sm:$0xff]  ;;  %v2776_v52 = vld [vmem:[#allocation17_spill] sm:$0xff]  ;;  %v2778_v53 = vld [vmem:[#allocation19_spill] sm:$0xff] }
  0xc9   :  { %v267_v34 = vmul.f32 0.0, %v245_v46  ;;  %v255_v51 = vmul.f32 %v1459_v40, %v254_v0  ;;  %v2779_v54 = vld [vmem:[#allocation33_spill] sm:$0xff]  ;;  %v2782_v62 = vld [vmem:[#allocation22_spill] sm:$0xff] }
  0xca   :  { %v2781_v0 = vld [vmem:[#allocation21_spill] sm:$0xff]  ;;  %v2783_v46 = vld [vmem:[#allocation34_spill] sm:$0xff] }
  0xcb   :  { %v2062_v63 = vadd.f32 %v268_v36, %v267_v34  ;;  %v256_v45 = vadd.f32 %v1459_v40, %v255_v51  ;;  %v2767_v34 = vld [vmem:[#allocation24_spill] sm:$0xff]  ;;  %v2768_v36 = vld [vmem:[#allocation11_spill] sm:$0xff]  ;;  %v2786_v59 = vld [vmem:[#allocation26_spill] sm:$0xff] }
  0xcc   :  { %v2771_v51 = vld [vmem:[#allocation28_spill] sm:$0xff] }
  0xcd   :  { %1462 = vtanh.f32 %v2062_v63  ;;  %v260_v38 = vsel %vm259_vm10, %v1459_v40, %v256_v45  ;;  %v2770_v40 = vld [vmem:[#allocation13_spill] sm:$0xff]  ;;  %v2784_v45 = vld [vmem:[#allocation23_spill] sm:$0xff] }
  0xce   :  { %v265_v55 = vsel %vm262_vm11, %v264_v42, %v260_v38  ;;  %v2787_v38 = vld [vmem:[#allocation35_spill] sm:$0xff] }
  0xcf   :  { %v2788_v42 = vld [vmem:[#allocation27_spill] sm:$0xff] }
  0xd3   :  { %v1463_v57 = vpop.eup %1462 }
  0xd4   :  { %v271_v41 = vmul.f32 %v1463_v57, %v265_v55  ;;  %v2789_v57 = vld [vmem:[#allocation29_spill] sm:$0xff]  ;;  %v2790_v55 = vld [vmem:[#allocation30_spill] sm:$0xff] }
  0xd6   :  { %293 = vmatmul.f32.vlgmr.msrb.gmra.mxu0 %v271_v41  ;;  %313 = vmatmul.f32.vlgmr.msrb.gmra.mxu1 %v271_v41 }
  0xd7   :  { %333 = vmatmul.f32.vlgmr.msrb.gmra.mxu2 %v271_v41  ;;  %353 = vmatmul.f32.vlgmr.msrb.gmra.mxu3 %v271_v41  ;;  %v2791_v41 = vld [vmem:[#allocation36_spill] sm:$0xff] }
  0xd8   :  { %581 = vmatpush.msrb.mxu0 %v2766_v60  ;;  %601 = vmatpush.msrb.mxu1 %v1732_v1 }
  0xd9   :  { %621 = vmatpush.msrb.mxu2 %v1776_v17  ;;  %641 = vmatpush.msrb.mxu3 %v1734_v2 }
  0xda   :  { %582 = vmatpush.msrb.mxu0 %v1738_v3  ;;  %602 = vmatpush.msrb.mxu1 %v1740_v4 }
  0xdb   :  { %622 = vmatpush.msrb.mxu2 %v1782_v19  ;;  %642 = vmatpush.msrb.mxu3 %v1742_v5 }
  0xdc   :  { %583 = vmatpush.msrb.mxu0 %v1745_v6  ;;  %603 = vmatpush.msrb.mxu1 %v1747_v7 }
  0xdd   :  { %623 = vmatpush.msrb.mxu2 %v1794_v23  ;;  %643 = vmatpush.msrb.mxu3 %v1751_v8 }
  0xde   :  { %584 = vmatpush.msrb.mxu0 %v1754_v9  ;;  %604 = vmatpush.msrb.mxu1 %v1756_v10 }
  0xdf   :  { %624 = vmatpush.msrb.mxu2 %v1806_v27  ;;  %644 = vmatpush.msrb.mxu3 %v1760_v11 }
  0xe0   :  { %585 = vmatpush.msrb.mxu0 %v1763_v12  ;;  %605 = vmatpush.msrb.mxu1 %v1765_v13 }
  0xe1   :  { %625 = vmatpush.msrb.mxu2 %v1818_v31  ;;  %645 = vmatpush.msrb.mxu3 %v1769_v14 }
  0xe2   :  { %586 = vmatpush.msrb.mxu0 %v1772_v15  ;;  %606 = vmatpush.msrb.mxu1 %v1774_v16 }
  0xe3   :  { %626 = vmatpush.msrb.mxu2 %v1830_v35  ;;  %646 = vmatpush.msrb.mxu3 %v1780_v18 }
  0xe4   :  { %587 = vmatpush.msrb.mxu0 %v1785_v20  ;;  %607 = vmatpush.msrb.mxu1 %v1787_v21 }
  0xe5   :  { %627 = vmatpush.msrb.mxu2 %v1842_v39  ;;  %647 = vmatpush.msrb.mxu3 %v1792_v22 }
  0xe6   :  { %588 = vmatpush.msrb.mxu0 %v1797_v24  ;;  %608 = vmatpush.msrb.mxu1 %v1799_v25 }
  0xe7   :  { %628 = vmatpush.msrb.mxu2 %v1854_v43  ;;  %648 = vmatpush.msrb.mxu3 %v1804_v26 }
  0xe8   :  { %589 = vmatpush.msrb.mxu0 %v1809_v28  ;;  %609 = vmatpush.msrb.mxu1 %v1811_v29 }
  0xe9   :  { %629 = vmatpush.msrb.mxu2 %v1866_v47  ;;  %649 = vmatpush.msrb.mxu3 %v1816_v30 }
  0xea   :  { %590 = vmatpush.msrb.mxu0 %v1821_v32  ;;  %610 = vmatpush.msrb.mxu1 %v1823_v33 }
  0xeb   :  { %630 = vmatpush.msrb.mxu2 %v2767_v34  ;;  %650 = vmatpush.msrb.mxu3 %v2768_v36 }
  0xec   :  { %591 = vmatpush.msrb.mxu0 %v2769_v37  ;;  %611 = vmatpush.msrb.mxu1 %v2770_v40 }
  0xed   :  { %631 = vmatpush.msrb.mxu2 %v2771_v51  ;;  %651 = vmatpush.msrb.mxu3 %v2772_v56 }
  0xee   :  { %592 = vmatpush.msrb.mxu0 %v2773_v49  ;;  %612 = vmatpush.msrb.mxu1 %v2774_v48 }
  0xef   :  { %632 = vmatpush.msrb.mxu2 %v2775_v61  ;;  %652 = vmatpush.msrb.mxu3 %v2776_v52 }
  0xf0   :  { %593 = vmatpush.msrb.mxu0 %v2777_v50  ;;  %613 = vmatpush.msrb.mxu1 %v2778_v53 }
  0xf1   :  { %633 = vmatpush.msrb.mxu2 %v2779_v54  ;;  %653 = vmatpush.msrb.mxu3 %v2780_v58 }
  0xf2   :  { %594 = vmatpush.msrb.mxu0 %v2781_v0  ;;  %614 = vmatpush.msrb.mxu1 %v2782_v62  ;;  %v2792_v0 = vld [vmem:[#allocation31_spill] sm:$0xff] }
  0xf3   :  { %634 = vmatpush.msrb.mxu2 %v2783_v46  ;;  %654 = vmatpush.msrb.mxu3 %v2784_v45  ;;  %v1391_v45 = vld [vmem:[%s2628_s0 + $0x20] sm:$0xff] }
  0xf4   :  { %595 = vmatpush.msrb.mxu0 %v2785_v44  ;;  %615 = vmatpush.msrb.mxu1 %v2786_v59  ;;  %v1392_v59 = vld [vmem:[%s2628_s0 + $0x28] sm:$0xff] }
  0xf5   :  { %635 = vmatpush.msrb.mxu2 %v2787_v38  ;;  %655 = vmatpush.msrb.mxu3 %v2788_v42 }
  0xf6   :  { %596 = vmatpush.msrb.mxu0 %v2789_v57  ;;  %616 = vmatpush.msrb.mxu1 %v2790_v55 }
  0xf7   :  { %636 = vmatpush.msrb.mxu2 %v2791_v41  ;;  %656 = vmatpush.msrb.mxu3 %v2792_v0  ;;  %v1394_v41 = vld [vmem:[%s2628_s0 + $0x38] sm:$0xff] }
 0x153   :  { %v294_v44 = vpop.f32.mrf.mxu0  ;;  %v314_v38 = vpop.f32.mrf.mxu1 }
 0x154   :  { %v357_v46 = vadd.f32 %v1391_v45, %v294_v44  ;;  %v358_v42 = vadd.f32 %v1392_v59, %v314_v38 }
 0x156   :  { %v1395_v62 = vmul.f32 -1.442695, %v357_v46  ;;  %v1396_v57 = vmul.f32 -1.442695, %v358_v42  ;;  %v1393_v46 = vld [vmem:[%s2628_s0 + $0x30] sm:$0xff] }
 0x158   :  { %1464 = vpow2.f32 %v1395_v62 }
 0x159   :  { %1466 = vpow2.f32 %v1396_v57 }
 0x15a   :  { %v354_v0 = vpop.f32.mrf.mxu3  ;;  %v334_v62 = vpop.f32.mrf.mxu2 }
 0x15b   :  { %v360_v55 = vadd.f32 %v1394_v41, %v354_v0  ;;  %v359_v38 = vadd.f32 %v1393_v46, %v334_v62 }
 0x15d   :  { %v1397_v58 = vmul.f32 -1.442695, %v360_v55 }
 0x15e   :  { %v1465_v54 = vpop.eup %1464 }
 0x15f   :  { %v1467_v53 = vpop.eup %1466  ;;  %v364_v50 = vadd.f32 1.0, %v1465_v54  ;;  %1468 = vpow2.f32 %v1397_v58 }
 0x160   :  { %v383_v52 = vadd.f32 1.0, %v1467_v53 }
 0x161   :  { %1470 = vrcp.f32 %v364_v50  ;;  %v376_v54 = vand.u32 2147483648, %v364_v50  ;;  %v374_v61 = vand.u32 2147483647, %v364_v50  ;;  %vm370_vm14 = vweird.f32 %v364_v50 }
 0x162   :  { %1472 = vrcp.f32 %v383_v52  ;;  %v395_v53 = vand.u32 2147483648, %v383_v52  ;;  %v393_v49 = vand.u32 2147483647, %v383_v52  ;;  %vm389_vm15 = vweird.f32 %v383_v52 }
 0x163   :  { %v377_v46 = vor.u32 1.1754944e-38, %v376_v54  ;;  %vm375_vm2 = vcmp.eq.f32.partialorder %v374_v61, 8.507059e+37 }
 0x164   :  { %vm394_vm3 = vcmp.eq.f32.partialorder %v393_v49, 8.507059e+37 }
 0x165   :  { %v1469_v45 = vpop.eup %1468 }
 0x166   :  { %v403_v44 = vadd.f32 1.0, %v1469_v45 }
 0x167   :  { %v1471_v59 = vpop.eup %1470 }
 0x168   :  { %v1473_v42 = vpop.eup %1472  ;;  %v366_v57 = vmul.f32 %v1471_v59, %v364_v50  ;;  %1474 = vrcp.f32 %v403_v44  ;;  %vm371_vm12 = vweird.f32 %v1471_v59  ;;  %vm409_vm5 = vweird.f32 %v403_v44 }
 0x169   :  { %v385_v0 = vmul.f32 %v1473_v42, %v383_v52  ;;  %1476 = vtanh.f32 %v359_v38  ;;  %vm390_vm13 = vweird.f32 %v1473_v42  ;;  %vm372_vm0 = vmor %vm370_vm14, %vm371_vm12 }
 0x16a   :  { %v367_v55 = vsub.f32 1.0, %v366_v57  ;;  %vm391_vm1 = vmor %vm389_vm15, %vm390_vm13  ;;  %v396_v57 = vor.u32 1.1754944e-38, %v395_v53 }
 0x16b   :  { %v386_v41 = vsub.f32 1.0, %v385_v0 }
 0x16c   :  { %v368_v58 = vmul.f32 %v1471_v59, %v367_v55 }
 0x16d   :  { %v387_v48 = vmul.f32 %v1473_v42, %v386_v41 }
 0x16e   :  { %v1475_v56 = vpop.eup %1474  ;;  %v369_v51 = vadd.f32 %v1471_v59, %v368_v58 }
 0x16f   :  { %v388_v62 = vadd.f32 %v1473_v42, %v387_v48  ;;  %v405_v45 = vmul.f32 %v1475_v56, %v403_v44  ;;  %v1477_v38 = vpop.eup %1476  ;;  %vm410_vm4 = vweird.f32 %v1475_v56  ;;  %v415_v48 = vand.u32 2147483648, %v403_v44 }
 0x170   :  { %v373_v0 = vsel %vm372_vm0, %v1471_v59, %v369_v51  ;;  %v413_v51 = vand.u32 2147483647, %v403_v44  ;;  %vm411_vm6 = vmor %vm409_vm5, %vm410_vm4 }
 0x171   :  { %v378_v40 = vsel %vm375_vm2, %v377_v46, %v373_v0  ;;  %v392_v55 = vsel %vm391_vm1, %v1473_v42, %v388_v62  ;;  %v406_v37 = vsub.f32 1.0, %v405_v45  ;;  %v416_v59 = vor.u32 1.1754944e-38, %v415_v48 }
 0x172   :  { %v397_v41 = vsel %vm394_vm3, %v396_v57, %v392_v55  ;;  %v420_v36 = vmul.f32 %v1477_v38, %v378_v40  ;;  %vm414_vm7 = vcmp.eq.f32.partialorder %v413_v51, 8.507059e+37  ;;  %v1400_v40 = vld [vmem:[%s2628_s0 + $0x50] sm:$0xff] }
 0x173   :  { %v419_v34 = vmul.f32 %v397_v41, %v2062_v63  ;;  %v407_v58 = vmul.f32 %v1475_v56, %v406_v37 }
 0x175   :  { %v2142_v50 = vadd.f32 %v420_v36, %v419_v34  ;;  %v408_v52 = vadd.f32 %v1475_v56, %v407_v58 }
 0x177   :  { %1478 = vtanh.f32 %v2142_v50  ;;  %v412_v61 = vsel %vm411_vm6, %v1475_v56, %v408_v52 }
 0x178   :  { %v417_v42 = vsel %vm414_vm7, %v416_v59, %v412_v61 }
 0x17d   :  { %v1479_v49 = vpop.eup %1478 }
 0x17e   :  { %v423_v54 = vmul.f32 %v1479_v49, %v417_v42 }
 0x180   :  { %445 = vmatmul.f32.vlgmr.msra.gmra.mxu0 %v423_v54  ;;  %465 = vmatmul.f32.vlgmr.msra.gmra.mxu1 %v423_v54 }
 0x181   :  { %485 = vmatmul.f32.vlgmr.msra.gmra.mxu2 %v423_v54  ;;  %505 = vmatmul.f32.vlgmr.msra.gmra.mxu3 %v423_v54 }
 0x182   :  { %733 = vmatpush.msra.mxu0 %v2766_v60  ;;  %753 = vmatpush.msra.mxu1 %v1732_v1  ;;  %v2793_v1 = vld [vmem:[#allocation24_spill] sm:$0xff] }
 0x183   :  { %773 = vmatpush.msra.mxu2 %v1776_v17  ;;  %793 = vmatpush.msra.mxu3 %v1734_v2  ;;  %v2794_v2 = vld [vmem:[#allocation11_spill] sm:$0xff]  ;;  %v2809_v17 = vld [vmem:[#allocation34_spill] sm:$0xff] }
 0x184   :  { %734 = vmatpush.msra.mxu0 %v1738_v3  ;;  %754 = vmatpush.msra.mxu1 %v1740_v4  ;;  %v2795_v3 = vld [vmem:[#allocation12_spill] sm:$0xff]  ;;  %v2796_v4 = vld [vmem:[#allocation13_spill] sm:$0xff] }
 0x185   :  { %774 = vmatpush.msra.mxu2 %v1782_v19  ;;  %794 = vmatpush.msra.mxu3 %v1742_v5  ;;  %v2797_v5 = vld [vmem:[#allocation28_spill] sm:$0xff]  ;;  %v2811_v19 = vld [vmem:[#allocation25_spill] sm:$0xff] }
 0x186   :  { %735 = vmatpush.msra.mxu0 %v1745_v6  ;;  %755 = vmatpush.msra.mxu1 %v1747_v7  ;;  %v2798_v6 = vld [vmem:[#allocation14_spill] sm:$0xff]  ;;  %v2799_v7 = vld [vmem:[#allocation15_spill] sm:$0xff] }
 0x187   :  { %775 = vmatpush.msra.mxu2 %v1794_v23  ;;  %795 = vmatpush.msra.mxu3 %v1751_v8  ;;  %v2800_v8 = vld [vmem:[#allocation16_spill] sm:$0xff]  ;;  %v2815_v23 = vld [vmem:[#allocation29_spill] sm:$0xff] }
 0x188   :  { %736 = vmatpush.msra.mxu0 %v1754_v9  ;;  %756 = vmatpush.msra.mxu1 %v1756_v10  ;;  %v2801_v9 = vld [vmem:[#allocation32_spill] sm:$0xff]  ;;  %v2802_v10 = vld [vmem:[#allocation17_spill] sm:$0xff] }
 0x189   :  { %776 = vmatpush.msra.mxu2 %v1806_v27  ;;  %796 = vmatpush.msra.mxu3 %v1760_v11  ;;  %v2803_v11 = vld [vmem:[#allocation18_spill] sm:$0xff] }
 0x18a   :  { %737 = vmatpush.msra.mxu0 %v1763_v12  ;;  %757 = vmatpush.msra.mxu1 %v1765_v13  ;;  %v2804_v12 = vld [vmem:[#allocation19_spill] sm:$0xff]  ;;  %v2805_v13 = vld [vmem:[#allocation33_spill] sm:$0xff]  ;;  %v1398_v27 = vld [vmem:[%s2628_s0 + $0x40] sm:$0xff] }
 0x18b   :  { %777 = vmatpush.msra.mxu2 %v1818_v31  ;;  %797 = vmatpush.msra.mxu3 %v1769_v14  ;;  %v2806_v14 = vld [vmem:[#allocation20_spill] sm:$0xff] }
 0x18c   :  { %738 = vmatpush.msra.mxu0 %v1772_v15  ;;  %758 = vmatpush.msra.mxu1 %v1774_v16  ;;  %v2807_v15 = vld [vmem:[#allocation21_spill] sm:$0xff]  ;;  %v2808_v16 = vld [vmem:[#allocation22_spill] sm:$0xff] }
 0x18d   :  { %778 = vmatpush.msra.mxu2 %v1830_v35  ;;  %798 = vmatpush.msra.mxu3 %v1780_v18  ;;  %v2810_v18 = vld [vmem:[#allocation23_spill] sm:$0xff] }
 0x18e   :  { %739 = vmatpush.msra.mxu0 %v1785_v20  ;;  %759 = vmatpush.msra.mxu1 %v1787_v21  ;;  %v2812_v20 = vld [vmem:[#allocation26_spill] sm:$0xff]  ;;  %v2813_v21 = vld [vmem:[#allocation35_spill] sm:$0xff] }
 0x18f   :  { %779 = vmatpush.msra.mxu2 %v1842_v39  ;;  %799 = vmatpush.msra.mxu3 %v1792_v22  ;;  %v2814_v22 = vld [vmem:[#allocation27_spill] sm:$0xff]  ;;  %v1401_v39 = vld [vmem:[%s2628_s0 + $0x58] sm:$0xff] }
 0x190   :  { %740 = vmatpush.msra.mxu0 %v1797_v24  ;;  %760 = vmatpush.msra.mxu1 %v1799_v25  ;;  %v2816_v24 = vld [vmem:[#allocation30_spill] sm:$0xff]  ;;  %v2817_v25 = vld [vmem:[#allocation36_spill] sm:$0xff] }
 0x191   :  { %780 = vmatpush.msra.mxu2 %v1854_v43  ;;  %800 = vmatpush.msra.mxu3 %v1804_v26  ;;  %v2818_v26 = vld [vmem:[#allocation31_spill] sm:$0xff] }
 0x192   :  { %741 = vmatpush.msra.mxu0 %v1809_v28  ;;  %761 = vmatpush.msra.mxu1 %v1811_v29  ;;  %v1399_v28 = vld [vmem:[%s2628_s0 + $0x48] sm:$0xff] }
 0x193   :  { %781 = vmatpush.msra.mxu2 %v1866_v47  ;;  %801 = vmatpush.msra.mxu3 %v1816_v30 }
 0x194   :  { %742 = vmatpush.msra.mxu0 %v1821_v32  ;;  %762 = vmatpush.msra.mxu1 %v1823_v33 }
 0x195   :  { %782 = vmatpush.msra.mxu2 %v2793_v1  ;;  %802 = vmatpush.msra.mxu3 %v2794_v2 }
 0x196   :  { %743 = vmatpush.msra.mxu0 %v2795_v3  ;;  %763 = vmatpush.msra.mxu1 %v2796_v4 }
 0x197   :  { %783 = vmatpush.msra.mxu2 %v2797_v5  ;;  %803 = vmatpush.msra.mxu3 %v2798_v6 }
 0x198   :  { %744 = vmatpush.msra.mxu0 %v2799_v7  ;;  %764 = vmatpush.msra.mxu1 %v2800_v8 }
 0x199   :  { %784 = vmatpush.msra.mxu2 %v2801_v9  ;;  %804 = vmatpush.msra.mxu3 %v2802_v10 }
 0x19a   :  { %745 = vmatpush.msra.mxu0 %v2803_v11  ;;  %765 = vmatpush.msra.mxu1 %v2804_v12 }
 0x19b   :  { %785 = vmatpush.msra.mxu2 %v2805_v13  ;;  %805 = vmatpush.msra.mxu3 %v2806_v14 }
 0x19c   :  { %746 = vmatpush.msra.mxu0 %v2807_v15  ;;  %766 = vmatpush.msra.mxu1 %v2808_v16 }
 0x19d   :  { %786 = vmatpush.msra.mxu2 %v2809_v17  ;;  %806 = vmatpush.msra.mxu3 %v2810_v18 }
 0x19e   :  { %747 = vmatpush.msra.mxu0 %v2811_v19  ;;  %767 = vmatpush.msra.mxu1 %v2812_v20 }
 0x19f   :  { %787 = vmatpush.msra.mxu2 %v2813_v21  ;;  %807 = vmatpush.msra.mxu3 %v2814_v22  ;;  %v2228_v21 = vld [vmem:[#allocation4 + $0x1e8] sm:$0xff]  ;;  %v2231_v22 = vld [vmem:[#allocation4 + $0x1f0] sm:$0xff] }
 0x1a0   :  { %748 = vmatpush.msra.mxu0 %v2815_v23  ;;  %768 = vmatpush.msra.mxu1 %v2816_v24  ;;  %v2234_v23 = vld [vmem:[#allocation4 + $0x1f8] sm:$0xff]  ;;  %v2237_v24 = vld [vmem:[#allocation4 + $0x1c0] sm:$0xff] }
 0x1a1   :  { %788 = vmatpush.msra.mxu2 %v2817_v25  ;;  %808 = vmatpush.msra.mxu3 %v2818_v26  ;;  %v2240_v25 = vld [vmem:[#allocation4 + $0x1c8] sm:$0xff]  ;;  %v2243_v26 = vld [vmem:[#allocation4 + $0x1d0] sm:$0xff] }
 0x1fd   :  { %v446_v29 = vpop.f32.mrf.mxu0  ;;  %v466_v30 = vpop.f32.mrf.mxu1 }
 0x1fe   :  { %v509_v31 = vadd.f32 %v1398_v27, %v446_v29  ;;  %v510_v32 = vadd.f32 %v1399_v28, %v466_v30  ;;  %v2246_v27 = vld [vmem:[#allocation4 + $0x1d8] sm:$0xff]  ;;  %v2249_v28 = vld [vmem:[#allocation4 + $0x1a0] sm:$0xff]  ;;  %v2252_v29 = vld [vmem:[#allocation4 + $0x1a8] sm:$0xff] }
 0x1ff   :  { %v2255_v30 = vld [vmem:[#allocation4 + $0x1b0] sm:$0xff] }
 0x200   :  { %v1402_v33 = vmul.f32 -1.442695, %v509_v31  ;;  %v1403_v35 = vmul.f32 -1.442695, %v510_v32  ;;  %v2258_v31 = vld [vmem:[#allocation4 + $0x1b8] sm:$0xff]  ;;  %v2261_v32 = vld [vmem:[#allocation4 + $0x180] sm:$0xff] }
 0x202   :  { %1480 = vpow2.f32 %v1402_v33  ;;  %v2264_v33 = vld [vmem:[#allocation4 + $0x188] sm:$0xff] }
 0x203   :  { %1482 = vpow2.f32 %v1403_v35  ;;  %v2267_v35 = vld [vmem:[#allocation4 + $0x190] sm:$0xff] }
 0x204   :  { %v506_v43 = vpop.f32.mrf.mxu3  ;;  %v486_v56 = vpop.f32.mrf.mxu2 }
 0x205   :  { %v512_v47 = vadd.f32 %v1401_v39, %v506_v43  ;;  %v511_v62 = vadd.f32 %v1400_v40, %v486_v56  ;;  %v2270_v39 = vld [vmem:[#allocation4 + $0x198] sm:$0xff]  ;;  %v2273_v43 = vld [vmem:[#allocation4 + $0x160] sm:$0xff] }
 0x206   :  { %v2294_v40 = vld [vmem:[#allocation4 + $0x158] sm:$0xff]  ;;  %v2297_v56 = vld [vmem:[#allocation4 + $0x120] sm:$0xff] }
 0x207   :  { %v1404_v60 = vmul.f32 -1.442695, %v512_v47  ;;  %v2276_v47 = vld [vmem:[#allocation4 + $0x168] sm:$0xff] }
 0x208   :  { %v1481_v63 = vpop.eup %1480 }
 0x209   :  { %v1483_v34 = vpop.eup %1482  ;;  %v516_v36 = vadd.f32 1.0, %v1481_v63  ;;  %1484 = vpow2.f32 %v1404_v60  ;;  %v2279_v60 = vld [vmem:[#allocation4 + $0x170] sm:$0xff]  ;;  %v2282_v63 = vld [vmem:[#allocation4 + $0x178] sm:$0xff] }
 0x20a   :  { %v535_v37 = vadd.f32 1.0, %v1483_v34  ;;  %v2285_v34 = vld [vmem:[#allocation4 + $0x140] sm:$0xff] }
 0x20b   :  { %1486 = vrcp.f32 %v516_v36  ;;  %v528_v41 = vand.u32 2147483648, %v516_v36  ;;  %v526_v48 = vand.u32 2147483647, %v516_v36  ;;  %vm522_vm10 = vweird.f32 %v516_v36 }
 0x20c   :  { %1488 = vrcp.f32 %v535_v37  ;;  %v547_v58 = vand.u32 2147483648, %v535_v37  ;;  %v545_v61 = vand.u32 2147483647, %v535_v37  ;;  %vm541_vm11 = vweird.f32 %v535_v37 }
 0x20d   :  { %v529_v42 = vor.u32 1.1754944e-38, %v528_v41  ;;  %vm527_vm14 = vcmp.eq.f32.partialorder %v526_v48, 8.507059e+37  ;;  %v2327_v41 = vld [vmem:[#allocation4 + $0xf0] sm:$0xff]  ;;  %v2336_v48 = vld [vmem:[#allocation4 + $0xc8] sm:$0xff] }
 0x20e   :  { %v548_v2 = vor.u32 1.1754944e-38, %v547_v58  ;;  %vm546_vm15 = vcmp.eq.f32.partialorder %v545_v61, 8.507059e+37  ;;  %v2330_v58 = vld [vmem:[#allocation4 + $0xf8] sm:$0xff] }
 0x20f   :  { %v1485_v44 = vpop.eup %1484  ;;  %v2342_v61 = vld [vmem:[#allocation4 + $0xd8] sm:$0xff] }
 0x210   :  { %v555_v53 = vadd.f32 1.0, %v1485_v44  ;;  %v2300_v44 = vld [vmem:[#allocation4 + $0x128] sm:$0xff]  ;;  %2820 = vst [vmem:[#allocation24_spill] sm:$0xff] %v2342_v61 }
 0x211   :  { %v1487_v46 = vpop.eup %1486 }
 0x212   :  { %v1489_v45 = vpop.eup %1488  ;;  %v518_v57 = vmul.f32 %v1487_v46, %v516_v36  ;;  %1490 = vrcp.f32 %v555_v53  ;;  %vm523_vm8 = vweird.f32 %v1487_v46  ;;  %v567_v14 = vand.u32 2147483648, %v555_v53  ;;  %v2288_v36 = vld [vmem:[#allocation4 + $0x148] sm:$0xff] }
 0x213   :  { %v537_v0 = vmul.f32 %v1489_v45, %v535_v37  ;;  %1492 = vtanh.f32 %v511_v62  ;;  %vm542_vm9 = vweird.f32 %v1489_v45  ;;  %vm524_vm12 = vmor %vm522_vm10, %vm523_vm8  ;;  %vm561_vm1 = vweird.f32 %v555_v53  ;;  %v2291_v37 = vld [vmem:[#allocation4 + $0x150] sm:$0xff]  ;;  %v2309_v62 = vld [vmem:[#allocation4 + $0x100] sm:$0xff] }
 0x214   :  { %v519_v38 = vsub.f32 1.0, %v518_v57  ;;  %vm543_vm13 = vmor %vm541_vm11, %vm542_vm9  ;;  %v565_v15 = vand.u32 2147483647, %v555_v53  ;;  %v568_v17 = vor.u32 1.1754944e-38, %v567_v14  ;;  %v2315_v57 = vld [vmem:[#allocation4 + $0x110] sm:$0xff]  ;;  %v2393_v14 = vld [vmem:[#allocation4 + $0x20] sm:$0xff] }
 0x215   :  { %v538_v55 = vsub.f32 1.0, %v537_v0  ;;  %v2318_v0 = vld [vmem:[#allocation4 + $0x118] sm:$0xff]  ;;  %2837 = vst [vmem:[#allocation23_spill] sm:$0xff] %v2393_v14 }
 0x216   :  { %v520_v52 = vmul.f32 %v1487_v46, %v519_v38  ;;  %vm566_vm3 = vcmp.eq.f32.partialorder %v565_v15, 8.507059e+37  ;;  %v2321_v38 = vld [vmem:[#allocation4 + $0xe0] sm:$0xff]  ;;  %v2396_v15 = vld [vmem:[#allocation4 + $0x28] sm:$0xff] }
 0x217   :  { %v539_v51 = vmul.f32 %v1489_v45, %v538_v55  ;;  %v2324_v55 = vld [vmem:[#allocation4 + $0xe8] sm:$0xff]  ;;  %2838 = vst [vmem:[#allocation25_spill] sm:$0xff] %v2396_v15 }
 0x218   :  { %v1491_v59 = vpop.eup %1490  ;;  %v521_v49 = vadd.f32 %v1487_v46, %v520_v52  ;;  %v2333_v52 = vld [vmem:[#allocation4 + $0xc0] sm:$0xff] }
 0x219   :  { %v540_v54 = vadd.f32 %v1489_v45, %v539_v51  ;;  %v557_v1 = vmul.f32 %v1491_v59, %v555_v53  ;;  %v1493_v4 = vpop.eup %1492  ;;  %vm562_vm0 = vweird.f32 %v1491_v59  ;;  %v2303_v53 = vld [vmem:[#allocation4 + $0x130] sm:$0xff] }
 0x21a   :  { %v525_v3 = vsel %vm524_vm12, %v1487_v46, %v521_v49  ;;  %vm563_vm2 = vmor %vm561_vm1, %vm562_vm0  ;;  %v2306_v46 = vld [vmem:[#allocation4 + $0x138] sm:$0xff]  ;;  %v2339_v51 = vld [vmem:[#allocation4 + $0xd0] sm:$0xff] }
 0x21b   :  { %v530_v5 = vsel %vm527_vm14, %v529_v42, %v525_v3  ;;  %v544_v6 = vsel %vm543_vm13, %v1489_v45, %v540_v54  ;;  %v558_v7 = vsub.f32 1.0, %v557_v1  ;;  %v2312_v45 = vld [vmem:[#allocation4 + $0x108] sm:$0xff]  ;;  %2819 = vst [vmem:[#allocation10_spill] sm:$0xff] %v2339_v51  ;;  %v2351_v42 = vld [vmem:[#allocation4 + $0xb0] sm:$0xff]  ;;  %v2354_v54 = vld [vmem:[#allocation4 + $0xb8] sm:$0xff] }
 0x21c   :  { %v549_v8 = vsel %vm546_vm15, %v548_v2, %v544_v6  ;;  %v572_v9 = vmul.f32 %v1493_v4, %v530_v5  ;;  %v2348_v49 = vld [vmem:[#allocation4 + $0xa8] sm:$0xff]  ;;  %2823 = vst [vmem:[#allocation13_spill] sm:$0xff] %v2351_v42  ;;  %v2357_v1 = vld [vmem:[#allocation4 + $0x80] sm:$0xff]  ;;  %v2363_v3 = vld [vmem:[#allocation4 + $0x90] sm:$0xff] }
 0x21d   :  { %v571_v10 = vmul.f32 %v549_v8, %v2142_v50  ;;  %v559_v11 = vmul.f32 %v1491_v59, %v558_v7  ;;  %v2225_v50 = vld [vmem:[#allocation4 + $0x1e0] sm:$0xff]  ;;  %2822 = vst [vmem:[#allocation12_spill] sm:$0xff] %v2348_v49  ;;  %v2360_v2 = vld [vmem:[#allocation4 + $0x88] sm:$0xff]  ;;  %v2366_v4 = vld [vmem:[#allocation4 + $0x98] sm:$0xff] }
 0x21e   :  { %2824 = vst [vmem:[#allocation28_spill] sm:$0xff] %v2354_v54  ;;  %v2369_v5 = vld [vmem:[#allocation4 + $0x60] sm:$0xff]  ;;  %v2372_v6 = vld [vmem:[#allocation4 + $0x68] sm:$0xff]  ;;  %v2375_v7 = vld [vmem:[#allocation4 + $0x70] sm:$0xff] }
 0x21f   :  { %v2222_v12 = vadd.f32 %v572_v9, %v571_v10  ;;  %v560_v13 = vadd.f32 %v1491_v59, %v559_v11  ;;  %2825 = vst [vmem:[#allocation14_spill] sm:$0xff] %v2357_v1  ;;  %v2378_v8 = vld [vmem:[#allocation4 + $0x78] sm:$0xff]  ;;  %v2381_v9 = vld [vmem:[#allocation4 + $0x40] sm:$0xff]  ;;  %v2384_v10 = vld [vmem:[#allocation4 + $0x48] sm:$0xff] }
 0x220   :  { %2826 = vst [vmem:[#allocation15_spill] sm:$0xff] %v2360_v2  ;;  %v2387_v11 = vld [vmem:[#allocation4 + $0x50] sm:$0xff] }
 0x221   :  { %1494 = vtanh.f32 %v2222_v12  ;;  %v564_v16 = vsel %vm563_vm2, %v1491_v59, %v560_v13  ;;  %v2345_v59 = vld [vmem:[#allocation4 + $0xa0] sm:$0xff]  ;;  %2827 = vst [vmem:[#allocation16_spill] sm:$0xff] %v2363_v3  ;;  %v2390_v13 = vld [vmem:[#allocation4 + $0x58] sm:$0xff] }
 0x222   :  { %v569_v19 = vsel %vm566_vm3, %v568_v17, %v564_v16  ;;  %2821 = vst [vmem:[#allocation11_spill] sm:$0xff] %v2345_v59  ;;  %v2399_v16 = vld [vmem:[#allocation4 + $0x30] sm:$0xff]  ;;  %v2402_v17 = vld [vmem:[#allocation4 + $0x38] sm:$0xff] }
 0x223   :  { %2828 = vst [vmem:[#allocation32_spill] sm:$0xff] %v2366_v4 }
 0x224   :  { %2829 = vst [vmem:[#allocation17_spill] sm:$0xff] %v2369_v5 }
 0x225   :  { %2830 = vst [vmem:[#allocation18_spill] sm:$0xff] %v2372_v6 }
 0x226   :  { %2831 = vst [vmem:[#allocation19_spill] sm:$0xff] %v2375_v7 }
 0x227   :  { %v1495_v18 = vpop.eup %1494  ;;  %2832 = vst [vmem:[#allocation33_spill] sm:$0xff] %v2378_v8 }
 0x228   :  { %v575_v20 = vmul.f32 %v1495_v18, %v569_v19  ;;  %2833 = vst [vmem:[#allocation20_spill] sm:$0xff] %v2381_v9  ;;  %v2405_v18 = vld [vmem:[#allocation4] sm:$0xff]  ;;  %v2408_v19 = vld [vmem:[#allocation4 + $0x8] sm:$0xff] }
 0x229   :  { %2834 = vst [vmem:[#allocation21_spill] sm:$0xff] %v2384_v10 }
 0x22a   :  { %597 = vmatmul.f32.vlgmr.msrb.gmra.mxu0 %v575_v20  ;;  %617 = vmatmul.f32.vlgmr.msrb.gmra.mxu1 %v575_v20  ;;  %2835 = vst [vmem:[#allocation22_spill] sm:$0xff] %v2387_v11 }
 0x22b   :  { %637 = vmatmul.f32.vlgmr.msrb.gmra.mxu2 %v575_v20  ;;  %657 = vmatmul.f32.vlgmr.msrb.gmra.mxu3 %v575_v20  ;;  %2836 = vst [vmem:[#allocation34_spill] sm:$0xff] %v2390_v13  ;;  %v2411_v20 = vld [vmem:[#allocation4 + $0x10] sm:$0xff] }
 0x22c   :  { %885 = vmatpush.msrb.mxu0 %v2225_v50  ;;  %905 = vmatpush.msrb.mxu1 %v2228_v21  ;;  %2839 = vst [vmem:[#allocation26_spill] sm:$0xff] %v2399_v16 }
 0x22d   :  { %925 = vmatpush.msrb.mxu2 %v2231_v22  ;;  %945 = vmatpush.msrb.mxu3 %v2234_v23  ;;  %2840 = vst [vmem:[#allocation35_spill] sm:$0xff] %v2402_v17 }
 0x22e   :  { %886 = vmatpush.msrb.mxu0 %v2237_v24  ;;  %906 = vmatpush.msrb.mxu1 %v2240_v25  ;;  %2841 = vst [vmem:[#allocation27_spill] sm:$0xff] %v2405_v18 }
 0x22f   :  { %926 = vmatpush.msrb.mxu2 %v2243_v26  ;;  %946 = vmatpush.msrb.mxu3 %v2246_v27  ;;  %2842 = vst [vmem:[#allocation29_spill] sm:$0xff] %v2408_v19 }
 0x230   :  { %887 = vmatpush.msrb.mxu0 %v2249_v28  ;;  %907 = vmatpush.msrb.mxu1 %v2252_v29  ;;  %2843 = vst [vmem:[#allocation30_spill] sm:$0xff] %v2411_v20 }
 0x231   :  { %927 = vmatpush.msrb.mxu2 %v2255_v30  ;;  %947 = vmatpush.msrb.mxu3 %v2258_v31 }
 0x232   :  { %888 = vmatpush.msrb.mxu0 %v2261_v32  ;;  %908 = vmatpush.msrb.mxu1 %v2264_v33 }
 0x233   :  { %928 = vmatpush.msrb.mxu2 %v2267_v35  ;;  %948 = vmatpush.msrb.mxu3 %v2270_v39 }
 0x234   :  { %889 = vmatpush.msrb.mxu0 %v2273_v43  ;;  %909 = vmatpush.msrb.mxu1 %v2276_v47 }
 0x235   :  { %929 = vmatpush.msrb.mxu2 %v2279_v60  ;;  %949 = vmatpush.msrb.mxu3 %v2282_v63 }
 0x236   :  { %890 = vmatpush.msrb.mxu0 %v2285_v34  ;;  %910 = vmatpush.msrb.mxu1 %v2288_v36 }
 0x237   :  { %930 = vmatpush.msrb.mxu2 %v2291_v37  ;;  %950 = vmatpush.msrb.mxu3 %v2294_v40 }
 0x238   :  { %891 = vmatpush.msrb.mxu0 %v2297_v56  ;;  %911 = vmatpush.msrb.mxu1 %v2300_v44 }
 0x239   :  { %931 = vmatpush.msrb.mxu2 %v2303_v53  ;;  %951 = vmatpush.msrb.mxu3 %v2306_v46 }
 0x23a   :  { %892 = vmatpush.msrb.mxu0 %v2309_v62  ;;  %912 = vmatpush.msrb.mxu1 %v2312_v45 }
 0x23b   :  { %932 = vmatpush.msrb.mxu2 %v2315_v57  ;;  %952 = vmatpush.msrb.mxu3 %v2318_v0 }
 0x23c   :  { %893 = vmatpush.msrb.mxu0 %v2321_v38  ;;  %913 = vmatpush.msrb.mxu1 %v2324_v55 }
 0x23d   :  { %933 = vmatpush.msrb.mxu2 %v2327_v41  ;;  %953 = vmatpush.msrb.mxu3 %v2330_v58 }
 0x23e   :  { %894 = vmatpush.msrb.mxu0 %v2333_v52  ;;  %914 = vmatpush.msrb.mxu1 %v2336_v48 }
 0x23f   :  { %934 = vmatpush.msrb.mxu2 %v2339_v51  ;;  %954 = vmatpush.msrb.mxu3 %v2342_v61 }
 0x240   :  { %895 = vmatpush.msrb.mxu0 %v2345_v59  ;;  %915 = vmatpush.msrb.mxu1 %v2348_v49 }
 0x241   :  { %935 = vmatpush.msrb.mxu2 %v2351_v42  ;;  %955 = vmatpush.msrb.mxu3 %v2354_v54 }
 0x242   :  { %896 = vmatpush.msrb.mxu0 %v2357_v1  ;;  %916 = vmatpush.msrb.mxu1 %v2360_v2 }
 0x243   :  { %936 = vmatpush.msrb.mxu2 %v2363_v3  ;;  %956 = vmatpush.msrb.mxu3 %v2366_v4 }
 0x244   :  { %897 = vmatpush.msrb.mxu0 %v2369_v5  ;;  %917 = vmatpush.msrb.mxu1 %v2372_v6 }
 0x245   :  { %937 = vmatpush.msrb.mxu2 %v2375_v7  ;;  %957 = vmatpush.msrb.mxu3 %v2378_v8 }
 0x246   :  { %898 = vmatpush.msrb.mxu0 %v2381_v9  ;;  %918 = vmatpush.msrb.mxu1 %v2384_v10 }
 0x247   :  { %938 = vmatpush.msrb.mxu2 %v2387_v11  ;;  %958 = vmatpush.msrb.mxu3 %v2390_v13 }
 0x248   :  { %899 = vmatpush.msrb.mxu0 %v2393_v14  ;;  %919 = vmatpush.msrb.mxu1 %v2396_v15  ;;  %v2414_v15 = vld [vmem:[#allocation4 + $0x18] sm:$0xff] }
 0x249   :  { %939 = vmatpush.msrb.mxu2 %v2399_v16  ;;  %959 = vmatpush.msrb.mxu3 %v2402_v17  ;;  %2844 = vst [vmem:[#allocation36_spill] sm:$0xff] %v2414_v15  ;;  %v1405_v17 = vld [vmem:[%s2628_s0 + $0x60] sm:$0xff] }
 0x24a   :  { %900 = vmatpush.msrb.mxu0 %v2405_v18  ;;  %920 = vmatpush.msrb.mxu1 %v2408_v19  ;;  %v1406_v18 = vld [vmem:[%s2628_s0 + $0x68] sm:$0xff] }
 0x24b   :  { %940 = vmatpush.msrb.mxu2 %v2411_v20  ;;  %960 = vmatpush.msrb.mxu3 %v2414_v15  ;;  %v1408_v20 = vld [vmem:[%s2628_s0 + $0x78] sm:$0xff] }
 0x2a7   :  { %v598_v16 = vpop.f32.mrf.mxu0  ;;  %v618_v14 = vpop.f32.mrf.mxu1 }
 0x2a8   :  { %v661_v13 = vadd.f32 %v1405_v17, %v598_v16  ;;  %v662_v19 = vadd.f32 %v1406_v18, %v618_v14 }
 0x2aa   :  { %v1409_v11 = vmul.f32 -1.442695, %v661_v13  ;;  %v1410_v10 = vmul.f32 -1.442695, %v662_v19  ;;  %v1407_v13 = vld [vmem:[%s2628_s0 + $0x70] sm:$0xff] }
 0x2ac   :  { %1496 = vpow2.f32 %v1409_v11 }
 0x2ad   :  { %1498 = vpow2.f32 %v1410_v10 }
 0x2ae   :  { %v658_v15 = vpop.f32.mrf.mxu3  ;;  %v638_v11 = vpop.f32.mrf.mxu2 }
 0x2af   :  { %v664_v9 = vadd.f32 %v1408_v20, %v658_v15  ;;  %v663_v18 = vadd.f32 %v1407_v13, %v638_v11 }
 0x2b1   :  { %v1411_v8 = vmul.f32 -1.442695, %v664_v9 }
 0x2b2   :  { %v1497_v7 = vpop.eup %1496 }
 0x2b3   :  { %v1499_v6 = vpop.eup %1498  ;;  %v668_v5 = vadd.f32 1.0, %v1497_v7  ;;  %1500 = vpow2.f32 %v1411_v8 }
 0x2b4   :  { %v687_v4 = vadd.f32 1.0, %v1499_v6 }
 0x2b5   :  { %1502 = vrcp.f32 %v668_v5  ;;  %v680_v7 = vand.u32 2147483648, %v668_v5  ;;  %v678_v3 = vand.u32 2147483647, %v668_v5  ;;  %vm674_vm6 = vweird.f32 %v668_v5 }
 0x2b6   :  { %1504 = vrcp.f32 %v687_v4  ;;  %v699_v6 = vand.u32 2147483648, %v687_v4  ;;  %v697_v1 = vand.u32 2147483647, %v687_v4  ;;  %vm693_vm7 = vweird.f32 %v687_v4 }
 0x2b7   :  { %v681_v13 = vor.u32 1.1754944e-38, %v680_v7  ;;  %vm679_vm10 = vcmp.eq.f32.partialorder %v678_v3, 8.507059e+37 }
 0x2b8   :  { %vm698_vm11 = vcmp.eq.f32.partialorder %v697_v1, 8.507059e+37 }
 0x2b9   :  { %v1501_v14 = vpop.eup %1500 }
 0x2ba   :  { %v707_v16 = vadd.f32 1.0, %v1501_v14 }
 0x2bb   :  { %v1503_v17 = vpop.eup %1502 }
 0x2bc   :  { %v1505_v10 = vpop.eup %1504  ;;  %v670_v19 = vmul.f32 %v1503_v17, %v668_v5  ;;  %1506 = vrcp.f32 %v707_v16  ;;  %vm675_vm4 = vweird.f32 %v1503_v17  ;;  %vm713_vm13 = vweird.f32 %v707_v16 }
 0x2bd   :  { %v689_v9 = vmul.f32 %v1505_v10, %v687_v4  ;;  %1508 = vtanh.f32 %v663_v18  ;;  %vm694_vm5 = vweird.f32 %v1505_v10  ;;  %vm676_vm8 = vmor %vm674_vm6, %vm675_vm4 }
 0x2be   :  { %v671_v15 = vsub.f32 1.0, %v670_v19  ;;  %vm695_vm9 = vmor %vm693_vm7, %vm694_vm5  ;;  %v700_v19 = vor.u32 1.1754944e-38, %v699_v6  ;;  %v2852_v6 = vld [vmem:[#allocation15_spill] sm:$0xff] }
 0x2bf   :  { %v690_v20 = vsub.f32 1.0, %v689_v9 }
 0x2c0   :  { %v672_v8 = vmul.f32 %v1503_v17, %v671_v15 }
 0x2c1   :  { %v691_v2 = vmul.f32 %v1505_v10, %v690_v20 }
 0x2c2   :  { %v1507_v54 = vpop.eup %1506  ;;  %v673_v42 = vadd.f32 %v1503_v17, %v672_v8 }
 0x2c3   :  { %v692_v11 = vadd.f32 %v1505_v10, %v691_v2  ;;  %v709_v14 = vmul.f32 %v1507_v54, %v707_v16  ;;  %v1509_v18 = vpop.eup %1508  ;;  %vm714_vm12 = vweird.f32 %v1507_v54  ;;  %v719_v2 = vand.u32 2147483648, %v707_v16 }
 0x2c4   :  { %v677_v9 = vsel %vm676_vm8, %v1503_v17, %v673_v42  ;;  %v717_v42 = vand.u32 2147483647, %v707_v16  ;;  %vm715_vm14 = vmor %vm713_vm13, %vm714_vm12  ;;  %v2851_v16 = vld [vmem:[#allocation14_spill] sm:$0xff] }
 0x2c5   :  { %v682_v49 = vsel %vm679_vm10, %v681_v13, %v677_v9  ;;  %v696_v15 = vsel %vm695_vm9, %v1505_v10, %v692_v11  ;;  %v710_v59 = vsub.f32 1.0, %v709_v14  ;;  %v720_v17 = vor.u32 1.1754944e-38, %v719_v2  ;;  %v2853_v13 = vld [vmem:[#allocation16_spill] sm:$0xff]  ;;  %v2855_v14 = vld [vmem:[#allocation17_spill] sm:$0xff]  ;;  %v2857_v9 = vld [vmem:[#allocation19_spill] sm:$0xff] }
 0x2c6   :  { %v701_v20 = vsel %vm698_vm11, %v700_v19, %v696_v15  ;;  %v724_v61 = vmul.f32 %v1509_v18, %v682_v49  ;;  %vm718_vm15 = vcmp.eq.f32.partialorder %v717_v42, 8.507059e+37  ;;  %v2849_v49 = vld [vmem:[#allocation13_spill] sm:$0xff]  ;;  %v2854_v11 = vld [vmem:[#allocation32_spill] sm:$0xff]  ;;  %v2856_v19 = vld [vmem:[#allocation18_spill] sm:$0xff] }
 0x2c7   :  { %v723_v51 = vmul.f32 %v701_v20, %v2222_v12  ;;  %v711_v8 = vmul.f32 %v1507_v54, %v710_v59  ;;  %v2845_v12 = vld [vmem:[#allocation10_spill] sm:$0xff]  ;;  %v2848_v59 = vld [vmem:[#allocation12_spill] sm:$0xff]  ;;  %v2858_v18 = vld [vmem:[#allocation33_spill] sm:$0xff] }
 0x2c8   :  { %v2859_v15 = vld [vmem:[#allocation20_spill] sm:$0xff]  ;;  %v2860_v20 = vld [vmem:[#allocation21_spill] sm:$0xff]  ;;  %v2863_v2 = vld [vmem:[#allocation23_spill] sm:$0xff] }
 0x2c9   :  { %v2430_v5 = vadd.f32 %v724_v61, %v723_v51  ;;  %v712_v4 = vadd.f32 %v1507_v54, %v711_v8  ;;  %v2846_v51 = vld [vmem:[#allocation24_spill] sm:$0xff]  ;;  %v2847_v61 = vld [vmem:[#allocation11_spill] sm:$0xff]  ;;  %v2861_v8 = vld [vmem:[#allocation22_spill] sm:$0xff] }
 0x2ca   :  { %v2864_v42 = vld [vmem:[#allocation25_spill] sm:$0xff] }
 0x2cb   :  { %1510 = vtanh.f32 %v2430_v5  ;;  %v716_v3 = vsel %vm715_vm14, %v1507_v54, %v712_v4  ;;  %v2850_v54 = vld [vmem:[#allocation28_spill] sm:$0xff]  ;;  %v2862_v4 = vld [vmem:[#allocation34_spill] sm:$0xff] }
 0x2cc   :  { %v721_v10 = vsel %vm718_vm15, %v720_v17, %v716_v3  ;;  %v2865_v3 = vld [vmem:[#allocation26_spill] sm:$0xff]  ;;  %v2866_v17 = vld [vmem:[#allocation35_spill] sm:$0xff] }
 0x2d1   :  { %v1511_v1 = vpop.eup %1510 }
 0x2d2   :  { %v727_v7 = vmul.f32 %v1511_v1, %v721_v10  ;;  %v2867_v1 = vld [vmem:[#allocation27_spill] sm:$0xff]  ;;  %v2868_v10 = vld [vmem:[#allocation29_spill] sm:$0xff] }
 0x2d4   :  { %749 = vmatmul.f32.vlgmr.msra.gmra.mxu0 %v727_v7  ;;  %769 = vmatmul.f32.vlgmr.msra.gmra.mxu1 %v727_v7 }
 0x2d5   :  { %789 = vmatmul.f32.vlgmr.msra.gmra.mxu2 %v727_v7  ;;  %809 = vmatmul.f32.vlgmr.msra.gmra.mxu3 %v727_v7  ;;  %v2869_v7 = vld [vmem:[#allocation30_spill] sm:$0xff] }
 0x2d6   :  { %1037 = vmatpush.msra.mxu0 %v2225_v50  ;;  %1057 = vmatpush.msra.mxu1 %v2228_v21 }
 0x2d7   :  { %1077 = vmatpush.msra.mxu2 %v2231_v22  ;;  %1097 = vmatpush.msra.mxu3 %v2234_v23 }
 0x2d8   :  { %1038 = vmatpush.msra.mxu0 %v2237_v24  ;;  %1058 = vmatpush.msra.mxu1 %v2240_v25 }
 0x2d9   :  { %1078 = vmatpush.msra.mxu2 %v2243_v26  ;;  %1098 = vmatpush.msra.mxu3 %v2246_v27 }
 0x2da   :  { %1039 = vmatpush.msra.mxu0 %v2249_v28  ;;  %1059 = vmatpush.msra.mxu1 %v2252_v29 }
 0x2db   :  { %1079 = vmatpush.msra.mxu2 %v2255_v30  ;;  %1099 = vmatpush.msra.mxu3 %v2258_v31 }
 0x2dc   :  { %1040 = vmatpush.msra.mxu0 %v2261_v32  ;;  %1060 = vmatpush.msra.mxu1 %v2264_v33 }
 0x2dd   :  { %1080 = vmatpush.msra.mxu2 %v2267_v35  ;;  %1100 = vmatpush.msra.mxu3 %v2270_v39 }
 0x2de   :  { %1041 = vmatpush.msra.mxu0 %v2273_v43  ;;  %1061 = vmatpush.msra.mxu1 %v2276_v47 }
 0x2df   :  { %1081 = vmatpush.msra.mxu2 %v2279_v60  ;;  %1101 = vmatpush.msra.mxu3 %v2282_v63 }
 0x2e0   :  { %1042 = vmatpush.msra.mxu0 %v2285_v34  ;;  %1062 = vmatpush.msra.mxu1 %v2288_v36 }
 0x2e1   :  { %1082 = vmatpush.msra.mxu2 %v2291_v37  ;;  %1102 = vmatpush.msra.mxu3 %v2294_v40 }
 0x2e2   :  { %1043 = vmatpush.msra.mxu0 %v2297_v56  ;;  %1063 = vmatpush.msra.mxu1 %v2300_v44 }
 0x2e3   :  { %1083 = vmatpush.msra.mxu2 %v2303_v53  ;;  %1103 = vmatpush.msra.mxu3 %v2306_v46 }
 0x2e4   :  { %1044 = vmatpush.msra.mxu0 %v2309_v62  ;;  %1064 = vmatpush.msra.mxu1 %v2312_v45 }
 0x2e5   :  { %1084 = vmatpush.msra.mxu2 %v2315_v57  ;;  %1104 = vmatpush.msra.mxu3 %v2318_v0 }
 0x2e6   :  { %1045 = vmatpush.msra.mxu0 %v2321_v38  ;;  %1065 = vmatpush.msra.mxu1 %v2324_v55 }
 0x2e7   :  { %1085 = vmatpush.msra.mxu2 %v2327_v41  ;;  %1105 = vmatpush.msra.mxu3 %v2330_v58 }
 0x2e8   :  { %1046 = vmatpush.msra.mxu0 %v2333_v52  ;;  %1066 = vmatpush.msra.mxu1 %v2336_v48 }
 0x2e9   :  { %1086 = vmatpush.msra.mxu2 %v2845_v12  ;;  %1106 = vmatpush.msra.mxu3 %v2846_v51 }
 0x2ea   :  { %1047 = vmatpush.msra.mxu0 %v2847_v61  ;;  %1067 = vmatpush.msra.mxu1 %v2848_v59 }
 0x2eb   :  { %1087 = vmatpush.msra.mxu2 %v2849_v49  ;;  %1107 = vmatpush.msra.mxu3 %v2850_v54 }
 0x2ec   :  { %1048 = vmatpush.msra.mxu0 %v2851_v16  ;;  %1068 = vmatpush.msra.mxu1 %v2852_v6 }
 0x2ed   :  { %1088 = vmatpush.msra.mxu2 %v2853_v13  ;;  %1108 = vmatpush.msra.mxu3 %v2854_v11 }
 0x2ee   :  { %1049 = vmatpush.msra.mxu0 %v2855_v14  ;;  %1069 = vmatpush.msra.mxu1 %v2856_v19 }
 0x2ef   :  { %1089 = vmatpush.msra.mxu2 %v2857_v9  ;;  %1109 = vmatpush.msra.mxu3 %v2858_v18 }
 0x2f0   :  { %1050 = vmatpush.msra.mxu0 %v2859_v15  ;;  %1070 = vmatpush.msra.mxu1 %v2860_v20  ;;  %v2870_v15 = vld [vmem:[#allocation36_spill] sm:$0xff] }
 0x2f1   :  { %1090 = vmatpush.msra.mxu2 %v2861_v8  ;;  %1110 = vmatpush.msra.mxu3 %v2862_v4  ;;  %v1412_v4 = vld [vmem:[%s2628_s0 + $0x80] sm:$0xff] }
 0x2f2   :  { %1051 = vmatpush.msra.mxu0 %v2863_v2  ;;  %1071 = vmatpush.msra.mxu1 %v2864_v42  ;;  %v1413_v42 = vld [vmem:[%s2628_s0 + $0x88] sm:$0xff] }
 0x2f3   :  { %1091 = vmatpush.msra.mxu2 %v2865_v3  ;;  %1111 = vmatpush.msra.mxu3 %v2866_v17 }
 0x2f4   :  { %1052 = vmatpush.msra.mxu0 %v2867_v1  ;;  %1072 = vmatpush.msra.mxu1 %v2868_v10 }
 0x2f5   :  { %1092 = vmatpush.msra.mxu2 %v2869_v7  ;;  %1112 = vmatpush.msra.mxu3 %v2870_v15  ;;  %v1415_v7 = vld [vmem:[%s2628_s0 + $0x98] sm:$0xff] }
 0x351   :  { %v750_v2 = vpop.f32.mrf.mxu0  ;;  %v770_v3 = vpop.f32.mrf.mxu1 }
 0x352   :  { %v813_v8 = vadd.f32 %v1412_v4, %v750_v2  ;;  %v814_v17 = vadd.f32 %v1413_v42, %v770_v3 }
 0x354   :  { %v1416_v20 = vmul.f32 -1.442695, %v813_v8  ;;  %v1417_v1 = vmul.f32 -1.442695, %v814_v17  ;;  %v1414_v8 = vld [vmem:[%s2628_s0 + $0x90] sm:$0xff] }
 0x356   :  { %1512 = vpow2.f32 %v1416_v20 }
 0x357   :  { %1514 = vpow2.f32 %v1417_v1 }
 0x358   :  { %v810_v15 = vpop.f32.mrf.mxu3  ;;  %v790_v20 = vpop.f32.mrf.mxu2 }
 0x359   :  { %v816_v10 = vadd.f32 %v1415_v7, %v810_v15  ;;  %v815_v3 = vadd.f32 %v1414_v8, %v790_v20 }
 0x35b   :  { %v1418_v18 = vmul.f32 -1.442695, %v816_v10 }
 0x35c   :  { %v1513_v9 = vpop.eup %1512 }
 0x35d   :  { %v1515_v19 = vpop.eup %1514  ;;  %v820_v14 = vadd.f32 1.0, %v1513_v9  ;;  %1516 = vpow2.f32 %v1418_v18 }
 0x35e   :  { %v839_v11 = vadd.f32 1.0, %v1515_v19 }
 0x35f   :  { %1518 = vrcp.f32 %v820_v14  ;;  %v832_v9 = vand.u32 2147483648, %v820_v14  ;;  %v830_v13 = vand.u32 2147483647, %v820_v14  ;;  %vm826_vm2 = vweird.f32 %v820_v14 }
 0x360   :  { %1520 = vrcp.f32 %v839_v11  ;;  %v851_v19 = vand.u32 2147483648, %v839_v11  ;;  %v849_v16 = vand.u32 2147483647, %v839_v11  ;;  %vm845_vm3 = vweird.f32 %v839_v11 }
 0x361   :  { %v833_v8 = vor.u32 1.1754944e-38, %v832_v9  ;;  %vm831_vm6 = vcmp.eq.f32.partialorder %v830_v13, 8.507059e+37 }
 0x362   :  { %vm850_vm7 = vcmp.eq.f32.partialorder %v849_v16, 8.507059e+37 }
 0x363   :  { %v1517_v4 = vpop.eup %1516 }
 0x364   :  { %v859_v2 = vadd.f32 1.0, %v1517_v4 }
 0x365   :  { %v1519_v42 = vpop.eup %1518 }
 0x366   :  { %v1521_v17 = vpop.eup %1520  ;;  %v822_v1 = vmul.f32 %v1519_v42, %v820_v14  ;;  %1522 = vrcp.f32 %v859_v2  ;;  %vm827_vm0 = vweird.f32 %v1519_v42  ;;  %vm865_vm9 = vweird.f32 %v859_v2 }
 0x367   :  { %v841_v15 = vmul.f32 %v1521_v17, %v839_v11  ;;  %1524 = vtanh.f32 %v815_v3  ;;  %vm846_vm1 = vweird.f32 %v1521_v17  ;;  %vm828_vm4 = vmor %vm826_vm2, %vm827_vm0 }
 0x368   :  { %v823_v10 = vsub.f32 1.0, %v822_v1  ;;  %vm847_vm5 = vmor %vm845_vm3, %vm846_vm1  ;;  %v852_v1 = vor.u32 1.1754944e-38, %v851_v19 }
 0x369   :  { %v842_v7 = vsub.f32 1.0, %v841_v15 }
 0x36a   :  { %v824_v18 = vmul.f32 %v1519_v42, %v823_v10 }
 0x36b   :  { %v843_v6 = vmul.f32 %v1521_v17, %v842_v7 }
 0x36c   :  { %v1523_v54 = vpop.eup %1522  ;;  %v825_v49 = vadd.f32 %v1519_v42, %v824_v18 }
 0x36d   :  { %v844_v20 = vadd.f32 %v1521_v17, %v843_v6  ;;  %v861_v4 = vmul.f32 %v1523_v54, %v859_v2  ;;  %v1525_v3 = vpop.eup %1524  ;;  %vm866_vm8 = vweird.f32 %v1523_v54  ;;  %v871_v6 = vand.u32 2147483648, %v859_v2 }
 0x36e   :  { %v829_v15 = vsel %vm828_vm4, %v1519_v42, %v825_v49  ;;  %v869_v49 = vand.u32 2147483647, %v859_v2  ;;  %vm867_vm10 = vmor %vm865_vm9, %vm866_vm8 }
 0x36f   :  { %v834_v59 = vsel %vm831_vm6, %v833_v8, %v829_v15  ;;  %v848_v10 = vsel %vm847_vm5, %v1521_v17, %v844_v20  ;;  %v862_v61 = vsub.f32 1.0, %v861_v4  ;;  %v872_v42 = vor.u32 1.1754944e-38, %v871_v6 }
 0x370   :  { %v853_v7 = vsel %vm850_vm7, %v852_v1, %v848_v10  ;;  %v876_v51 = vmul.f32 %v1525_v3, %v834_v59  ;;  %vm870_vm11 = vcmp.eq.f32.partialorder %v869_v49, 8.507059e+37  ;;  %v1421_v59 = vld [vmem:[%s2628_s0 + $0xb0] sm:$0xff] }
 0x371   :  { %v875_v12 = vmul.f32 %v853_v7, %v2430_v5  ;;  %v863_v18 = vmul.f32 %v1523_v54, %v862_v61 }
 0x373   :  { %v2510_v14 = vadd.f32 %v876_v51, %v875_v12  ;;  %v864_v11 = vadd.f32 %v1523_v54, %v863_v18 }
 0x375   :  { %1526 = vtanh.f32 %v2510_v14  ;;  %v868_v13 = vsel %vm867_vm10, %v1523_v54, %v864_v11 }
 0x376   :  { %v873_v17 = vsel %vm870_vm11, %v872_v42, %v868_v13 }
 0x37b   :  { %v1527_v16 = vpop.eup %1526 }
 0x37c   :  { %v879_v9 = vmul.f32 %v1527_v16, %v873_v17 }
 0x37e   :  { %901 = vmatmul.f32.vlgmr.msrb.gmra.mxu0 %v879_v9  ;;  %921 = vmatmul.f32.vlgmr.msrb.gmra.mxu1 %v879_v9 }
 0x37f   :  { %941 = vmatmul.f32.vlgmr.msrb.gmra.mxu2 %v879_v9  ;;  %961 = vmatmul.f32.vlgmr.msrb.gmra.mxu3 %v879_v9 }
 0x380   :  { %1189 = vmatpush.msrb.mxu0 %v2225_v50  ;;  %1209 = vmatpush.msrb.mxu1 %v2228_v21  ;;  %v2871_v50 = vld [vmem:[#allocation10_spill] sm:$0xff]  ;;  %v2872_v21 = vld [vmem:[#allocation24_spill] sm:$0xff] }
 0x381   :  { %1229 = vmatpush.msrb.mxu2 %v2231_v22  ;;  %1249 = vmatpush.msrb.mxu3 %v2234_v23  ;;  %v2873_v22 = vld [vmem:[#allocation11_spill] sm:$0xff]  ;;  %v2874_v23 = vld [vmem:[#allocation12_spill] sm:$0xff] }
 0x382   :  { %1190 = vmatpush.msrb.mxu0 %v2237_v24  ;;  %1210 = vmatpush.msrb.mxu1 %v2240_v25  ;;  %v2875_v24 = vld [vmem:[#allocation13_spill] sm:$0xff]  ;;  %v2876_v25 = vld [vmem:[#allocation28_spill] sm:$0xff] }
 0x383   :  { %1230 = vmatpush.msrb.mxu2 %v2243_v26  ;;  %1250 = vmatpush.msrb.mxu3 %v2246_v27  ;;  %v2877_v26 = vld [vmem:[#allocation14_spill] sm:$0xff]  ;;  %v2878_v27 = vld [vmem:[#allocation15_spill] sm:$0xff] }
 0x384   :  { %1191 = vmatpush.msrb.mxu0 %v2249_v28  ;;  %1211 = vmatpush.msrb.mxu1 %v2252_v29  ;;  %v2879_v28 = vld [vmem:[#allocation16_spill] sm:$0xff] }
 0x385   :  { %1231 = vmatpush.msrb.mxu2 %v2255_v30  ;;  %1251 = vmatpush.msrb.mxu3 %v2258_v31  ;;  %v2880_v29 = vld [vmem:[#allocation32_spill] sm:$0xff]  ;;  %v2881_v30 = vld [vmem:[#allocation17_spill] sm:$0xff]  ;;  %v2882_v31 = vld [vmem:[#allocation18_spill] sm:$0xff] }
 0x386   :  { %1192 = vmatpush.msrb.mxu0 %v2261_v32  ;;  %1212 = vmatpush.msrb.mxu1 %v2264_v33  ;;  %v2883_v32 = vld [vmem:[#allocation19_spill] sm:$0xff]  ;;  %v2884_v33 = vld [vmem:[#allocation33_spill] sm:$0xff] }
 0x387   :  { %1232 = vmatpush.msrb.mxu2 %v2267_v35  ;;  %1252 = vmatpush.msrb.mxu3 %v2270_v39  ;;  %v2885_v35 = vld [vmem:[#allocation20_spill] sm:$0xff]  ;;  %v2886_v39 = vld [vmem:[#allocation21_spill] sm:$0xff] }
 0x388   :  { %1193 = vmatpush.msrb.mxu0 %v2273_v43  ;;  %1213 = vmatpush.msrb.mxu1 %v2276_v47  ;;  %v2887_v43 = vld [vmem:[#allocation22_spill] sm:$0xff] }
 0x389   :  { %1233 = vmatpush.msrb.mxu2 %v2279_v60  ;;  %1253 = vmatpush.msrb.mxu3 %v2282_v63  ;;  %v2888_v47 = vld [vmem:[#allocation34_spill] sm:$0xff]  ;;  %v2889_v60 = vld [vmem:[#allocation23_spill] sm:$0xff]  ;;  %v2890_v63 = vld [vmem:[#allocation25_spill] sm:$0xff] }
 0x38a   :  { %1194 = vmatpush.msrb.mxu0 %v2285_v34  ;;  %1214 = vmatpush.msrb.mxu1 %v2288_v36  ;;  %v2891_v34 = vld [vmem:[#allocation26_spill] sm:$0xff]  ;;  %v2892_v36 = vld [vmem:[#allocation35_spill] sm:$0xff] }
 0x38b   :  { %1234 = vmatpush.msrb.mxu2 %v2291_v37  ;;  %1254 = vmatpush.msrb.mxu3 %v2294_v40  ;;  %v2893_v37 = vld [vmem:[#allocation27_spill] sm:$0xff]  ;;  %v2894_v40 = vld [vmem:[#allocation29_spill] sm:$0xff] }
 0x38c   :  { %1195 = vmatpush.msrb.mxu0 %v2297_v56  ;;  %1215 = vmatpush.msrb.mxu1 %v2300_v44  ;;  %v2895_v56 = vld [vmem:[#allocation30_spill] sm:$0xff]  ;;  %v2896_v44 = vld [vmem:[#allocation36_spill] sm:$0xff] }
 0x38d   :  { %1235 = vmatpush.msrb.mxu2 %v2303_v53  ;;  %1255 = vmatpush.msrb.mxu3 %v2306_v46  ;;  %v1419_v53 = vld [vmem:[%s2628_s0 + $0xa0] sm:$0xff]  ;;  %v1420_v46 = vld [vmem:[%s2628_s0 + $0xa8] sm:$0xff] }
 0x38e   :  { %1196 = vmatpush.msrb.mxu0 %v2309_v62  ;;  %1216 = vmatpush.msrb.mxu1 %v2312_v45 }
 0x38f   :  { %1236 = vmatpush.msrb.mxu2 %v2315_v57  ;;  %1256 = vmatpush.msrb.mxu3 %v2318_v0 }
 0x390   :  { %1197 = vmatpush.msrb.mxu0 %v2321_v38  ;;  %1217 = vmatpush.msrb.mxu1 %v2324_v55 }
 0x391   :  { %1237 = vmatpush.msrb.mxu2 %v2327_v41  ;;  %1257 = vmatpush.msrb.mxu3 %v2330_v58  ;;  %v1422_v41 = vld [vmem:[%s2628_s0 + $0xb8] sm:$0xff] }
 0x392   :  { %1198 = vmatpush.msrb.mxu0 %v2333_v52  ;;  %1218 = vmatpush.msrb.mxu1 %v2336_v48 }
 0x393   :  { %1238 = vmatpush.msrb.mxu2 %v2871_v50  ;;  %1258 = vmatpush.msrb.mxu3 %v2872_v21 }
 0x394   :  { %1199 = vmatpush.msrb.mxu0 %v2873_v22  ;;  %1219 = vmatpush.msrb.mxu1 %v2874_v23 }
 0x395   :  { %1239 = vmatpush.msrb.mxu2 %v2875_v24  ;;  %1259 = vmatpush.msrb.mxu3 %v2876_v25 }
 0x396   :  { %1200 = vmatpush.msrb.mxu0 %v2877_v26  ;;  %1220 = vmatpush.msrb.mxu1 %v2878_v27 }
 0x397   :  { %1240 = vmatpush.msrb.mxu2 %v2879_v28  ;;  %1260 = vmatpush.msrb.mxu3 %v2880_v29 }
 0x398   :  { %1201 = vmatpush.msrb.mxu0 %v2881_v30  ;;  %1221 = vmatpush.msrb.mxu1 %v2882_v31 }
 0x399   :  { %1241 = vmatpush.msrb.mxu2 %v2883_v32  ;;  %1261 = vmatpush.msrb.mxu3 %v2884_v33 }
 0x39a   :  { %1202 = vmatpush.msrb.mxu0 %v2885_v35  ;;  %1222 = vmatpush.msrb.mxu1 %v2886_v39 }
 0x39b   :  { %1242 = vmatpush.msrb.mxu2 %v2887_v43  ;;  %1262 = vmatpush.msrb.mxu3 %v2888_v47 }
 0x39c   :  { %1203 = vmatpush.msrb.mxu0 %v2889_v60  ;;  %1223 = vmatpush.msrb.mxu1 %v2890_v63 }
 0x39d   :  { %1243 = vmatpush.msrb.mxu2 %v2891_v34  ;;  %1263 = vmatpush.msrb.mxu3 %v2892_v36  ;;  %v1427_v34 = vld [vmem:[%s2628_s0 + $0xc8] sm:$0xff] }
 0x39e   :  { %1204 = vmatpush.msrb.mxu0 %v2893_v37  ;;  %1224 = vmatpush.msrb.mxu1 %v2894_v40 }
 0x39f   :  { %1244 = vmatpush.msrb.mxu2 %v2895_v56  ;;  %1264 = vmatpush.msrb.mxu3 %v2896_v44 }
 0x3fb   :  { %v902_v62 = vpop.f32.mrf.mxu0  ;;  %v922_v45 = vpop.f32.mrf.mxu1 }
 0x3fc   :  { %v965_v57 = vadd.f32 %v1419_v53, %v902_v62  ;;  %v966_v0 = vadd.f32 %v1420_v46, %v922_v45  ;;  %v1429_v46 = vld [vmem:[%s2628_s0 + $0xd8] sm:$0xff] }
 0x3fe   :  { %v1423_v38 = vmul.f32 -1.442695, %v965_v57  ;;  %v1424_v55 = vmul.f32 -1.442695, %v966_v0 }
 0x400   :  { %1528 = vpow2.f32 %v1423_v38 }
 0x401   :  { %1530 = vpow2.f32 %v1424_v55 }
 0x402   :  { %v962_v58 = vpop.f32.mrf.mxu3  ;;  %v942_v54 = vpop.f32.mrf.mxu2 }
 0x403   :  { %v968_v52 = vadd.f32 %v1422_v41, %v962_v58  ;;  %v967_v20 = vadd.f32 %v1421_v59, %v942_v54  ;;  %v1428_v58 = vld [vmem:[%s2628_s0 + $0xd0] sm:$0xff] }
 0x405   :  { %v1425_v48 = vmul.f32 -1.442695, %v968_v52 }
 0x406   :  { %v1529_v5 = vpop.eup %1528 }
 0x407   :  { %v1531_v12 = vpop.eup %1530  ;;  %v972_v51 = vadd.f32 1.0, %v1529_v5  ;;  %1532 = vpow2.f32 %v1425_v48 }
 0x408   :  { %v991_v61 = vadd.f32 1.0, %v1531_v12 }
 0x409   :  { %1534 = vrcp.f32 %v972_v51  ;;  %v984_v7 = vand.u32 2147483648, %v972_v51  ;;  %v982_v6 = vand.u32 2147483647, %v972_v51  ;;  %vm978_vm14 = vweird.f32 %v972_v51 }
 0x40a   :  { %1536 = vrcp.f32 %v991_v61  ;;  %v1003_v18 = vand.u32 2147483648, %v991_v61  ;;  %v1001_v13 = vand.u32 2147483647, %v991_v61  ;;  %vm997_vm15 = vweird.f32 %v991_v61 }
 0x40b   :  { %v985_v17 = vor.u32 1.1754944e-38, %v984_v7  ;;  %vm983_vm2 = vcmp.eq.f32.partialorder %v982_v6, 8.507059e+37 }
 0x40c   :  { %v1004_v21 = vor.u32 1.1754944e-38, %v1003_v18  ;;  %vm1002_vm3 = vcmp.eq.f32.partialorder %v1001_v13, 8.507059e+37 }
 0x40d   :  { %v1533_v2 = vpop.eup %1532 }
 0x40e   :  { %v1011_v19 = vadd.f32 1.0, %v1533_v2 }
 0x40f   :  { %v1535_v8 = vpop.eup %1534 }
 0x410   :  { %v1537_v4 = vpop.eup %1536  ;;  %v974_v1 = vmul.f32 %v1535_v8, %v972_v51  ;;  %1538 = vrcp.f32 %v1011_v19  ;;  %vm979_vm12 = vweird.f32 %v1535_v8  ;;  %v1023_v33 = vand.u32 2147483648, %v1011_v19 }
 0x411   :  { %v993_v15 = vmul.f32 %v1537_v4, %v991_v61  ;;  %1540 = vtanh.f32 %v967_v20  ;;  %vm998_vm13 = vweird.f32 %v1537_v4  ;;  %vm980_vm0 = vmor %vm978_vm14, %vm979_vm12  ;;  %vm1017_vm5 = vweird.f32 %v1011_v19 }
 0x412   :  { %v975_v3 = vsub.f32 1.0, %v974_v1  ;;  %vm999_vm1 = vmor %vm997_vm15, %vm998_vm13  ;;  %v1021_v35 = vand.u32 2147483647, %v1011_v19  ;;  %v1024_v43 = vor.u32 1.1754944e-38, %v1023_v33 }
 0x413   :  { %v994_v10 = vsub.f32 1.0, %v993_v15 }
 0x414   :  { %v976_v11 = vmul.f32 %v1535_v8, %v975_v3  ;;  %vm1022_vm7 = vcmp.eq.f32.partialorder %v1021_v35, 8.507059e+37  ;;  %v1355_v35 = vld [vmem:[#allocation6 + $0x70] sm:$0xff] }
 0x415   :  { %v995_v49 = vmul.f32 %v1537_v4, %v994_v10 }
 0x416   :  { %v1539_v42 = vpop.eup %1538  ;;  %v977_v16 = vadd.f32 %v1535_v8, %v976_v11 }
 0x417   :  { %v996_v9 = vadd.f32 %v1537_v4, %v995_v49  ;;  %v1013_v50 = vmul.f32 %v1539_v42, %v1011_v19  ;;  %v1541_v23 = vpop.eup %1540  ;;  %vm1018_vm4 = vweird.f32 %v1539_v42 }
 0x418   :  { %v981_v22 = vsel %vm980_vm0, %v1535_v8, %v977_v16  ;;  %vm1019_vm6 = vmor %vm1017_vm5, %vm1018_vm4 }
 0x419   :  { %v986_v24 = vsel %vm983_vm2, %v985_v17, %v981_v22  ;;  %v1000_v25 = vsel %vm999_vm1, %v1537_v4, %v996_v9  ;;  %v1014_v26 = vsub.f32 1.0, %v1013_v50 }
 0x41a   :  { %v1005_v27 = vsel %vm1002_vm3, %v1004_v21, %v1000_v25  ;;  %v1028_v28 = vmul.f32 %v1541_v23, %v986_v24 }
 0x41b   :  { %v1027_v29 = vmul.f32 %v1005_v27, %v2510_v14  ;;  %v1015_v30 = vmul.f32 %v1539_v42, %v1014_v26  ;;  %v1426_v14 = vld [vmem:[%s2628_s0 + $0xc0] sm:$0xff] }
 0x41d   :  { %v2590_v31 = vadd.f32 %v1028_v28, %v1027_v29  ;;  %v1016_v32 = vadd.f32 %v1539_v42, %v1015_v30 }
 0x41f   :  { %1542 = vtanh.f32 %v2590_v31  ;;  %v1020_v39 = vsel %vm1019_vm6, %v1539_v42, %v1016_v32 }
 0x420   :  { %v1025_v60 = vsel %vm1022_vm7, %v1024_v43, %v1020_v39  ;;  %v1354_v39 = vld [vmem:[#allocation6 + $0x68] sm:$0xff]  ;;  %v1353_v43 = vld [vmem:[#allocation6 + $0x60] sm:$0xff] }
 0x425   :  { %v1543_v47 = vpop.eup %1542 }
 0x426   :  { %v1031_v63 = vmul.f32 %v1543_v47, %v1025_v60  ;;  %v1352_v47 = vld [vmem:[#allocation6 + $0x58] sm:$0xff]  ;;  %v1351_v60 = vld [vmem:[#allocation6 + $0x50] sm:$0xff] }
 0x428   :  { %1053 = vmatmul.f32.vlgmr.msra.gmra.mxu0 %v1031_v63  ;;  %1073 = vmatmul.f32.vlgmr.msra.gmra.mxu1 %v1031_v63 }
 0x429   :  { %1093 = vmatmul.f32.vlgmr.msra.gmra.mxu2 %v1031_v63  ;;  %1113 = vmatmul.f32.vlgmr.msra.gmra.mxu3 %v1031_v63  ;;  %v1350_v63 = vld [vmem:[#allocation6 + $0x48] sm:$0xff] }
 0x4a5   :  { %v1054_v36 = vpop.f32.mrf.mxu0  ;;  %v1074_v37 = vpop.f32.mrf.mxu1 }
 0x4a6   :  { %v1117_v40 = vadd.f32 %v1426_v14, %v1054_v36  ;;  %v1118_v56 = vadd.f32 %v1427_v34, %v1074_v37  ;;  %v1349_v14 = vld [vmem:[#allocation6 + $0x40] sm:$0xff]  ;;  %v1348_v34 = vld [vmem:[#allocation6 + $0x38] sm:$0xff]  ;;  %v1434_v37 = vld [vmem:[%s2628_s0 + $0xe8] sm:$0xff] }
 0x4a7   :  { %v1433_v36 = vld [vmem:[%s2628_s0 + $0xe0] sm:$0xff] }
 0x4a8   :  { %v1430_v44 = vmul.f32 -1.442695, %v1117_v40  ;;  %v1431_v53 = vmul.f32 -1.442695, %v1118_v56  ;;  %v1347_v40 = vld [vmem:[#allocation6 + $0x30] sm:$0xff] }
 0x4aa   :  { %1544 = vpow2.f32 %v1430_v44 }
 0x4ab   :  { %1546 = vpow2.f32 %v1431_v53 }
 0x4ac   :  { %v1114_v62 = vpop.f32.mrf.mxu3  ;;  %v1094_v52 = vpop.f32.mrf.mxu2 }
 0x4ad   :  { %v1120_v45 = vadd.f32 %v1429_v46, %v1114_v62  ;;  %v1119_v51 = vadd.f32 %v1428_v58, %v1094_v52  ;;  %v1346_v62 = vld [vmem:[#allocation6 + $0x28] sm:$0xff] }
 0x4ae   :  { %v1342_v52 = vld [vmem:[#allocation6 + $0x8] sm:$0xff] }
 0x4af   :  { %v1432_v57 = vmul.f32 -1.442695, %v1120_v45 }
 0x4b0   :  { %v1545_v0 = vpop.eup %1544 }
 0x4b1   :  { %v1547_v38 = vpop.eup %1546  ;;  %v1124_v55 = vadd.f32 1.0, %v1545_v0  ;;  %1548 = vpow2.f32 %v1432_v57  ;;  %v1345_v0 = vld [vmem:[#allocation6 + $0x20] sm:$0xff] }
 0x4b2   :  { %v1143_v41 = vadd.f32 1.0, %v1547_v38  ;;  %v1344_v38 = vld [vmem:[#allocation6 + $0x18] sm:$0xff] }
 0x4b3   :  { %1550 = vrcp.f32 %v1124_v55  ;;  %v1136_v8 = vand.u32 2147483648, %v1124_v55  ;;  %v1134_v1 = vand.u32 2147483647, %v1124_v55  ;;  %vm1130_vm10 = vweird.f32 %v1124_v55 }
 0x4b4   :  { %1552 = vrcp.f32 %v1143_v41  ;;  %v1155_v20 = vand.u32 2147483648, %v1143_v41  ;;  %v1153_v3 = vand.u32 2147483647, %v1143_v41  ;;  %vm1149_vm11 = vweird.f32 %v1143_v41 }
 0x4b5   :  { %v1137_v18 = vor.u32 1.1754944e-38, %v1136_v8  ;;  %vm1135_vm14 = vcmp.eq.f32.partialorder %v1134_v1, 8.507059e+37 }
 0x4b6   :  { %v1156_v49 = vor.u32 1.1754944e-38, %v1155_v20  ;;  %vm1154_vm15 = vcmp.eq.f32.partialorder %v1153_v3, 8.507059e+37 }
 0x4b7   :  { %v1549_v48 = vpop.eup %1548 }
 0x4b8   :  { %v1163_v5 = vadd.f32 1.0, %v1549_v48 }
 0x4b9   :  { %v1551_v12 = vpop.eup %1550 }
 0x4ba   :  { %v1553_v61 = vpop.eup %1552  ;;  %v1126_v59 = vmul.f32 %v1551_v12, %v1124_v55  ;;  %1554 = vrcp.f32 %v1163_v5  ;;  %vm1131_vm8 = vweird.f32 %v1551_v12  ;;  %v1175_v26 = vand.u32 2147483648, %v1163_v5  ;;  %v1436_v55 = vld [vmem:[%s2628_s0 + $0xf8] sm:$0xff] }
 0x4bb   :  { %v1145_v54 = vmul.f32 %v1553_v61, %v1143_v41  ;;  %1556 = vtanh.f32 %v1119_v51  ;;  %vm1150_vm9 = vweird.f32 %v1553_v61  ;;  %vm1132_vm12 = vmor %vm1130_vm10, %vm1131_vm8  ;;  %vm1169_vm1 = vweird.f32 %v1163_v5  ;;  %v1343_v41 = vld [vmem:[#allocation6 + $0x10] sm:$0xff] }
 0x4bc   :  { %v1127_v2 = vsub.f32 1.0, %v1126_v59  ;;  %vm1151_vm13 = vmor %vm1149_vm11, %vm1150_vm9  ;;  %v1173_v27 = vand.u32 2147483647, %v1163_v5  ;;  %v1176_v29 = vor.u32 1.1754944e-38, %v1175_v26 }
 0x4bd   :  { %v1146_v19 = vsub.f32 1.0, %v1145_v54 }
 0x4be   :  { %v1128_v4 = vmul.f32 %v1551_v12, %v1127_v2  ;;  %vm1174_vm3 = vcmp.eq.f32.partialorder %v1173_v27, 8.507059e+37  ;;  %v1435_v2 = vld [vmem:[%s2628_s0 + $0xf0] sm:$0xff] }
 0x4bf   :  { %v1147_v15 = vmul.f32 %v1553_v61, %v1146_v19 }
 0x4c0   :  { %v1555_v10 = vpop.eup %1554  ;;  %v1129_v7 = vadd.f32 %v1551_v12, %v1128_v4 }
 0x4c1   :  { %v1148_v11 = vadd.f32 %v1553_v61, %v1147_v15  ;;  %v1165_v6 = vmul.f32 %v1555_v10, %v1163_v5  ;;  %v1557_v42 = vpop.eup %1556  ;;  %vm1170_vm0 = vweird.f32 %v1555_v10  ;;  %v1341_v5 = vld [vmem:[#allocation6] sm:$0xff] }
 0x4c2   :  { %v1133_v13 = vsel %vm1132_vm12, %v1551_v12, %v1129_v7  ;;  %vm1171_vm2 = vmor %vm1169_vm1, %vm1170_vm0 }
 0x4c3   :  { %v1138_v16 = vsel %vm1135_vm14, %v1137_v18, %v1133_v13  ;;  %v1152_v17 = vsel %vm1151_vm13, %v1553_v61, %v1148_v11  ;;  %v1166_v9 = vsub.f32 1.0, %v1165_v6 }
 0x4c4   :  { %v1157_v50 = vsel %vm1154_vm15, %v1156_v49, %v1152_v17  ;;  %v1180_v21 = vmul.f32 %v1557_v42, %v1138_v16 }
 0x4c5   :  { %v1179_v22 = vmul.f32 %v1157_v50, %v2590_v31  ;;  %v1167_v23 = vmul.f32 %v1555_v10, %v1166_v9  ;;  %v1356_v31 = vld [vmem:[#allocation6 + $0x78] sm:$0xff] }
 0x4c6   :  { %1361 = vmatpush.msra.mxu0 %v1356_v31 }
 0x4c7   :  { %v2606_v24 = vadd.f32 %v1180_v21, %v1179_v22  ;;  %v1168_v25 = vadd.f32 %v1555_v10, %v1167_v23 }
 0x4c8   :  { %1362 = vmatpush.msra.mxu0 %v1355_v35 }
 0x4c9   :  { %1558 = vtanh.f32 %v2606_v24  ;;  %v1172_v28 = vsel %vm1171_vm2, %v1555_v10, %v1168_v25 }
 0x4ca   :  { %v1177_v32 = vsel %vm1174_vm3, %v1176_v29, %v1172_v28  ;;  %1363 = vmatpush.msra.mxu0 %v1354_v39 }
 0x4cc   :  { %1364 = vmatpush.msra.mxu0 %v1353_v43 }
 0x4ce   :  { %1365 = vmatpush.msra.mxu0 %v1352_v47 }
 0x4cf   :  { %v1559_v30 = vpop.eup %1558 }
 0x4d0   :  { %v1183_v33 = vmul.f32 %v1559_v30, %v1177_v32  ;;  %1366 = vmatpush.msra.mxu0 %v1351_v60 }
 0x4d2   :  { %1205 = vmatmul.f32.vlgmr.msrb.gmra.mxu0 %v1183_v33  ;;  %1225 = vmatmul.f32.vlgmr.msrb.gmra.mxu1 %v1183_v33 }
 0x4d3   :  { %1245 = vmatmul.f32.vlgmr.msrb.gmra.mxu2 %v1183_v33  ;;  %1265 = vmatmul.f32.vlgmr.msrb.gmra.mxu3 %v1183_v33 }
 0x4d4   :  { %1367 = vmatpush.msra.mxu0 %v1350_v63 }
 0x4d6   :  { %1368 = vmatpush.msra.mxu0 %v1349_v14 }
 0x4d8   :  { %1369 = vmatpush.msra.mxu0 %v1348_v34 }
 0x4da   :  { %1370 = vmatpush.msra.mxu0 %v1347_v40 }
 0x4dc   :  { %1371 = vmatpush.msra.mxu0 %v1346_v62 }
 0x4de   :  { %1372 = vmatpush.msra.mxu0 %v1345_v0 }
 0x4e0   :  { %1373 = vmatpush.msra.mxu0 %v1344_v38 }
 0x4e2   :  { %1374 = vmatpush.msra.mxu0 %v1343_v41 }
 0x4e4   :  { %1375 = vmatpush.msra.mxu0 %v1342_v52 }
 0x4e6   :  { %1376 = vmatpush.msra.mxu0 %v1341_v5 }
 0x54f   :  { %v1206_v56 = vpop.f32.mrf.mxu0  ;;  %v1226_v44 = vpop.f32.mrf.mxu1 }
 0x550   :  { %v1269_v53 = vadd.f32 %v1433_v36, %v1206_v56  ;;  %v1270_v46 = vadd.f32 %v1434_v37, %v1226_v44 }
 0x552   :  { %v1437_v45 = vmul.f32 -1.442695, %v1269_v53  ;;  %v1438_v57 = vmul.f32 -1.442695, %v1270_v46 }
 0x554   :  { %1560 = vpow2.f32 %v1437_v45 }
 0x555   :  { %1562 = vpow2.f32 %v1438_v57 }
 0x556   :  { %v1266_v58 = vpop.f32.mrf.mxu3  ;;  %v1246_v19 = vpop.f32.mrf.mxu2 }
 0x557   :  { %v1272_v48 = vadd.f32 %v1436_v55, %v1266_v58  ;;  %v1271_v1 = vadd.f32 %v1435_v2, %v1246_v19 }
 0x559   :  { %v1439_v12 = vmul.f32 -1.442695, %v1272_v48 }
 0x55a   :  { %v1561_v51 = vpop.eup %1560 }
 0x55b   :  { %v1563_v61 = vpop.eup %1562  ;;  %v1276_v59 = vadd.f32 1.0, %v1561_v51  ;;  %1564 = vpow2.f32 %v1439_v12 }
 0x55c   :  { %v1295_v54 = vadd.f32 1.0, %v1563_v61 }
 0x55d   :  { %1566 = vrcp.f32 %v1276_v59  ;;  %v1288_v11 = vand.u32 2147483648, %v1276_v59  ;;  %v1286_v13 = vand.u32 2147483647, %v1276_v59  ;;  %vm1282_vm6 = vweird.f32 %v1276_v59 }
 0x55e   :  { %1568 = vrcp.f32 %v1295_v54  ;;  %v1307_v6 = vand.u32 2147483648, %v1295_v54  ;;  %v1305_v16 = vand.u32 2147483647, %v1295_v54  ;;  %vm1301_vm7 = vweird.f32 %v1295_v54 }
 0x55f   :  { %v1289_v50 = vor.u32 1.1754944e-38, %v1288_v11  ;;  %vm1287_vm10 = vcmp.eq.f32.partialorder %v1286_v13, 8.507059e+37 }
 0x560   :  { %v1308_v23 = vor.u32 1.1754944e-38, %v1307_v6  ;;  %vm1306_vm11 = vcmp.eq.f32.partialorder %v1305_v16, 8.507059e+37 }
 0x561   :  { %v1565_v8 = vpop.eup %1564 }
 0x562   :  { %v1315_v20 = vadd.f32 1.0, %v1565_v8 }
 0x563   :  { %v1567_v4 = vpop.eup %1566 }
 0x564   :  { %v1569_v15 = vpop.eup %1568  ;;  %v1278_v3 = vmul.f32 %v1567_v4, %v1276_v59  ;;  %1570 = vrcp.f32 %v1315_v20  ;;  %vm1283_vm4 = vweird.f32 %v1567_v4  ;;  %v1327_v43 = vand.u32 2147483648, %v1315_v20 }
 0x565   :  { %v1297_v10 = vmul.f32 %v1569_v15, %v1295_v54  ;;  %1572 = vtanh.f32 %v1271_v1  ;;  %vm1302_vm5 = vweird.f32 %v1569_v15  ;;  %vm1284_vm8 = vmor %vm1282_vm6, %vm1283_vm4  ;;  %vm1321_vm13 = vweird.f32 %v1315_v20 }
 0x566   :  { %v1279_v7 = vsub.f32 1.0, %v1278_v3  ;;  %vm1303_vm9 = vmor %vm1301_vm7, %vm1302_vm5  ;;  %v1325_v47 = vand.u32 2147483647, %v1315_v20  ;;  %v1328_v63 = vor.u32 1.1754944e-38, %v1327_v43 }
 0x567   :  { %v1298_v18 = vsub.f32 1.0, %v1297_v10 }
 0x568   :  { %v1280_v49 = vmul.f32 %v1567_v4, %v1279_v7  ;;  %vm1326_vm15 = vcmp.eq.f32.partialorder %v1325_v47, 8.507059e+37 }
 0x569   :  { %v1299_v42 = vmul.f32 %v1569_v15, %v1298_v18 }
 0x56a   :  { %v1571_v17 = vpop.eup %1570  ;;  %v1281_v9 = vadd.f32 %v1567_v4, %v1280_v49 }
 0x56b   :  { %v1300_v21 = vadd.f32 %v1569_v15, %v1299_v42  ;;  %v1317_v22 = vmul.f32 %v1571_v17, %v1315_v20  ;;  %v1573_v26 = vpop.eup %1572  ;;  %vm1322_vm12 = vweird.f32 %v1571_v17 }
 0x56c   :  { %v1285_v25 = vsel %vm1284_vm8, %v1567_v4, %v1281_v9  ;;  %vm1323_vm14 = vmor %vm1321_vm13, %vm1322_vm12 }
 0x56d   :  { %v1290_v27 = vsel %vm1287_vm10, %v1289_v50, %v1285_v25  ;;  %v1304_v28 = vsel %vm1303_vm9, %v1569_v15, %v1300_v21  ;;  %v1318_v29 = vsub.f32 1.0, %v1317_v22 }
 0x56e   :  { %v1309_v30 = vsel %vm1306_vm11, %v1308_v23, %v1304_v28  ;;  %v1332_v32 = vmul.f32 %v1573_v26, %v1290_v27 }
 0x56f   :  { %v1331_v33 = vmul.f32 %v1309_v30, %v2606_v24  ;;  %v1319_v31 = vmul.f32 %v1571_v17, %v1318_v29  ;;  %v1447_v24 = vld [vmem:[%s2631_s3] ss:$0 sm:$0xff] }
 0x571   :  { %v1333_v35 = vadd.f32 %v1332_v32, %v1331_v33  ;;  %v1320_v39 = vadd.f32 %v1571_v17, %v1319_v31 }
 0x573   :  { %1574 = vtanh.f32 %v1333_v35  ;;  %v1324_v60 = vsel %vm1323_vm14, %v1571_v17, %v1320_v39 }
 0x574   :  { %v1329_v34 = vsel %vm1326_vm15, %v1328_v63, %v1324_v60 }
 0x579   :  { %v1575_v14 = vpop.eup %1574 }
 0x57a   :  { %v1335_v36 = vmul.f32 %v1575_v14, %v1329_v34 }
 0x57c   :  { %1377 = vmatmul.f32.vlgmr.msra.gmra.mxu0 %v1335_v36 }
 0x5f9   :  { %v1378_v37 = vpop.f32.mrf.mxu0 }
 0x5fa   :  { %v1379_v40 = vadd.f32 %v1447_v24, %v1378_v37 }
 0x5fc   :  { %1381 = vst [vmem:[%s2632_s4] sm:$0xff] %v1379_v40 }
 0x5fd   :  { %1386 = vsyncpa [#allocation5], 1 }
 0x5fe   :  { %1387 = vsyncpa [#allocation7], 1 }

</bundles_post_ra>
